<compile_context>
chip_gen: v7x
topology: tpu7x:2x2x1
jax: 0.10.0
libtpu: 0.0.40
codegen_flags: <defaults>
</compile_context>

<pallas_src>
import functools

import jax
import jax.numpy as jnp
from jax.experimental import pallas as pl
from jax.experimental.pallas import tpu as pltpu

IN_FEATURES = 784
F_PAD = 896          # 7 * 128: lane-aligned feature dimension
OUT_HW = (1, 28, 28)


def _round_up(x, m):
    return (x + m - 1) // m * m


def _decoder_kernel(x_ref, w1_ref, b1_ref, a1_ref, w2_ref, b2_ref, a2_ref, o_ref):
    # x: [TB, F_PAD] bf16; w1/w2: [F_PAD, F_PAD] bf16 (pre-transposed: y = x @ w + b)
    x = x_ref[...]

    # Linear 1 (bf16 MXU, f32 accumulation) + bias
    h = jnp.dot(x, w1_ref[...], preferred_element_type=jnp.float32) + b1_ref[...]
    # PReLU with per-feature slope broadcast over the batch tile
    h = jnp.where(h > 0.0, h, a1_ref[...] * h)

    # Linear 2 + bias (re-narrow to bf16 so the second matmul stays on the
    # fast bf16 MXU path)
    h = jnp.dot(h.astype(jnp.bfloat16), w2_ref[...],
                preferred_element_type=jnp.float32) + b2_ref[...]
    h = jnp.where(h > 0.0, h, a2_ref[...] * h)

    # Sigmoid: EUP exp + EUP approximate reciprocal (keeps the VALU divide free)
    o_ref[...] = pl.reciprocal(1.0 + jnp.exp(-h), approx=True)


@functools.partial(jax.jit, static_argnames=("tb",))
def lossless_decoder_forward(x, packed_params, *, tb=512):
    """x: [B, 784] float32 -> [B, 1, 28, 28] float32."""
    w1, b1, a1, w2, b2, a2 = packed_params
    B = x.shape[0]

    # Batch tile: 512 rows amortizes the per-grid-step overhead and feeds the
    # 256x256 MXU (v6e/v7x) with two full passes; clamp for tiny batches while
    # keeping bf16 sublane (16) alignment.
    TB = min(tb, _round_up(B, 16))
    Bp = _round_up(B, TB)

    # Zero-pad batch -> Bp and features -> F_PAD; cast activations to bf16.
    x_pad = jnp.zeros((Bp, F_PAD), jnp.bfloat16)
    x_pad = x_pad.at[:B, :IN_FEATURES].set(x.astype(jnp.bfloat16))

    tile = lambda i: (i, 0)      # x / out: walk the batch axis
    resident = lambda i: (0, 0)  # weights / biases: same block every grid step

    y_pad = pl.pallas_call(
        _decoder_kernel,
        out_shape=jax.ShapeDtypeStruct((Bp, F_PAD), jnp.float32),
        grid=(Bp // TB,),
        in_specs=[
            pl.BlockSpec((TB, F_PAD), tile),         # x
            pl.BlockSpec((F_PAD, F_PAD), resident),  # w1
            pl.BlockSpec((1, F_PAD), resident),      # b1
            pl.BlockSpec((1, F_PAD), resident),      # a1 (PReLU slopes)
            pl.BlockSpec((F_PAD, F_PAD), resident),  # w2
            pl.BlockSpec((1, F_PAD), resident),      # b2
            pl.BlockSpec((1, F_PAD), resident),      # a2
        ],
        out_specs=pl.BlockSpec((TB, F_PAD), tile),
        compiler_params=pltpu.CompilerParams(
            dimension_semantics=("parallel",),
            vmem_limit_bytes=48 << 20,   # headroom under v7x's 64 MiB VMEM
        ),
    )(x_pad, w1, b1, a1, w2, b2, a2)

    # Drop batch/feature padding, then nn.Unflatten(-1 -> (1, 28, 28)).
    return y_pad[:B, :IN_FEATURES].reshape((B,) + OUT_HW)


def init_params(key):
    """Deterministic init matching the PyTorch module's parameter shapes.

    nn.Linear default: U(-1/sqrt(fan_in), 1/sqrt(fan_in)) for weight & bias.
    nn.PReLU default: slopes initialized to 0.25.
    Weights are stored pre-transposed ([in, out]) so y = x @ W + b.
    """
    k1, k2, k3, k4 = jax.random.split(key, 4)
    bound = 1.0 / jnp.sqrt(jnp.float32(IN_FEATURES))
    w1 = jax.random.uniform(k1, (IN_FEATURES, IN_FEATURES), jnp.float32, -bound, bound)
    b1 = jax.random.uniform(k2, (1, IN_FEATURES), jnp.float32, -bound, bound)
    w2 = jax.random.uniform(k3, (IN_FEATURES, IN_FEATURES), jnp.float32, -bound, bound)
    b2 = jax.random.uniform(k4, (1, IN_FEATURES), jnp.float32, -bound, bound)
    a1 = jnp.full((1, IN_FEATURES), 0.25, jnp.float32)
    a2 = jnp.full((1, IN_FEATURES), 0.25, jnp.float32)
    return (w1, b1, a1, w2, b2, a2)


def pack_params(params):
    """One-time packing: pad 784 -> 896 and cast weights to bf16.

    Zero padding is exact: padded input features are zero (contribute nothing),
    padded output features get 0 pre-activation -> PReLU(0) = 0, and the
    wrapper slices the padded columns/rows off after the kernel.
    """
    w1, b1, a1, w2, b2, a2 = params

    def pad_mat(w):
        wp = jnp.zeros((F_PAD, F_PAD), jnp.float32)
        wp = wp.at[:IN_FEATURES, :IN_FEATURES].set(w)
        return wp.astype(jnp.bfloat16)

    def pad_vec(v):
        return jnp.zeros((1, F_PAD), jnp.float32).at[:, :IN_FEATURES].set(v)

    return (pad_mat(w1), pad_vec(b1), pad_vec(a1),
            pad_mat(w2), pad_vec(b2), pad_vec(a2))


def _reference(x, params):
    """Pure f32 reference matching the PyTorch module."""
    w1, b1, a1, w2, b2, a2 = params
    h = x @ w1 + b1
    h = jnp.where(h > 0, h, a1 * h)
    h = h @ w2 + b2
    h = jnp.where(h > 0, h, a2 * h)
    return jax.nn.sigmoid(h).reshape((x.shape[0],) + OUT_HW)


if __name__ == "__main__":
    key = jax.random.PRNGKey(0)
    kp, kx = jax.random.split(key)
    params = init_params(kp)
    packed = pack_params(params)

    B = 2
    x = jax.random.normal(kx, (B, IN_FEATURES), jnp.float32)

    y = lossless_decoder_forward(x, packed)
    y = jax.block_until_ready(y)

    y_ref = _reference(x, params)
    assert y.shape == (B, 1, 28, 28), y.shape
    # bf16 weights/activations + approximate EUP reciprocal vs. pure-f32 reference.
    err = float(jnp.max(jnp.abs(y - y_ref)))
    assert err < 1e-2, err

    print("KERNEL_OK")
</pallas_src>

<mosaic_0001>
module attributes {stable_mosaic.version = 11 : i64} {
  func.func @_decoder_kernel(%arg0: i32, %arg1: memref<16x896xbf16, #tpu.memory_space<vmem>>, %arg2: memref<896x896xbf16, #tpu.memory_space<vmem>>, %arg3: memref<1x896xf32, #tpu.memory_space<vmem>>, %arg4: memref<1x896xf32, #tpu.memory_space<vmem>>, %arg5: memref<896x896xbf16, #tpu.memory_space<vmem>>, %arg6: memref<1x896xf32, #tpu.memory_space<vmem>>, %arg7: memref<1x896xf32, #tpu.memory_space<vmem>>, %arg8: memref<16x896xf32, #tpu.memory_space<vmem>>) attributes {dimension_semantics = [#tpu.dimension_semantics<parallel>], iteration_bounds = array<i64: 1>, scalar_prefetch = 0 : i64, scratch_operands = 0 : i64, tpu.core_type = #tpu.core_type<tc>, window_params = [{transform_indices = @transform_0, window_bounds = array<i64: 16, 896>}, {pipeline_mode = #tpu.pipeline_mode<synchronous>, transform_indices = @transform_1, window_bounds = array<i64: 896, 896>}, {pipeline_mode = #tpu.pipeline_mode<synchronous>, transform_indices = @transform_2, window_bounds = array<i64: 1, 896>}, {pipeline_mode = #tpu.pipeline_mode<synchronous>, transform_indices = @transform_3, window_bounds = array<i64: 1, 896>}, {pipeline_mode = #tpu.pipeline_mode<synchronous>, transform_indices = @transform_4, window_bounds = array<i64: 896, 896>}, {pipeline_mode = #tpu.pipeline_mode<synchronous>, transform_indices = @transform_5, window_bounds = array<i64: 1, 896>}, {pipeline_mode = #tpu.pipeline_mode<synchronous>, transform_indices = @transform_6, window_bounds = array<i64: 1, 896>}, {transform_indices = @transform_7, window_bounds = array<i64: 16, 896>}]} {
    %c0 = arith.constant 0 : index
    %c0_0 = arith.constant 0 : index
    %0 = vector.load %arg1[%c0, %c0_0] : memref<16x896xbf16, #tpu.memory_space<vmem>>, vector<16x896xbf16>
    %c0_1 = arith.constant 0 : index
    %c0_2 = arith.constant 0 : index
    %1 = vector.load %arg2[%c0_1, %c0_2] : memref<896x896xbf16, #tpu.memory_space<vmem>>, vector<896x896xbf16>
    %cst = arith.constant dense<0.000000e+00> : vector<16x896xf32>
    %2 = tpu.matmul %0, %1, %cst {dimension_numbers = #tpu.dot_dimension_numbers<[1], [0], [0], [1], [0, 0, 1, 1], [], []>} : vector<16x896xbf16>, vector<896x896xbf16>, vector<16x896xf32> -> vector<16x896xf32>
    %c0_3 = arith.constant 0 : index
    %c0_4 = arith.constant 0 : index
    %3 = vector.load %arg3[%c0_3, %c0_4] : memref<1x896xf32, #tpu.memory_space<vmem>>, vector<1x896xf32>
    %4 = vector.broadcast %3 : vector<1x896xf32> to vector<16x896xf32>
    %5 = arith.addf %2, %4 : vector<16x896xf32>
    %cst_5 = arith.constant 0.000000e+00 : f32
    %6 = vector.broadcast %cst_5 : f32 to vector<16x896xf32>
    %7 = arith.cmpf ogt, %5, %6 : vector<16x896xf32>
    %c0_6 = arith.constant 0 : index
    %c0_7 = arith.constant 0 : index
    %8 = vector.load %arg4[%c0_6, %c0_7] : memref<1x896xf32, #tpu.memory_space<vmem>>, vector<1x896xf32>
    %9 = vector.broadcast %8 : vector<1x896xf32> to vector<16x896xf32>
    %10 = arith.mulf %9, %5 : vector<16x896xf32>
    %11 = arith.select %7, %5, %10 : vector<16x896xi1>, vector<16x896xf32>
    %12 = arith.truncf %11 : vector<16x896xf32> to vector<16x896xbf16>
    %c0_8 = arith.constant 0 : index
    %c0_9 = arith.constant 0 : index
    %13 = vector.load %arg5[%c0_8, %c0_9] : memref<896x896xbf16, #tpu.memory_space<vmem>>, vector<896x896xbf16>
    %cst_10 = arith.constant dense<0.000000e+00> : vector<16x896xf32>
    %14 = tpu.matmul %12, %13, %cst_10 {dimension_numbers = #tpu.dot_dimension_numbers<[1], [0], [0], [1], [0, 0, 1, 1], [], []>} : vector<16x896xbf16>, vector<896x896xbf16>, vector<16x896xf32> -> vector<16x896xf32>
    %c0_11 = arith.constant 0 : index
    %c0_12 = arith.constant 0 : index
    %15 = vector.load %arg6[%c0_11, %c0_12] : memref<1x896xf32, #tpu.memory_space<vmem>>, vector<1x896xf32>
    %16 = vector.broadcast %15 : vector<1x896xf32> to vector<16x896xf32>
    %17 = arith.addf %14, %16 : vector<16x896xf32>
    %cst_13 = arith.constant 0.000000e+00 : f32
    %18 = vector.broadcast %cst_13 : f32 to vector<16x896xf32>
    %19 = arith.cmpf ogt, %17, %18 : vector<16x896xf32>
    %c0_14 = arith.constant 0 : index
    %c0_15 = arith.constant 0 : index
    %20 = vector.load %arg7[%c0_14, %c0_15] : memref<1x896xf32, #tpu.memory_space<vmem>>, vector<1x896xf32>
    %21 = vector.broadcast %20 : vector<1x896xf32> to vector<16x896xf32>
    %22 = arith.mulf %21, %17 : vector<16x896xf32>
    %23 = arith.select %19, %17, %22 : vector<16x896xi1>, vector<16x896xf32>
    %cst_16 = arith.constant 0.000000e+00 : f32
    %24 = vector.broadcast %cst_16 : f32 to vector<16x896xf32>
    %25 = arith.subf %24, %23 : vector<16x896xf32>
    %26 = math.exp %25 : vector<16x896xf32>
    %cst_17 = arith.constant 1.000000e+00 : f32
    %27 = vector.broadcast %cst_17 : f32 to vector<16x896xf32>
    %28 = arith.addf %27, %26 : vector<16x896xf32>
    %29 = tpu.reciprocal %28 {approx = true} : vector<16x896xf32> -> vector<16x896xf32>
    %c0_18 = arith.constant 0 : index
    %c0_19 = arith.constant 0 : index
    %30 = vector.load %arg8[%c0_18, %c0_19] : memref<16x896xf32, #tpu.memory_space<vmem>>, vector<16x896xf32>
    tpu.vector_store %arg8[%c0_18, %c0_19], %29 {strides = array<i32>} : memref<16x896xf32, #tpu.memory_space<vmem>>, vector<16x896xf32>,
    return
  }
  func.func @transform_0(%arg0: i32) -> (i32, i32) {
    %c0_i32 = arith.constant 0 : i32
    %c0_i32_0 = arith.constant 0 : i32
    return %arg0, %c0_i32 : i32, i32
  }
  func.func @transform_1(%arg0: i32) -> (i32, i32) {
    %c0_i32 = arith.constant 0 : i32
    %c0_i32_0 = arith.constant 0 : i32
    %c0_i32_1 = arith.constant 0 : i32
    return %c0_i32, %c0_i32_0 : i32, i32
  }
  func.func @transform_2(%arg0: i32) -> (i32, i32) {
    %c0_i32 = arith.constant 0 : i32
    %c0_i32_0 = arith.constant 0 : i32
    %c0_i32_1 = arith.constant 0 : i32
    return %c0_i32, %c0_i32_0 : i32, i32
  }
  func.func @transform_3(%arg0: i32) -> (i32, i32) {
    %c0_i32 = arith.constant 0 : i32
    %c0_i32_0 = arith.constant 0 : i32
    %c0_i32_1 = arith.constant 0 : i32
    return %c0_i32, %c0_i32_0 : i32, i32
  }
  func.func @transform_4(%arg0: i32) -> (i32, i32) {
    %c0_i32 = arith.constant 0 : i32
    %c0_i32_0 = arith.constant 0 : i32
    %c0_i32_1 = arith.constant 0 : i32
    return %c0_i32, %c0_i32_0 : i32, i32
  }
  func.func @transform_5(%arg0: i32) -> (i32, i32) {
    %c0_i32 = arith.constant 0 : i32
    %c0_i32_0 = arith.constant 0 : i32
    %c0_i32_1 = arith.constant 0 : i32
    return %c0_i32, %c0_i32_0 : i32, i32
  }
  func.func @transform_6(%arg0: i32) -> (i32, i32) {
    %c0_i32 = arith.constant 0 : i32
    %c0_i32_0 = arith.constant 0 : i32
    %c0_i32_1 = arith.constant 0 : i32
    return %c0_i32, %c0_i32_0 : i32, i32
  }
  func.func @transform_7(%arg0: i32) -> (i32, i32) {
    %c0_i32 = arith.constant 0 : i32
    %c0_i32_0 = arith.constant 0 : i32
    return %arg0, %c0_i32 : i32, i32
  }
}

</mosaic_0001>

<bundles_post_ra>
// kernel: lossless_decoder_forward.1
= control target key start
LH: loop header
LB: loop body
LE: loop exit
PB: predicated region body
PF: predicated region fallthrough
CT: control target
= control target key end

     0   :  { %12 = vsyncpa [#allocation3], 0  ;;  %s9586_s0 = inlined_call_operand.vmem [shape: bf16[16,896], index: 0, kind: input, shape index: {}]   ;;  %s9587_s1 = inlined_call_operand.hbm [shape: bf16[896,896], index: 1, kind: input, shape index: {}]   ;;  %s9588_s2 = inlined_call_operand.hbm [shape: f32[1,896], index: 2, kind: input, shape index: {}]   ;;  %s9589_s3 = inlined_call_operand.hbm [shape: f32[1,896], index: 3, kind: input, shape index: {}]   ;;  %s9590_s4 = inlined_call_operand.hbm [shape: bf16[896,896], index: 4, kind: input, shape index: {}]   ;;  %s9591_s5 = inlined_call_operand.hbm [shape: f32[1,896], index: 5, kind: input, shape index: {}]   ;;  %s9592_s6 = inlined_call_operand.hbm [shape: f32[1,896], index: 6, kind: input, shape index: {}]   ;;  %s9593_s7 = inlined_call_operand.vmem [shape: f32[16,896], index: 7, kind: output, shape index: {}]  }
   0x1   :  { %13 = vsyncpa [#allocation5], 0 }
   0x2   :  { %14 = vsyncpa [#allocation8], 0 }
   0x3   :  { %15 = vsyncpa [#allocation11], 0  ;;  %s9187_s24 = smov [#allocation4]   ;;  %s9047_s28 = scalar_lea.hbm %s9588_s2, 112 }
   0x4   :  { %s36_s25 = sshll.u32 %s9187_s24, 4  ;;  %p9048_p0 = scmp.ne.s32.totalorder %s9588_s2, %s9047_s28  ;;  %s37_s25 = int_to_ptr.vmem [resolvable:$true] %s36_s25 }
   0x5   :  { %p9051_p1 = scmp.lt.u32.totalorder %s9047_s28, %s9588_s2 }
   0x7   :  { %p9053_p2 = pnand %p9051_p1, %p9048_p0 }
   0x9   :  { %9056 = shalt.err (!%p9053_p2)
}
   0xa   :  { %s9057_s10 = scalar_lea.vmem %s37_s25, 112  ;;  %s9061_s11 = scalar_lea.vmem %s37_s25, 128 }
   0xb   :  { %p9058_p3 = scmp.ne.s32.totalorder %s37_s25, %s9057_s10  ;;  %p9062_p4 = scmp.lt.s32.totalorder %s37_s25, %s37_s25 }
   0xc   :  { %p9063_p5 = scmp.lt.s32.totalorder %s9061_s11, %s9057_s10 }
   0xe   :  { %p9064_p6 = por %p9063_p5, %p9062_p4 }
  0x10   :  { %p9065_p7 = pnand %p9064_p6, %p9058_p3 }
  0x12   :  { %9068 = shalt.err (!%p9065_p7)
}
  0x13   :  { %39 = dma.hbm_to_vmem [thread:$0]  %s9588_s2, 112, %s37_s25, [#allocation5]  }
  0x14   :  { %s9188_s14 = smov [#allocation7]   ;;  %s9189_s16 = smov [#allocation2]  }
  0x15   :  { %s55_s15 = sshll.u32 %s9188_s14, 4  ;;  %s23_s17 = sshll.u32 %s9189_s16, 4  ;;  %s56_s15 = int_to_ptr.vmem [resolvable:$true] %s55_s15  ;;  %s24_s17 = int_to_ptr.vmem [resolvable:$true] %s23_s17 }
  0x16   :  { %s9069_s20 = scalar_lea.hbm %s9590_s4, 50176 }
  0x17   :  { %p9070_p8 = scmp.ne.s32.totalorder %s9590_s4, %s9069_s20  ;;  %p9073_p9 = scmp.lt.u32.totalorder %s9069_s20, %s9590_s4 }
  0x19   :  { %p9075_p10 = pnand %p9073_p9, %p9070_p8 }
  0x1b   :  { %9078 = shalt.err (!%p9075_p10)
}
  0x1c   :  { %s9079_s2 = scalar_lea.vmem %s56_s15, 50176  ;;  %p9084_p12 = scmp.lt.s32.totalorder %s56_s15, %s56_s15 }
  0x1d   :  { %p9080_p11 = scmp.ne.s32.totalorder %s56_s15, %s9079_s2  ;;  %p9085_p13 = scmp.lt.s32.totalorder %s9079_s2, %s9079_s2 }
  0x1f   :  { %p9086_p0 = por %p9085_p13, %p9084_p12 }
  0x21   :  { %p9087_p1 = pnand %p9086_p0, %p9080_p11 }
  0x23   :  { %9090 = shalt.err (!%p9087_p1)
}
  0x24   :  { %s9190_s25 = smov 448   ;;  %s9191_s26 = smov 28  }
  0x25   :  { %61 = dma.hbm_to_vmem [thread:$0]  %s9590_s4, 50176, %s56_s15, [#allocation8], %s9190_s25, %s9190_s25, %s9191_s26  }
  0x26   :  { %s9091_s8 = scalar_lea.hbm %s9587_s1, 50176 }
  0x27   :  { %p9092_p2 = scmp.ne.s32.totalorder %s9587_s1, %s9091_s8  ;;  %p9095_p3 = scmp.lt.u32.totalorder %s9091_s8, %s9587_s1 }
  0x29   :  { %p9097_p4 = pnand %p9095_p3, %p9092_p2 }
  0x2b   :  { %9100 = shalt.err (!%p9097_p4)
}
  0x2c   :  { %s9101_s13 = scalar_lea.vmem %s24_s17, 50176  ;;  %p9106_p6 = scmp.lt.s32.totalorder %s24_s17, %s24_s17 }
  0x2d   :  { %p9102_p5 = scmp.ne.s32.totalorder %s24_s17, %s9101_s13  ;;  %p9107_p7 = scmp.lt.s32.totalorder %s9101_s13, %s9101_s13 }
  0x2f   :  { %p9108_p8 = por %p9107_p7, %p9106_p6 }
  0x31   :  { %p9109_p9 = pnand %p9108_p8, %p9102_p5 }
  0x33   :  { %9112 = shalt.err (!%p9109_p9)
}
  0x34   :  { %29 = dma.hbm_to_vmem [thread:$0]  %s9587_s1, 50176, %s24_s17, [#allocation3], %s9190_s25, %s9190_s25, %s9191_s26  }
  0x35   :  { %s9192_s15 = smov [#allocation6]   ;;  %s9193_s18 = smov [#allocation9]  }
  0x36   :  { %s46_s16 = sshll.u32 %s9192_s15, 4  ;;  %s68_s19 = sshll.u32 %s9193_s18, 4  ;;  %s47_s16 = int_to_ptr.vmem [resolvable:$true] %s46_s16  ;;  %s69_s19 = int_to_ptr.vmem [resolvable:$true] %s68_s19 }
  0x37   :  { %s9113_s22 = scalar_lea.hbm %s9589_s3, 112 }
  0x38   :  { %p9114_p10 = scmp.ne.s32.totalorder %s9589_s3, %s9113_s22  ;;  %p9117_p11 = scmp.lt.u32.totalorder %s9113_s22, %s9589_s3 }
  0x3a   :  { %p9119_p12 = pnand %p9117_p11, %p9114_p10 }
  0x3c   :  { %9122 = shalt.err (!%p9119_p12)
}
  0x3d   :  { %s9123_s1 = scalar_lea.vmem %s47_s16, 112  ;;  %s9127_s17 = scalar_lea.vmem %s47_s16, 128 }
  0x3e   :  { %p9124_p13 = scmp.ne.s32.totalorder %s47_s16, %s9123_s1  ;;  %p9128_p0 = scmp.lt.s32.totalorder %s47_s16, %s47_s16 }
  0x3f   :  { %p9129_p1 = scmp.lt.s32.totalorder %s9127_s17, %s9123_s1 }
  0x41   :  { %p9130_p2 = por %p9129_p1, %p9128_p0 }
  0x43   :  { %p9131_p3 = pnand %p9130_p2, %p9124_p13 }
  0x45   :  { %9134 = shalt.err (!%p9131_p3)
}
  0x46   :  { %49 = dma.hbm_to_vmem [thread:$0]  %s9589_s3, 112, %s47_s16, [#allocation5]  }
  0x47   :  { %s9135_s30 = scalar_lea.hbm %s9591_s5, 112 }
  0x48   :  { %p9136_p4 = scmp.ne.s32.totalorder %s9591_s5, %s9135_s30  ;;  %p9139_p5 = scmp.lt.u32.totalorder %s9135_s30, %s9591_s5 }
  0x4a   :  { %p9141_p6 = pnand %p9139_p5, %p9136_p4 }
  0x4c   :  { %9144 = shalt.err (!%p9141_p6)
}
  0x4d   :  { %s9145_s12 = scalar_lea.vmem %s69_s19, 112  ;;  %s9149_s13 = scalar_lea.vmem %s69_s19, 128 }
  0x4e   :  { %p9146_p7 = scmp.ne.s32.totalorder %s69_s19, %s9145_s12  ;;  %p9150_p8 = scmp.lt.s32.totalorder %s69_s19, %s69_s19 }
  0x4f   :  { %p9151_p9 = scmp.lt.s32.totalorder %s9149_s13, %s9145_s12 }
  0x51   :  { %p9152_p10 = por %p9151_p9, %p9150_p8 }
  0x53   :  { %p9153_p11 = pnand %p9152_p10, %p9146_p7 }
  0x55   :  { %9156 = shalt.err (!%p9153_p11)
}
  0x56   :  { %71 = dma.hbm_to_vmem [thread:$0]  %s9591_s5, 112, %s69_s19, [#allocation8]  }
  0x57   :  { %s9194_s14 = smov [#allocation10]   ;;  %s9157_s20 = scalar_lea.hbm %s9592_s6, 112 }
  0x58   :  { %s78_s15 = sshll.u32 %s9194_s14, 4  ;;  %p9158_p12 = scmp.ne.s32.totalorder %s9592_s6, %s9157_s20  ;;  %s79_s15 = int_to_ptr.vmem [resolvable:$true] %s78_s15 }
  0x59   :  { %p9161_p13 = scmp.lt.u32.totalorder %s9157_s20, %s9592_s6 }
  0x5b   :  { %p9163_p0 = pnand %p9161_p13, %p9158_p12 }
  0x5d   :  { %9166 = shalt.err (!%p9163_p0)
}
  0x5e   :  { %s9167_s2 = scalar_lea.vmem %s79_s15, 112  ;;  %s9171_s5 = scalar_lea.vmem %s79_s15, 128 }
  0x5f   :  { %p9168_p1 = scmp.ne.s32.totalorder %s79_s15, %s9167_s2  ;;  %p9172_p2 = scmp.lt.s32.totalorder %s79_s15, %s79_s15 }
  0x60   :  { %p9173_p3 = scmp.lt.s32.totalorder %s9171_s5, %s9167_s2 }
  0x62   :  { %p9174_p4 = por %p9173_p3, %p9172_p2 }
  0x64   :  { %p9175_p5 = pnand %p9174_p4, %p9168_p1 }
  0x66   :  { %9178 = shalt.err (!%p9175_p5)
}
  0x67   :  { %81 = dma.hbm_to_vmem [thread:$0]  %s9592_s6, 112, %s79_s15, [#allocation11]  }
  0x68   :  { %9179 = dma.done.wait [#allocation3], 50176  }
  0x69   :  { %9180 = vsyncadd [#allocation3], 4294917120 }
  0x6a   :  { %9181 = dma.done.wait [#allocation5], 224  }
  0x6b   :  { %9182 = vsyncadd [#allocation5], 4294967072 }
  0x6c   :  { %9183 = dma.done.wait [#allocation8], 50288  }
  0x6d   :  { %9184 = vsyncadd [#allocation8], 4294917008 }
  0x6e   :  { %9185 = dma.done.wait [#allocation11], 112  }
  0x6f   :  { %9186 = vsyncadd [#allocation11], 4294967184  ;;  %v7852_v0 = vld [vmem:[#allocation2 + $0x4] ss:$28 sps:$4 sm:$0xff]   ;;  %v7854_v1 = vld [vmem:[#allocation2 + $0xc] ss:$28 sps:$4 sm:$0xff]  }
  0x70   :  { %2646 = vmatprep.subr.bf16.mxu0 %v7852_v0  ;;  %v7856_v2 = vld [vmem:[#allocation2] ss:$28 sps:$4 sm:$0xff]   ;;  %v7857_v3 = vld [vmem:[#allocation2 + $0x8] ss:$28 sps:$4 sm:$0xff]   ;;  %2818 = vmatprep.subr.bf16.mxu1 %v7854_v1  ;;  %v7862_v6 = vld [vmem:[#allocation2 + $0x38] ss:$28 sps:$4 sm:$0xff]  }
  0x71   :  { %v7858_v4 = vld [vmem:[#allocation2 + $0x3c] ss:$28 sps:$4 sm:$0xff]   ;;  %2647 = vmatpush1.bf16.msra.mxu0 %v7856_v2  ;;  %2819 = vmatpush1.bf16.msra.mxu1 %v7857_v3  ;;  %v7860_v5 = vld [vmem:[#allocation2 + $0x44] ss:$28 sps:$4 sm:$0xff]   ;;  %v7864_v8 = vld [vmem:[#allocation2 + $0x74] ss:$28 sps:$4 sm:$0xff]  }
  0x72   :  { %2648 = vmatprep.subr.bf16.mxu0 %v7858_v4  ;;  %v7863_v7 = vld [vmem:[#allocation2 + $0x40] ss:$28 sps:$4 sm:$0xff]   ;;  %2820 = vmatprep.subr.bf16.mxu1 %v7860_v5  ;;  %v7868_v10 = vld [vmem:[#allocation2 + $0x70] ss:$28 sps:$4 sm:$0xff]   ;;  %v7869_v11 = vld [vmem:[#allocation2 + $0x78] ss:$28 sps:$4 sm:$0xff]  }
  0x73   :  { %v7866_v9 = vld [vmem:[#allocation2 + $0x7c] ss:$28 sps:$4 sm:$0xff]   ;;  %v7870_v12 = vld [vmem:[#allocation2 + $0xac] ss:$28 sps:$4 sm:$0xff]   ;;  %v7872_v13 = vld [vmem:[#allocation2 + $0xb4] ss:$28 sps:$4 sm:$0xff]  }
  0x74   :  { %v7874_v14 = vld [vmem:[#allocation2 + $0xa8] ss:$28 sps:$4 sm:$0xff]   ;;  %v7875_v15 = vld [vmem:[#allocation2 + $0xb0] ss:$28 sps:$4 sm:$0xff]   ;;  %v7880_v18 = vld [vmem:[#allocation2 + $0xe0] ss:$28 sps:$4 sm:$0xff]  }
  0x75   :  { %2649 = vmatpush1.bf16.msra.mxu0 %v7862_v6  ;;  %2821 = vmatpush1.bf16.msra.mxu1 %v7863_v7  ;;  %v7876_v16 = vld [vmem:[#allocation2 + $0xe4] ss:$28 sps:$4 sm:$0xff]   ;;  %v7878_v17 = vld [vmem:[#allocation2 + $0xec] ss:$28 sps:$4 sm:$0xff]   ;;  %v7882_v20 = vld [vmem:[#allocation2 + $0x11c] ss:$28 sps:$4 sm:$0xff]  }
  0x76   :  { %2650 = vmatprep.subr.bf16.mxu0 %v7864_v8  ;;  %2822 = vmatprep.subr.bf16.mxu1 %v7866_v9  ;;  %v7881_v19 = vld [vmem:[#allocation2 + $0xe8] ss:$28 sps:$4 sm:$0xff]   ;;  %v7886_v22 = vld [vmem:[#allocation2 + $0x118] ss:$28 sps:$4 sm:$0xff]   ;;  %v7887_v23 = vld [vmem:[#allocation2 + $0x120] ss:$28 sps:$4 sm:$0xff]  }
  0x77   :  { %v7884_v21 = vld [vmem:[#allocation2 + $0x124] ss:$28 sps:$4 sm:$0xff]   ;;  %v7888_v24 = vld [vmem:[#allocation2 + $0x154] ss:$28 sps:$4 sm:$0xff]   ;;  %v7890_v25 = vld [vmem:[#allocation2 + $0x15c] ss:$28 sps:$4 sm:$0xff]  }
  0x78   :  { %v7892_v26 = vld [vmem:[#allocation2 + $0x150] ss:$28 sps:$4 sm:$0xff]   ;;  %v7893_v27 = vld [vmem:[#allocation2 + $0x158] ss:$28 sps:$4 sm:$0xff]   ;;  %v7898_v30 = vld [vmem:[#allocation2 + $0x188] ss:$28 sps:$4 sm:$0xff]  }
  0x79   :  { %2651 = vmatpush1.bf16.msra.mxu0 %v7868_v10  ;;  %2823 = vmatpush1.bf16.msra.mxu1 %v7869_v11  ;;  %v7894_v28 = vld [vmem:[#allocation2 + $0x18c] ss:$28 sps:$4 sm:$0xff]   ;;  %v7896_v29 = vld [vmem:[#allocation2 + $0x194] ss:$28 sps:$4 sm:$0xff]   ;;  %v7900_v32 = vld [vmem:[#allocation2 + $0x1c4] ss:$28 sps:$4 sm:$0xff]  }
  0x7a   :  { %2652 = vmatprep.subr.bf16.mxu0 %v7870_v12  ;;  %2824 = vmatprep.subr.bf16.mxu1 %v7872_v13  ;;  %v7899_v31 = vld [vmem:[#allocation2 + $0x190] ss:$28 sps:$4 sm:$0xff]   ;;  %v7904_v34 = vld [vmem:[#allocation2 + $0x1c0] ss:$28 sps:$4 sm:$0xff]   ;;  %v7905_v35 = vld [vmem:[#allocation2 + $0x1c8] ss:$28 sps:$4 sm:$0xff]  }
  0x7b   :  { %v7902_v33 = vld [vmem:[#allocation2 + $0x1cc] ss:$28 sps:$4 sm:$0xff]   ;;  %v7906_v36 = vld [vmem:[#allocation2 + $0x1fc] ss:$28 sps:$4 sm:$0xff]   ;;  %v7908_v37 = vld [vmem:[#allocation2 + $0x204] ss:$28 sps:$4 sm:$0xff]  }
  0x7c   :  { %v7910_v38 = vld [vmem:[#allocation2 + $0x1f8] ss:$28 sps:$4 sm:$0xff]   ;;  %v7911_v39 = vld [vmem:[#allocation2 + $0x200] ss:$28 sps:$4 sm:$0xff]   ;;  %v7916_v42 = vld [vmem:[#allocation2 + $0x230] ss:$28 sps:$4 sm:$0xff]  }
  0x7d   :  { %2653 = vmatpush1.bf16.msra.mxu0 %v7874_v14  ;;  %2825 = vmatpush1.bf16.msra.mxu1 %v7875_v15  ;;  %v7912_v40 = vld [vmem:[#allocation2 + $0x234] ss:$28 sps:$4 sm:$0xff]   ;;  %v7914_v41 = vld [vmem:[#allocation2 + $0x23c] ss:$28 sps:$4 sm:$0xff]   ;;  %v7918_v44 = vld [vmem:[#allocation2 + $0x26c] ss:$28 sps:$4 sm:$0xff]  }
  0x7e   :  { %2654 = vmatprep.subr.bf16.mxu0 %v7876_v16  ;;  %2826 = vmatprep.subr.bf16.mxu1 %v7878_v17  ;;  %v7917_v43 = vld [vmem:[#allocation2 + $0x238] ss:$28 sps:$4 sm:$0xff]   ;;  %v7922_v46 = vld [vmem:[#allocation2 + $0x268] ss:$28 sps:$4 sm:$0xff]   ;;  %v7923_v48 = vld [vmem:[#allocation2 + $0x270] ss:$28 sps:$4 sm:$0xff]  }
  0x7f   :  { %v7920_v45 = vld [vmem:[#allocation2 + $0x274] ss:$28 sps:$4 sm:$0xff]   ;;  %v7948_v47 = vld [vmem:[%s9586_s0 + $0x4] ss:$28 sps:$4 sm:$0xff]   ;;  %v7926_v50 = vld [vmem:[#allocation2 + $0x2ac] ss:$28 sps:$4 sm:$0xff]  }
  0x80   :  { %v7924_v49 = vld [vmem:[#allocation2 + $0x2a4] ss:$28 sps:$4 sm:$0xff]   ;;  %2678 = vmatprep.mubr.bf16.mxu0 %v7948_v47  ;;  %2850 = vmatprep.mubr.bf16.mxu1 %v7948_v47  ;;  %v7930_v53 = vld [vmem:[#allocation2 + $0x2dc] ss:$28 sps:$4 sm:$0xff]   ;;  %v7936_v57 = vld [vmem:[#allocation2 + $0x314] ss:$28 sps:$4 sm:$0xff]  }
  0x81   :  { %2655 = vmatpush1.bf16.msra.mxu0 %v7880_v18  ;;  %2827 = vmatpush1.bf16.msra.mxu1 %v7881_v19  ;;  %v7928_v51 = vld [vmem:[#allocation2 + $0x2a0] ss:$28 sps:$4 sm:$0xff]   ;;  %v7929_v52 = vld [vmem:[#allocation2 + $0x2a8] ss:$28 sps:$4 sm:$0xff]   ;;  %v7934_v55 = vld [vmem:[#allocation2 + $0x2d8] ss:$28 sps:$4 sm:$0xff]  }
  0x82   :  { %2656 = vmatprep.subr.bf16.mxu0 %v7882_v20  ;;  %2828 = vmatprep.subr.bf16.mxu1 %v7884_v21  ;;  %v7932_v54 = vld [vmem:[#allocation2 + $0x2e4] ss:$28 sps:$4 sm:$0xff]   ;;  %v7938_v58 = vld [vmem:[#allocation2 + $0x31c] ss:$28 sps:$4 sm:$0xff]   ;;  %v7940_v59 = vld [vmem:[#allocation2 + $0x310] ss:$28 sps:$4 sm:$0xff]  }
  0x83   :  { %v7935_v56 = vld [vmem:[#allocation2 + $0x2e0] ss:$28 sps:$4 sm:$0xff]   ;;  %v7941_v60 = vld [vmem:[#allocation2 + $0x318] ss:$28 sps:$4 sm:$0xff]   ;;  %v7942_v61 = vld [vmem:[#allocation2 + $0x34c] ss:$28 sps:$4 sm:$0xff]  }
  0x84   :  { %v7944_v62 = vld [vmem:[#allocation2 + $0x354] ss:$28 sps:$4 sm:$0xff]   ;;  %v7946_v63 = vld [vmem:[#allocation2 + $0x348] ss:$28 sps:$4 sm:$0xff]   ;;  %v7950_v3 = vld [vmem:[#allocation2 + $0x380] ss:$28 sps:$4 sm:$0xff]  }
  0x85   :  { %2657 = vmatpush1.bf16.msra.mxu0 %v7886_v22  ;;  %2829 = vmatpush1.bf16.msra.mxu1 %v7887_v23  ;;  %v7947_v0 = vld [vmem:[#allocation2 + $0x350] ss:$28 sps:$4 sm:$0xff]   ;;  %v7952_v1 = vld [vmem:[#allocation2 + $0x384] ss:$28 sps:$4 sm:$0xff]   ;;  %v7959_v6 = vld [vmem:[#allocation2 + $0x3bc] ss:$28 sps:$4 sm:$0xff]  }
  0x86   :  { %2658 = vmatprep.subr.bf16.mxu0 %v7888_v24  ;;  %2830 = vmatprep.subr.bf16.mxu1 %v7890_v25  ;;  %v7955_v2 = vld [vmem:[#allocation2 + $0x38c] ss:$28 sps:$4 sm:$0xff]   ;;  %v7956_v5 = vld [vmem:[%s9586_s0] ss:$28 sps:$4 sm:$0xff]   ;;  %v7957_v8 = vld [vmem:[#allocation2 + $0x3b8] ss:$28 sps:$4 sm:$0xff]  }
  0x87   :  { %v7953_v4 = vld [vmem:[#allocation2 + $0x388] ss:$28 sps:$4 sm:$0xff]   ;;  %v7960_v9 = vld [vmem:[#allocation2 + $0x3c0] ss:$28 sps:$4 sm:$0xff]   ;;  %v7965_v10 = vld [vmem:[#allocation2 + $0x3f4] ss:$28 sps:$4 sm:$0xff]  }
  0x88   :  { %v7962_v7 = vld [vmem:[#allocation2 + $0x3c4] ss:$28 sps:$4 sm:$0xff]   ;;  %v7968_v11 = vld [vmem:[#allocation2 + $0x3fc] ss:$28 sps:$4 sm:$0xff]   ;;  %v7963_v12 = vld [vmem:[#allocation2 + $0x3f0] ss:$28 sps:$4 sm:$0xff]  }
  0x89   :  { %2659 = vmatpush1.bf16.msra.mxu0 %v7892_v26  ;;  %2831 = vmatpush1.bf16.msra.mxu1 %v7893_v27  ;;  %v7966_v13 = vld [vmem:[#allocation2 + $0x3f8] ss:$28 sps:$4 sm:$0xff]   ;;  %v7971_v14 = vld [vmem:[#allocation2 + $0x42c] ss:$28 sps:$4 sm:$0xff]   ;;  %v7977_v18 = vld [vmem:[#allocation2 + $0x464] ss:$28 sps:$4 sm:$0xff]  }
  0x8a   :  { %2660 = vmatprep.subr.bf16.mxu0 %v7894_v28  ;;  %2832 = vmatprep.subr.bf16.mxu1 %v7896_v29  ;;  %v7974_v15 = vld [vmem:[#allocation2 + $0x434] ss:$28 sps:$4 sm:$0xff]   ;;  %v7969_v16 = vld [vmem:[#allocation2 + $0x428] ss:$28 sps:$4 sm:$0xff]   ;;  %v7975_v20 = vld [vmem:[#allocation2 + $0x460] ss:$28 sps:$4 sm:$0xff]  }
  0x8b   :  { %v7972_v17 = vld [vmem:[#allocation2 + $0x430] ss:$28 sps:$4 sm:$0xff]   ;;  %v7978_v21 = vld [vmem:[#allocation2 + $0x468] ss:$28 sps:$4 sm:$0xff]   ;;  %v7983_v22 = vld [vmem:[#allocation2 + $0x49c] ss:$28 sps:$4 sm:$0xff]  }
  0x8c   :  { %v7980_v19 = vld [vmem:[#allocation2 + $0x46c] ss:$28 sps:$4 sm:$0xff]   ;;  %v7986_v23 = vld [vmem:[#allocation2 + $0x4a4] ss:$28 sps:$4 sm:$0xff]   ;;  %v7981_v24 = vld [vmem:[#allocation2 + $0x498] ss:$28 sps:$4 sm:$0xff]  }
  0x8d   :  { %2661 = vmatpush1.bf16.msra.mxu0 %v7898_v30  ;;  %2833 = vmatpush1.bf16.msra.mxu1 %v7899_v31  ;;  %v7984_v25 = vld [vmem:[#allocation2 + $0x4a0] ss:$28 sps:$4 sm:$0xff]   ;;  %v7989_v26 = vld [vmem:[#allocation2 + $0x4d4] ss:$28 sps:$4 sm:$0xff]   ;;  %v8047_v29 = vld [vmem:[%s9586_s0 + $0xc] ss:$28 sps:$4 sm:$0xff]  }
  0x8e   :  { %2662 = vmatprep.subr.bf16.mxu0 %v7900_v32  ;;  %2834 = vmatprep.subr.bf16.mxu1 %v7902_v33  ;;  %v7992_v27 = vld [vmem:[#allocation2 + $0x4dc] ss:$28 sps:$4 sm:$0xff]   ;;  %v7987_v28 = vld [vmem:[#allocation2 + $0x4d0] ss:$28 sps:$4 sm:$0xff]   ;;  %v7993_v33 = vld [vmem:[#allocation2 + $0x508] ss:$28 sps:$4 sm:$0xff]  }
  0x8f   :  { %v7990_v30 = vld [vmem:[#allocation2 + $0x4d8] ss:$28 sps:$4 sm:$0xff]   ;;  %v7995_v31 = vld [vmem:[#allocation2 + $0x50c] ss:$28 sps:$4 sm:$0xff]   ;;  %vm9197_vm0 = vmmov 0  }
  0x90   :  { %v7998_v32 = vld [vmem:[#allocation2 + $0x514] ss:$28 sps:$4 sm:$0xff]   ;;  %v8019_v47 = vld [vmem:[#allocation2 + $0x5ec] ss:$28 sps:$4 sm:$0xff]  }
  0x91   :  { %2663 = vmatpush1.bf16.msra.mxu0 %v7904_v34  ;;  %2835 = vmatpush1.bf16.msra.mxu1 %v7905_v35  ;;  %v7996_v34 = vld [vmem:[#allocation2 + $0x510] ss:$28 sps:$4 sm:$0xff]   ;;  %v8001_v35 = vld [vmem:[#allocation2 + $0x544] ss:$28 sps:$4 sm:$0xff]  }
  0x92   :  { %2664 = vmatprep.subr.bf16.mxu0 %v7906_v36  ;;  %2836 = vmatprep.subr.bf16.mxu1 %v7908_v37  ;;  %v8004_v36 = vld [vmem:[#allocation2 + $0x54c] ss:$28 sps:$4 sm:$0xff]   ;;  %v7999_v37 = vld [vmem:[#allocation2 + $0x540] ss:$28 sps:$4 sm:$0xff]  }
  0x95   :  { %2665 = vmatpush1.bf16.msra.mxu0 %v7910_v38  ;;  %2837 = vmatpush1.bf16.msra.mxu1 %v7911_v39  ;;  %v8002_v38 = vld [vmem:[#allocation2 + $0x548] ss:$28 sps:$4 sm:$0xff]   ;;  %v8007_v39 = vld [vmem:[#allocation2 + $0x57c] ss:$28 sps:$4 sm:$0xff]  }
  0x96   :  { %2666 = vmatprep.subr.bf16.mxu0 %v7912_v40  ;;  %2838 = vmatprep.subr.bf16.mxu1 %v7914_v41  ;;  %v8010_v40 = vld [vmem:[#allocation2 + $0x584] ss:$28 sps:$4 sm:$0xff]   ;;  %v8005_v41 = vld [vmem:[#allocation2 + $0x578] ss:$28 sps:$4 sm:$0xff]  }
  0x99   :  { %2667 = vmatpush1.bf16.msra.mxu0 %v7916_v42  ;;  %2839 = vmatpush1.bf16.msra.mxu1 %v7917_v43  ;;  %v8008_v42 = vld [vmem:[#allocation2 + $0x580] ss:$28 sps:$4 sm:$0xff]   ;;  %v8013_v43 = vld [vmem:[#allocation2 + $0x5b4] ss:$28 sps:$4 sm:$0xff]  }
  0x9a   :  { %2668 = vmatprep.subr.bf16.mxu0 %v7918_v44  ;;  %2840 = vmatprep.subr.bf16.mxu1 %v7920_v45  ;;  %v8016_v44 = vld [vmem:[#allocation2 + $0x5bc] ss:$28 sps:$4 sm:$0xff]   ;;  %v8011_v45 = vld [vmem:[#allocation2 + $0x5b0] ss:$28 sps:$4 sm:$0xff]  }
  0x9d   :  { %2669 = vmatpush1.bf16.msra.mxu0 %v7922_v46  ;;  %2841 = vmatpush1.bf16.msra.mxu1 %v7923_v48  ;;  %v8014_v46 = vld [vmem:[#allocation2 + $0x5b8] ss:$28 sps:$4 sm:$0xff]  }
  0x9e   :  { %2670 = vmatprep.subr.bf16.mxu0 %v7924_v49  ;;  %2842 = vmatprep.subr.bf16.mxu1 %v7926_v50  ;;  %v8022_v48 = vld [vmem:[#allocation2 + $0x5f4] ss:$28 sps:$4 sm:$0xff]   ;;  %v8017_v49 = vld [vmem:[#allocation2 + $0x5e8] ss:$28 sps:$4 sm:$0xff]  }
  0x9f   :  { %v8020_v50 = vld [vmem:[#allocation2 + $0x5f0] ss:$28 sps:$4 sm:$0xff]  }
  0xa1   :  { %2671 = vmatpush1.bf16.msra.mxu0 %v7928_v51  ;;  %2843 = vmatpush1.bf16.msra.mxu1 %v7929_v52  ;;  %v8025_v51 = vld [vmem:[#allocation2 + $0x624] ss:$28 sps:$4 sm:$0xff]   ;;  %v8028_v52 = vld [vmem:[#allocation2 + $0x62c] ss:$28 sps:$4 sm:$0xff]  }
  0xa2   :  { %2672 = vmatprep.subr.bf16.mxu0 %v7930_v53  ;;  %2844 = vmatprep.subr.bf16.mxu1 %v7932_v54  ;;  %v8023_v53 = vld [vmem:[#allocation2 + $0x620] ss:$28 sps:$4 sm:$0xff]   ;;  %v8026_v54 = vld [vmem:[#allocation2 + $0x628] ss:$28 sps:$4 sm:$0xff]  }
  0xa5   :  { %2673 = vmatpush1.bf16.msra.mxu0 %v7934_v55  ;;  %2845 = vmatpush1.bf16.msra.mxu1 %v7935_v56  ;;  %v8031_v55 = vld [vmem:[#allocation2 + $0x65c] ss:$28 sps:$4 sm:$0xff]   ;;  %v8034_v56 = vld [vmem:[#allocation2 + $0x664] ss:$28 sps:$4 sm:$0xff]  }
  0xa6   :  { %2674 = vmatprep.subr.bf16.mxu0 %v7936_v57  ;;  %2846 = vmatprep.subr.bf16.mxu1 %v7938_v58  ;;  %v8029_v57 = vld [vmem:[#allocation2 + $0x658] ss:$28 sps:$4 sm:$0xff]   ;;  %v8032_v58 = vld [vmem:[#allocation2 + $0x660] ss:$28 sps:$4 sm:$0xff]  }
  0xa9   :  { %2675 = vmatpush1.bf16.msra.mxu0 %v7940_v59  ;;  %2847 = vmatpush1.bf16.msra.mxu1 %v7941_v60  ;;  %v8037_v59 = vld [vmem:[#allocation2 + $0x694] ss:$28 sps:$4 sm:$0xff]   ;;  %v8040_v60 = vld [vmem:[#allocation2 + $0x69c] ss:$28 sps:$4 sm:$0xff]  }
  0xaa   :  { %2676 = vmatprep.subr.bf16.mxu0 %v7942_v61  ;;  %2848 = vmatprep.subr.bf16.mxu1 %v7944_v62  ;;  %v8035_v61 = vld [vmem:[#allocation2 + $0x690] ss:$28 sps:$4 sm:$0xff]   ;;  %v8038_v62 = vld [vmem:[#allocation2 + $0x698] ss:$28 sps:$4 sm:$0xff]  }
  0xad   :  { %2677 = vmatpush1.bf16.msra.mxu0 %v7946_v63  ;;  %2849 = vmatpush1.bf16.msra.mxu1 %v7947_v0  ;;  %v8043_v63 = vld [vmem:[#allocation2 + $0x6cc] ss:$28 sps:$4 sm:$0xff]   ;;  %v8046_v0 = vld [vmem:[#allocation2 + $0x6d4] ss:$28 sps:$4 sm:$0xff]  }
  0xae   :  { %2689 = vmatprep.subr.bf16.mxu0 %v7952_v1  ;;  %2861 = vmatprep.subr.bf16.mxu1 %v7955_v2  ;;  %v8041_v1 = vld [vmem:[#allocation2 + $0x6c8] ss:$28 sps:$4 sm:$0xff]   ;;  %v8044_v2 = vld [vmem:[#allocation2 + $0x6d0] ss:$28 sps:$4 sm:$0xff]  }
  0xb0   :  { %2679 = vmatmul.mubr.bf16.vlgmr.msra.gmra.mrb[0].mxu0 %v7956_v5  ;;  %2851 = vmatmul.mubr.bf16.vlgmr.msra.gmra.mrb[0].mxu1 %v7956_v5  ;;  %v8049_v5 = vld [vmem:[#allocation2 + $0x700] ss:$28 sps:$4 sm:$0xff]  }
  0xb1   :  { %2690 = vmatpush1.bf16.msra.mxu0 %v7950_v3  ;;  %2862 = vmatpush1.bf16.msra.mxu1 %v7953_v4  ;;  %v8051_v3 = vld [vmem:[#allocation2 + $0x704] ss:$28 sps:$4 sm:$0xff]   ;;  %v8054_v4 = vld [vmem:[#allocation2 + $0x70c] ss:$28 sps:$4 sm:$0xff]  }
  0xb2   :  { %2691 = vmatprep.subr.bf16.mxu0 %v7959_v6  ;;  %2863 = vmatprep.subr.bf16.mxu1 %v7962_v7  ;;  %v8052_v6 = vld [vmem:[#allocation2 + $0x708] ss:$28 sps:$4 sm:$0xff]  }
  0xb3   :  { %2721 = vmatprep.mubr.bf16.mxu0 %v8047_v29  ;;  %2893 = vmatprep.mubr.bf16.mxu1 %v8047_v29  ;;  %v8055_v7 = vld [vmem:[%s9586_s0 + $0x8] ss:$28 sps:$4 sm:$0xff]   ;;  %v8088_v29 = vld [vmem:[#allocation2 + $0x854] ss:$28 sps:$4 sm:$0xff]  }
  0xb5   :  { %2692 = vmatpush1.bf16.msra.mxu0 %v7957_v8  ;;  %2864 = vmatpush1.bf16.msra.mxu1 %v7960_v9  ;;  %v8058_v8 = vld [vmem:[#allocation2 + $0x73c] ss:$28 sps:$4 sm:$0xff]   ;;  %v8061_v9 = vld [vmem:[#allocation2 + $0x744] ss:$28 sps:$4 sm:$0xff]  }
  0xb6   :  { %2693 = vmatprep.subr.bf16.mxu0 %v7965_v10  ;;  %2865 = vmatprep.subr.bf16.mxu1 %v7968_v11  ;;  %v8056_v10 = vld [vmem:[#allocation2 + $0x738] ss:$28 sps:$4 sm:$0xff]  }
  0xb7   :  { %v8146_v11 = vld [vmem:[%s9586_s0 + $0x14] ss:$28 sps:$4 sm:$0xff]  }
  0xb9   :  { %2694 = vmatpush1.bf16.msra.mxu0 %v7963_v12  ;;  %2866 = vmatpush1.bf16.msra.mxu1 %v7966_v13  ;;  %v8059_v12 = vld [vmem:[#allocation2 + $0x740] ss:$28 sps:$4 sm:$0xff]   ;;  %v8064_v13 = vld [vmem:[#allocation2 + $0x774] ss:$28 sps:$4 sm:$0xff]  }
  0xba   :  { %2695 = vmatprep.subr.bf16.mxu0 %v7971_v14  ;;  %2867 = vmatprep.subr.bf16.mxu1 %v7974_v15  ;;  %v8067_v14 = vld [vmem:[#allocation2 + $0x77c] ss:$28 sps:$4 sm:$0xff]   ;;  %v8062_v15 = vld [vmem:[#allocation2 + $0x770] ss:$28 sps:$4 sm:$0xff]  }
  0xbd   :  { %2696 = vmatpush1.bf16.msra.mxu0 %v7969_v16  ;;  %2868 = vmatpush1.bf16.msra.mxu1 %v7972_v17  ;;  %v8065_v16 = vld [vmem:[#allocation2 + $0x778] ss:$28 sps:$4 sm:$0xff]   ;;  %v8070_v17 = vld [vmem:[#allocation2 + $0x7ac] ss:$28 sps:$4 sm:$0xff]  }
  0xbe   :  { %2697 = vmatprep.subr.bf16.mxu0 %v7977_v18  ;;  %2869 = vmatprep.subr.bf16.mxu1 %v7980_v19  ;;  %v8073_v18 = vld [vmem:[#allocation2 + $0x7b4] ss:$28 sps:$4 sm:$0xff]   ;;  %v8068_v19 = vld [vmem:[#allocation2 + $0x7a8] ss:$28 sps:$4 sm:$0xff]  }
  0xc1   :  { %2698 = vmatpush1.bf16.msra.mxu0 %v7975_v20  ;;  %2870 = vmatpush1.bf16.msra.mxu1 %v7978_v21  ;;  %v8071_v20 = vld [vmem:[#allocation2 + $0x7b0] ss:$28 sps:$4 sm:$0xff]   ;;  %v8076_v21 = vld [vmem:[#allocation2 + $0x7e4] ss:$28 sps:$4 sm:$0xff]  }
  0xc2   :  { %2699 = vmatprep.subr.bf16.mxu0 %v7983_v22  ;;  %2871 = vmatprep.subr.bf16.mxu1 %v7986_v23  ;;  %v8079_v22 = vld [vmem:[#allocation2 + $0x7ec] ss:$28 sps:$4 sm:$0xff]   ;;  %v8074_v23 = vld [vmem:[#allocation2 + $0x7e0] ss:$28 sps:$4 sm:$0xff]  }
  0xc5   :  { %2700 = vmatpush1.bf16.msra.mxu0 %v7981_v24  ;;  %2872 = vmatpush1.bf16.msra.mxu1 %v7984_v25  ;;  %v8077_v24 = vld [vmem:[#allocation2 + $0x7e8] ss:$28 sps:$4 sm:$0xff]   ;;  %v8082_v25 = vld [vmem:[#allocation2 + $0x81c] ss:$28 sps:$4 sm:$0xff]  }
  0xc6   :  { %2701 = vmatprep.subr.bf16.mxu0 %v7989_v26  ;;  %2873 = vmatprep.subr.bf16.mxu1 %v7992_v27  ;;  %v8085_v26 = vld [vmem:[#allocation2 + $0x824] ss:$28 sps:$4 sm:$0xff]   ;;  %v8080_v27 = vld [vmem:[#allocation2 + $0x818] ss:$28 sps:$4 sm:$0xff]  }
  0xc9   :  { %2702 = vmatpush1.bf16.msra.mxu0 %v7987_v28  ;;  %2874 = vmatpush1.bf16.msra.mxu1 %v7990_v30  ;;  %v8083_v28 = vld [vmem:[#allocation2 + $0x820] ss:$28 sps:$4 sm:$0xff]  }
  0xca   :  { %2703 = vmatprep.subr.bf16.mxu0 %v7995_v31  ;;  %2875 = vmatprep.subr.bf16.mxu1 %v7998_v32  ;;  %v8091_v30 = vld [vmem:[#allocation2 + $0x85c] ss:$28 sps:$4 sm:$0xff]   ;;  %v8086_v31 = vld [vmem:[#allocation2 + $0x850] ss:$28 sps:$4 sm:$0xff]  }
  0xcb   :  { %v8089_v32 = vld [vmem:[#allocation2 + $0x858] ss:$28 sps:$4 sm:$0xff]  }
  0xcd   :  { %2704 = vmatpush1.bf16.msra.mxu0 %v7993_v33  ;;  %2876 = vmatpush1.bf16.msra.mxu1 %v7996_v34  ;;  %v8094_v33 = vld [vmem:[#allocation2 + $0x88c] ss:$28 sps:$4 sm:$0xff]   ;;  %v8097_v34 = vld [vmem:[#allocation2 + $0x894] ss:$28 sps:$4 sm:$0xff]  }
  0xce   :  { %2705 = vmatprep.subr.bf16.mxu0 %v8001_v35  ;;  %2877 = vmatprep.subr.bf16.mxu1 %v8004_v36  ;;  %v8092_v35 = vld [vmem:[#allocation2 + $0x888] ss:$28 sps:$4 sm:$0xff]   ;;  %v8095_v36 = vld [vmem:[#allocation2 + $0x890] ss:$28 sps:$4 sm:$0xff]  }
  0xd1   :  { %2706 = vmatpush1.bf16.msra.mxu0 %v7999_v37  ;;  %2878 = vmatpush1.bf16.msra.mxu1 %v8002_v38  ;;  %v8100_v37 = vld [vmem:[#allocation2 + $0x8c4] ss:$28 sps:$4 sm:$0xff]   ;;  %v8103_v38 = vld [vmem:[#allocation2 + $0x8cc] ss:$28 sps:$4 sm:$0xff]  }
  0xd2   :  { %2707 = vmatprep.subr.bf16.mxu0 %v8007_v39  ;;  %2879 = vmatprep.subr.bf16.mxu1 %v8010_v40  ;;  %v8098_v39 = vld [vmem:[#allocation2 + $0x8c0] ss:$28 sps:$4 sm:$0xff]   ;;  %v8101_v40 = vld [vmem:[#allocation2 + $0x8c8] ss:$28 sps:$4 sm:$0xff]  }
  0xd5   :  { %2708 = vmatpush1.bf16.msra.mxu0 %v8005_v41  ;;  %2880 = vmatpush1.bf16.msra.mxu1 %v8008_v42  ;;  %v8106_v41 = vld [vmem:[#allocation2 + $0x8fc] ss:$28 sps:$4 sm:$0xff]   ;;  %v8109_v42 = vld [vmem:[#allocation2 + $0x904] ss:$28 sps:$4 sm:$0xff]  }
  0xd6   :  { %2709 = vmatprep.subr.bf16.mxu0 %v8013_v43  ;;  %2881 = vmatprep.subr.bf16.mxu1 %v8016_v44  ;;  %v8104_v43 = vld [vmem:[#allocation2 + $0x8f8] ss:$28 sps:$4 sm:$0xff]   ;;  %v8107_v44 = vld [vmem:[#allocation2 + $0x900] ss:$28 sps:$4 sm:$0xff]  }
  0xd9   :  { %2710 = vmatpush1.bf16.msra.mxu0 %v8011_v45  ;;  %2882 = vmatpush1.bf16.msra.mxu1 %v8014_v46  ;;  %v8112_v45 = vld [vmem:[#allocation2 + $0x934] ss:$28 sps:$4 sm:$0xff]   ;;  %v8115_v46 = vld [vmem:[#allocation2 + $0x93c] ss:$28 sps:$4 sm:$0xff]  }
  0xda   :  { %2711 = vmatprep.subr.bf16.mxu0 %v8019_v47  ;;  %2883 = vmatprep.subr.bf16.mxu1 %v8022_v48  ;;  %v8110_v47 = vld [vmem:[#allocation2 + $0x930] ss:$28 sps:$4 sm:$0xff]   ;;  %v8113_v48 = vld [vmem:[#allocation2 + $0x938] ss:$28 sps:$4 sm:$0xff]  }
  0xdd   :  { %2712 = vmatpush1.bf16.msra.mxu0 %v8017_v49  ;;  %2884 = vmatpush1.bf16.msra.mxu1 %v8020_v50  ;;  %v8118_v49 = vld [vmem:[#allocation2 + $0x96c] ss:$28 sps:$4 sm:$0xff]   ;;  %v8121_v50 = vld [vmem:[#allocation2 + $0x974] ss:$28 sps:$4 sm:$0xff]  }
  0xde   :  { %2713 = vmatprep.subr.bf16.mxu0 %v8025_v51  ;;  %2885 = vmatprep.subr.bf16.mxu1 %v8028_v52  ;;  %v8116_v51 = vld [vmem:[#allocation2 + $0x968] ss:$28 sps:$4 sm:$0xff]   ;;  %v8119_v52 = vld [vmem:[#allocation2 + $0x970] ss:$28 sps:$4 sm:$0xff]  }
  0xe1   :  { %2714 = vmatpush1.bf16.msra.mxu0 %v8023_v53  ;;  %2886 = vmatpush1.bf16.msra.mxu1 %v8026_v54  ;;  %v8124_v53 = vld [vmem:[#allocation2 + $0x9a4] ss:$28 sps:$4 sm:$0xff]   ;;  %v8127_v54 = vld [vmem:[#allocation2 + $0x9ac] ss:$28 sps:$4 sm:$0xff]  }
  0xe2   :  { %2715 = vmatprep.subr.bf16.mxu0 %v8031_v55  ;;  %2887 = vmatprep.subr.bf16.mxu1 %v8034_v56  ;;  %v8122_v55 = vld [vmem:[#allocation2 + $0x9a0] ss:$28 sps:$4 sm:$0xff]   ;;  %v8125_v56 = vld [vmem:[#allocation2 + $0x9a8] ss:$28 sps:$4 sm:$0xff]  }
  0xe5   :  { %2716 = vmatpush1.bf16.msra.mxu0 %v8029_v57  ;;  %2888 = vmatpush1.bf16.msra.mxu1 %v8032_v58  ;;  %v8130_v57 = vld [vmem:[#allocation2 + $0x9dc] ss:$28 sps:$4 sm:$0xff]   ;;  %v8133_v58 = vld [vmem:[#allocation2 + $0x9e4] ss:$28 sps:$4 sm:$0xff]  }
  0xe6   :  { %2717 = vmatprep.subr.bf16.mxu0 %v8037_v59  ;;  %2889 = vmatprep.subr.bf16.mxu1 %v8040_v60  ;;  %v8128_v59 = vld [vmem:[#allocation2 + $0x9d8] ss:$28 sps:$4 sm:$0xff]   ;;  %v8131_v60 = vld [vmem:[#allocation2 + $0x9e0] ss:$28 sps:$4 sm:$0xff]  }
  0xe9   :  { %2718 = vmatpush1.bf16.msra.mxu0 %v8035_v61  ;;  %2890 = vmatpush1.bf16.msra.mxu1 %v8038_v62  ;;  %v8136_v61 = vld [vmem:[#allocation2 + $0xa14] ss:$28 sps:$4 sm:$0xff]   ;;  %v8139_v62 = vld [vmem:[#allocation2 + $0xa1c] ss:$28 sps:$4 sm:$0xff]  }
  0xea   :  { %2719 = vmatprep.subr.bf16.mxu0 %v8043_v63  ;;  %2891 = vmatprep.subr.bf16.mxu1 %v8046_v0  ;;  %v8134_v63 = vld [vmem:[#allocation2 + $0xa10] ss:$28 sps:$4 sm:$0xff]   ;;  %v8137_v0 = vld [vmem:[#allocation2 + $0xa18] ss:$28 sps:$4 sm:$0xff]  }
  0xed   :  { %2720 = vmatpush1.bf16.msra.mxu0 %v8041_v1  ;;  %2892 = vmatpush1.bf16.msra.mxu1 %v8044_v2  ;;  %v8142_v1 = vld [vmem:[#allocation2 + $0xa4c] ss:$28 sps:$4 sm:$0xff]   ;;  %v8145_v2 = vld [vmem:[#allocation2 + $0xa54] ss:$28 sps:$4 sm:$0xff]  }
  0xee   :  { %2732 = vmatprep.subr.bf16.mxu0 %v8051_v3  ;;  %2904 = vmatprep.subr.bf16.mxu1 %v8054_v4  ;;  %v8140_v3 = vld [vmem:[#allocation2 + $0xa48] ss:$28 sps:$4 sm:$0xff]   ;;  %v8143_v4 = vld [vmem:[#allocation2 + $0xa50] ss:$28 sps:$4 sm:$0xff]  }
  0xf0   :  { %2722 = vmatmul.mubr.bf16.vlgmr.msra.gmra.mrb[0].mxu0 %v8055_v7  ;;  %2894 = vmatmul.mubr.bf16.vlgmr.msra.gmra.mrb[0].mxu1 %v8055_v7  ;;  %v8148_v7 = vld [vmem:[#allocation2 + $0xa80] ss:$28 sps:$4 sm:$0xff]  }
  0xf1   :  { %2733 = vmatpush1.bf16.msra.mxu0 %v8049_v5  ;;  %2905 = vmatpush1.bf16.msra.mxu1 %v8052_v6  ;;  %v8150_v5 = vld [vmem:[#allocation2 + $0xa84] ss:$28 sps:$4 sm:$0xff]   ;;  %v8153_v6 = vld [vmem:[#allocation2 + $0xa8c] ss:$28 sps:$4 sm:$0xff]  }
  0xf2   :  { %2734 = vmatprep.subr.bf16.mxu0 %v8058_v8  ;;  %2906 = vmatprep.subr.bf16.mxu1 %v8061_v9  ;;  %v8151_v8 = vld [vmem:[#allocation2 + $0xa88] ss:$28 sps:$4 sm:$0xff]   ;;  %v8154_v9 = vld [vmem:[%s9586_s0 + $0x10] ss:$28 sps:$4 sm:$0xff]  }
  0xf3   :  { %2764 = vmatprep.mubr.bf16.mxu0 %v8146_v11  ;;  %2936 = vmatprep.mubr.bf16.mxu1 %v8146_v11  ;;  %v8160_v11 = vld [vmem:[#allocation2 + $0xac4] ss:$28 sps:$4 sm:$0xff]  }
  0xf5   :  { %2735 = vmatpush1.bf16.msra.mxu0 %v8056_v10  ;;  %2907 = vmatpush1.bf16.msra.mxu1 %v8059_v12  ;;  %v8157_v10 = vld [vmem:[#allocation2 + $0xabc] ss:$28 sps:$4 sm:$0xff]  }
  0xf6   :  { %2736 = vmatprep.subr.bf16.mxu0 %v8064_v13  ;;  %2908 = vmatprep.subr.bf16.mxu1 %v8067_v14  ;;  %v8155_v12 = vld [vmem:[#allocation2 + $0xab8] ss:$28 sps:$4 sm:$0xff]   ;;  %v8158_v13 = vld [vmem:[#allocation2 + $0xac0] ss:$28 sps:$4 sm:$0xff]  }
  0xf7   :  { %v8163_v14 = vld [vmem:[#allocation2 + $0xaf4] ss:$28 sps:$4 sm:$0xff]  }
  0xf9   :  { %2737 = vmatpush1.bf16.msra.mxu0 %v8062_v15  ;;  %2909 = vmatpush1.bf16.msra.mxu1 %v8065_v16  ;;  %v8166_v15 = vld [vmem:[#allocation2 + $0xafc] ss:$28 sps:$4 sm:$0xff]   ;;  %v9195_v16 = vmov 0  }
  0xfa   :  { %2738 = vmatprep.subr.bf16.mxu0 %v8070_v17  ;;  %2910 = vmatprep.subr.bf16.mxu1 %v8073_v18  ;;  %v8161_v17 = vld [vmem:[#allocation2 + $0xaf0] ss:$28 sps:$4 sm:$0xff]   ;;  %v8164_v18 = vld [vmem:[#allocation2 + $0xaf8] ss:$28 sps:$4 sm:$0xff]  }
  0xfd   :  { %2739 = vmatpush1.bf16.msra.mxu0 %v8068_v19  ;;  %2911 = vmatpush1.bf16.msra.mxu1 %v8071_v20  ;;  %v8169_v19 = vld [vmem:[#allocation2 + $0xb2c] ss:$28 sps:$4 sm:$0xff]   ;;  %v8172_v20 = vld [vmem:[#allocation2 + $0xb34] ss:$28 sps:$4 sm:$0xff]  }
  0xfe   :  { %2740 = vmatprep.subr.bf16.mxu0 %v8076_v21  ;;  %2912 = vmatprep.subr.bf16.mxu1 %v8079_v22  ;;  %v8167_v21 = vld [vmem:[#allocation2 + $0xb28] ss:$28 sps:$4 sm:$0xff]   ;;  %v8170_v22 = vld [vmem:[#allocation2 + $0xb30] ss:$28 sps:$4 sm:$0xff]  }
 0x101   :  { %2741 = vmatpush1.bf16.msra.mxu0 %v8074_v23  ;;  %2913 = vmatpush1.bf16.msra.mxu1 %v8077_v24  ;;  %v8175_v23 = vld [vmem:[#allocation2 + $0xb64] ss:$28 sps:$4 sm:$0xff]   ;;  %v8178_v24 = vld [vmem:[#allocation2 + $0xb6c] ss:$28 sps:$4 sm:$0xff]  }
 0x102   :  { %2742 = vmatprep.subr.bf16.mxu0 %v8082_v25  ;;  %2914 = vmatprep.subr.bf16.mxu1 %v8085_v26  ;;  %v8173_v25 = vld [vmem:[#allocation2 + $0xb60] ss:$28 sps:$4 sm:$0xff]   ;;  %v8176_v26 = vld [vmem:[#allocation2 + $0xb68] ss:$28 sps:$4 sm:$0xff]  }
 0x105   :  { %2743 = vmatpush1.bf16.msra.mxu0 %v8080_v27  ;;  %2915 = vmatpush1.bf16.msra.mxu1 %v8083_v28  ;;  %v8181_v27 = vld [vmem:[#allocation2 + $0xb9c] ss:$28 sps:$4 sm:$0xff]   ;;  %v8184_v28 = vld [vmem:[#allocation2 + $0xba4] ss:$28 sps:$4 sm:$0xff]  }
 0x106   :  { %2744 = vmatprep.subr.bf16.mxu0 %v8088_v29  ;;  %2916 = vmatprep.subr.bf16.mxu1 %v8091_v30  ;;  %v8179_v29 = vld [vmem:[#allocation2 + $0xb98] ss:$28 sps:$4 sm:$0xff]   ;;  %v8182_v30 = vld [vmem:[#allocation2 + $0xba0] ss:$28 sps:$4 sm:$0xff]  }
 0x109   :  { %2745 = vmatpush1.bf16.msra.mxu0 %v8086_v31  ;;  %2917 = vmatpush1.bf16.msra.mxu1 %v8089_v32  ;;  %v8187_v31 = vld [vmem:[#allocation2 + $0xbd4] ss:$28 sps:$4 sm:$0xff]   ;;  %v8190_v32 = vld [vmem:[#allocation2 + $0xbdc] ss:$28 sps:$4 sm:$0xff]  }
 0x10a   :  { %2746 = vmatprep.subr.bf16.mxu0 %v8094_v33  ;;  %2918 = vmatprep.subr.bf16.mxu1 %v8097_v34  ;;  %v8185_v33 = vld [vmem:[#allocation2 + $0xbd0] ss:$28 sps:$4 sm:$0xff]   ;;  %v8188_v34 = vld [vmem:[#allocation2 + $0xbd8] ss:$28 sps:$4 sm:$0xff]  }
 0x10d   :  { %2747 = vmatpush1.bf16.msra.mxu0 %v8092_v35  ;;  %2919 = vmatpush1.bf16.msra.mxu1 %v8095_v36  ;;  %v8193_v35 = vld [vmem:[#allocation2 + $0xc0c] ss:$28 sps:$4 sm:$0xff]   ;;  %v8196_v36 = vld [vmem:[#allocation2 + $0xc14] ss:$28 sps:$4 sm:$0xff]  }
 0x10e   :  { %2748 = vmatprep.subr.bf16.mxu0 %v8100_v37  ;;  %2920 = vmatprep.subr.bf16.mxu1 %v8103_v38  ;;  %v8191_v37 = vld [vmem:[#allocation2 + $0xc08] ss:$28 sps:$4 sm:$0xff]   ;;  %v8194_v38 = vld [vmem:[#allocation2 + $0xc10] ss:$28 sps:$4 sm:$0xff]  }
 0x111   :  { %2749 = vmatpush1.bf16.msra.mxu0 %v8098_v39  ;;  %2921 = vmatpush1.bf16.msra.mxu1 %v8101_v40  ;;  %v8200_v39 = vld [vmem:[#allocation2 + $0x14] ss:$28 sps:$4 sm:$0xff]  }
 0x112   :  { %2750 = vmatprep.subr.bf16.mxu0 %v8106_v41  ;;  %2922 = vmatprep.subr.bf16.mxu1 %v8109_v42  ;;  %v8222_v40 = vld [vmem:[#allocation2 + $0x1d8] ss:$28 sps:$4 sm:$0xff]   ;;  %v8198_v42 = vld [vmem:[#allocation2 + $0x10] ss:$28 sps:$4 sm:$0xff]  }
 0x113   :  { %v8197_v41 = vld [vmem:[%s9586_s0 + $0x18] ss:$28 sps:$4 sm:$0xff]  }
 0x115   :  { %2751 = vmatpush1.bf16.msra.mxu0 %v8104_v43  ;;  %2923 = vmatpush1.bf16.msra.mxu1 %v8107_v44  ;;  %v8203_v43 = vld [vmem:[#allocation2 + $0x4c] ss:$28 sps:$4 sm:$0xff]   ;;  %v8223_v44 = vld [vmem:[#allocation2 + $0x18] ss:$28 sps:$4 sm:$0xff]  }
 0x116   :  { %2752 = vmatprep.subr.bf16.mxu0 %v8112_v45  ;;  %2924 = vmatprep.subr.bf16.mxu1 %v8115_v46  ;;  %v8227_v45 = vld [vmem:[#allocation2 + $0x210] ss:$28 sps:$4 sm:$0xff]   ;;  %v8201_v46 = vld [vmem:[#allocation2 + $0x48] ss:$28 sps:$4 sm:$0xff]  }
 0x119   :  { %2753 = vmatpush1.bf16.msra.mxu0 %v8110_v47  ;;  %2925 = vmatpush1.bf16.msra.mxu1 %v8113_v48  ;;  %v8206_v47 = vld [vmem:[#allocation2 + $0x84] ss:$28 sps:$4 sm:$0xff]   ;;  %v8228_v48 = vld [vmem:[#allocation2 + $0x50] ss:$28 sps:$4 sm:$0xff]  }
 0x11a   :  { %2754 = vmatprep.subr.bf16.mxu0 %v8118_v49  ;;  %2926 = vmatprep.subr.bf16.mxu1 %v8121_v50  ;;  %v8232_v49 = vld [vmem:[#allocation2 + $0x248] ss:$28 sps:$4 sm:$0xff]  }
 0x11b   :  { %v9038_v50 = vld [vmem:[%s9586_s0 + $0x4] ss:$28 sps:$4 sm:$0xff]  }
 0x11d   :  { %2755 = vmatpush1.bf16.msra.mxu0 %v8116_v51  ;;  %2927 = vmatpush1.bf16.msra.mxu1 %v8119_v52  ;;  %v8204_v51 = vld [vmem:[#allocation2 + $0x80] ss:$28 sps:$4 sm:$0xff]  }
 0x11e   :  { %2756 = vmatprep.subr.bf16.mxu0 %v8124_v53  ;;  %2928 = vmatprep.subr.bf16.mxu1 %v8127_v54  ;;  %v8209_v52 = vld [vmem:[#allocation2 + $0xbc] ss:$28 sps:$4 sm:$0xff]   ;;  %v8233_v53 = vld [vmem:[#allocation2 + $0x88] ss:$28 sps:$4 sm:$0xff]  }
 0x11f   :  { %v8237_v54 = vld [vmem:[#allocation2 + $0x280] ss:$28 sps:$4 sm:$0xff]  }
 0x121   :  { %2757 = vmatpush1.bf16.msra.mxu0 %v8122_v55  ;;  %2929 = vmatpush1.bf16.msra.mxu1 %v8125_v56  ;;  %v8207_v55 = vld [vmem:[#allocation2 + $0xb8] ss:$28 sps:$4 sm:$0xff]  }
 0x122   :  { %2758 = vmatprep.subr.bf16.mxu0 %v8130_v57  ;;  %2930 = vmatprep.subr.bf16.mxu1 %v8133_v58  ;;  %v8212_v56 = vld [vmem:[#allocation2 + $0xf4] ss:$28 sps:$4 sm:$0xff]   ;;  %v8238_v57 = vld [vmem:[#allocation2 + $0xc0] ss:$28 sps:$4 sm:$0xff]  }
 0x123   :  { %v8242_v58 = vld [vmem:[#allocation2 + $0x2b8] ss:$28 sps:$4 sm:$0xff]  }
 0x125   :  { %2759 = vmatpush1.bf16.msra.mxu0 %v8128_v59  ;;  %2931 = vmatpush1.bf16.msra.mxu1 %v8131_v60  ;;  %v8210_v59 = vld [vmem:[#allocation2 + $0xf0] ss:$28 sps:$4 sm:$0xff]   ;;  %v8243_v60 = vld [vmem:[#allocation2 + $0xf8] ss:$28 sps:$4 sm:$0xff]  }
 0x126   :  { %2760 = vmatprep.subr.bf16.mxu0 %v8136_v61  ;;  %2932 = vmatprep.subr.bf16.mxu1 %v8139_v62  ;;  %v8215_v61 = vld [vmem:[#allocation2 + $0x12c] ss:$28 sps:$4 sm:$0xff]  }
 0x127   :  { %v8247_v62 = vld [vmem:[#allocation2 + $0x2f0] ss:$28 sps:$4 sm:$0xff]  }
 0x129   :  { %2761 = vmatpush1.bf16.msra.mxu0 %v8134_v63  ;;  %2933 = vmatpush1.bf16.msra.mxu1 %v8137_v0  ;;  %v8213_v63 = vld [vmem:[#allocation2 + $0x128] ss:$28 sps:$4 sm:$0xff]  }
 0x12a   :  { %2762 = vmatprep.subr.bf16.mxu0 %v8142_v1  ;;  %2934 = vmatprep.subr.bf16.mxu1 %v8145_v2  ;;  %v8218_v0 = vld [vmem:[#allocation2 + $0x164] ss:$28 sps:$4 sm:$0xff]   ;;  %v8248_v1 = vld [vmem:[#allocation2 + $0x130] ss:$28 sps:$4 sm:$0xff]  }
 0x12b   :  { %v8252_v2 = vld [vmem:[#allocation2 + $0x328] ss:$28 sps:$4 sm:$0xff]  }
 0x12d   :  { %2763 = vmatpush1.bf16.msra.mxu0 %v8140_v3  ;;  %2935 = vmatpush1.bf16.msra.mxu1 %v8143_v4  ;;  %v8216_v3 = vld [vmem:[#allocation2 + $0x160] ss:$28 sps:$4 sm:$0xff]   ;;  %v8253_v4 = vld [vmem:[#allocation2 + $0x168] ss:$28 sps:$4 sm:$0xff]  }
 0x12e   :  { %2775 = vmatprep.subr.bf16.mxu0 %v8150_v5  ;;  %2947 = vmatprep.subr.bf16.mxu1 %v8153_v6  ;;  %v8221_v5 = vld [vmem:[#allocation2 + $0x19c] ss:$28 sps:$4 sm:$0xff]  }
 0x12f   :  { %v8257_v6 = vld [vmem:[#allocation2 + $0x360] ss:$28 sps:$4 sm:$0xff]  }
 0x130   :  { %2765 = vmatmul.mubr.bf16.vlgmr.msra.gmra.mrb[0].mxu0 %v8154_v9  ;;  %2937 = vmatmul.mubr.bf16.vlgmr.msra.gmra.mrb[0].mxu1 %v8154_v9  ;;  %v8258_v9 = vld [vmem:[#allocation2 + $0x1a0] ss:$28 sps:$4 sm:$0xff]  }
 0x131   :  { %2776 = vmatpush1.bf16.msra.mxu0 %v8148_v7  ;;  %2948 = vmatpush1.bf16.msra.mxu1 %v8151_v8  ;;  %v8219_v7 = vld [vmem:[#allocation2 + $0x198] ss:$28 sps:$4 sm:$0xff]  }
 0x132   :  { %2777 = vmatprep.subr.bf16.mxu0 %v8157_v10  ;;  %2949 = vmatprep.subr.bf16.mxu1 %v8160_v11  ;;  %v8226_v8 = vld [vmem:[#allocation2 + $0x1d4] ss:$28 sps:$4 sm:$0xff]  }
 0x133   :  { %2807 = vmatprep.mubr.bf16.mxu0 %v9195_v16  ;;  %2979 = vmatprep.mubr.bf16.mxu1 %v9195_v16  ;;  %v8262_v10 = vld [vmem:[#allocation2 + $0x558] ss:$28 sps:$4 sm:$0xff]   ;;  %v8224_v11 = vld [vmem:[#allocation2 + $0x1d0] ss:$28 sps:$4 sm:$0xff]  }
 0x135   :  { %2778 = vmatpush1.bf16.msra.mxu0 %v8155_v12  ;;  %2950 = vmatpush1.bf16.msra.mxu1 %v8158_v13  ;;  %v8231_v12 = vld [vmem:[#allocation2 + $0x20c] ss:$28 sps:$4 sm:$0xff]   ;;  %v8263_v13 = vld [vmem:[#allocation2 + $0x398] ss:$28 sps:$4 sm:$0xff]  }
 0x136   :  { %2779 = vmatprep.subr.bf16.mxu0 %v8163_v14  ;;  %2951 = vmatprep.subr.bf16.mxu1 %v8166_v15  ;;  %v8267_v14 = vld [vmem:[#allocation2 + $0x590] ss:$28 sps:$4 sm:$0xff]   ;;  %v8229_v15 = vld [vmem:[#allocation2 + $0x208] ss:$28 sps:$4 sm:$0xff]  }
 0x139   :  { %2780 = vmatpush1.bf16.msra.mxu0 %v8161_v17  ;;  %2952 = vmatpush1.bf16.msra.mxu1 %v8164_v18  ;;  %v8236_v17 = vld [vmem:[#allocation2 + $0x244] ss:$28 sps:$4 sm:$0xff]  }
 0x13a   :  { %2781 = vmatprep.subr.bf16.mxu0 %v8169_v19  ;;  %2953 = vmatprep.subr.bf16.mxu1 %v8172_v20  ;;  %v9339_v18 = vld [vmem:[%s9586_s0] ss:$28 sps:$4 sm:$0xff]   ;;  %v8268_v19 = vld [vmem:[#allocation2 + $0x3d0] ss:$28 sps:$4 sm:$0xff]   ;;  %v8272_v20 = vld [vmem:[#allocation2 + $0x5c8] ss:$28 sps:$4 sm:$0xff]  }
 0x13d   :  { %2782 = vmatpush1.bf16.msra.mxu0 %v8167_v21  ;;  %2954 = vmatpush1.bf16.msra.mxu1 %v8170_v22  ;;  %v9345_v21 = vld [vmem:[%s9586_s0 + $0xc] ss:$28 sps:$4 sm:$0xff]   ;;  %v8234_v22 = vld [vmem:[#allocation2 + $0x240] ss:$28 sps:$4 sm:$0xff]  }
 0x13e   :  { %2783 = vmatprep.subr.bf16.mxu0 %v8175_v23  ;;  %2955 = vmatprep.subr.bf16.mxu1 %v8178_v24  ;;  %v8241_v23 = vld [vmem:[#allocation2 + $0x27c] ss:$28 sps:$4 sm:$0xff]   ;;  %v8273_v24 = vld [vmem:[#allocation2 + $0x408] ss:$28 sps:$4 sm:$0xff]  }
 0x141   :  { %2784 = vmatpush1.bf16.msra.mxu0 %v8173_v25  ;;  %2956 = vmatpush1.bf16.msra.mxu1 %v8176_v26  ;;  %v8277_v25 = vld [vmem:[#allocation2 + $0x600] ss:$28 sps:$4 sm:$0xff]   ;;  %v8239_v26 = vld [vmem:[#allocation2 + $0x278] ss:$28 sps:$4 sm:$0xff]  }
 0x142   :  { %2785 = vmatprep.subr.bf16.mxu0 %v8181_v27  ;;  %2957 = vmatprep.subr.bf16.mxu1 %v8184_v28  ;;  %v8246_v27 = vld [vmem:[#allocation2 + $0x2b4] ss:$28 sps:$4 sm:$0xff]   ;;  %v8278_v28 = vld [vmem:[#allocation2 + $0x440] ss:$28 sps:$4 sm:$0xff]  }
 0x145   :  { %2786 = vmatpush1.bf16.msra.mxu0 %v8179_v29  ;;  %2958 = vmatpush1.bf16.msra.mxu1 %v8182_v30  ;;  %v8282_v29 = vld [vmem:[#allocation2 + $0x638] ss:$28 sps:$4 sm:$0xff]   ;;  %v8244_v30 = vld [vmem:[#allocation2 + $0x2b0] ss:$28 sps:$4 sm:$0xff]  }
 0x146   :  { %2787 = vmatprep.subr.bf16.mxu0 %v8187_v31  ;;  %2959 = vmatprep.subr.bf16.mxu1 %v8190_v32  ;;  %v8251_v31 = vld [vmem:[#allocation2 + $0x2ec] ss:$28 sps:$4 sm:$0xff]   ;;  %v8283_v32 = vld [vmem:[#allocation2 + $0x478] ss:$28 sps:$4 sm:$0xff]  }
 0x149   :  { %2788 = vmatpush1.bf16.msra.mxu0 %v8185_v33  ;;  %2960 = vmatpush1.bf16.msra.mxu1 %v8188_v34  ;;  %v8287_v33 = vld [vmem:[#allocation2 + $0x670] ss:$28 sps:$4 sm:$0xff]   ;;  %v8249_v34 = vld [vmem:[#allocation2 + $0x2e8] ss:$28 sps:$4 sm:$0xff]  }
 0x14a   :  { %2789 = vmatprep.subr.bf16.mxu0 %v8193_v35  ;;  %2961 = vmatprep.subr.bf16.mxu1 %v8196_v36  ;;  %v8256_v35 = vld [vmem:[#allocation2 + $0x324] ss:$28 sps:$4 sm:$0xff]   ;;  %v8288_v36 = vld [vmem:[#allocation2 + $0x4b0] ss:$28 sps:$4 sm:$0xff]  }
 0x14d   :  { %2790 = vmatpush1.bf16.msra.mxu0 %v8191_v37  ;;  %2962 = vmatpush1.bf16.msra.mxu1 %v8194_v38  ;;  %v8292_v37 = vld [vmem:[#allocation2 + $0x6a8] ss:$28 sps:$4 sm:$0xff]   ;;  %v8254_v38 = vld [vmem:[#allocation2 + $0x320] ss:$28 sps:$4 sm:$0xff]  }
 0x14e   :  { %2990 = vmatprep.subr.bf16.mxu0 %v8200_v39  ;;  %7555 = vmatprep.subr.bf16.mxu1 %v8222_v40  ;;  %v8261_v39 = vld [vmem:[#allocation2 + $0x35c] ss:$28 sps:$4 sm:$0xff]   ;;  %v8293_v40 = vld [vmem:[#allocation2 + $0x4e8] ss:$28 sps:$4 sm:$0xff]  }
 0x150   :  { %2808 = vmatmul.mubr.bf16.vlgmr.msra.gmra.mrb[0].mxu0 %v8197_v41  ;;  %2980 = vmatmul.mubr.bf16.vlgmr.msra.gmra.mrb[0].mxu1 %v8197_v41  ;;  %v8297_v41 = vld [vmem:[#allocation2 + $0x6e0] ss:$28 sps:$4 sm:$0xff]  }
 0x151   :  { %2991 = vmatpush1.bf16.msra.mxu0 %v8198_v42  ;;  %7556 = vmatpush3.bf16.msra.mxu1 %v8223_v44  ;;  %v8259_v42 = vld [vmem:[#allocation2 + $0x358] ss:$28 sps:$4 sm:$0xff]   ;;  %v8298_v44 = vld [vmem:[#allocation2 + $0x520] ss:$28 sps:$4 sm:$0xff]  }
 0x152   :  { %2992 = vmatprep.subr.bf16.mxu0 %v8203_v43  ;;  %7557 = vmatprep.subr.bf16.mxu1 %v8227_v45  ;;  %v8266_v43 = vld [vmem:[#allocation2 + $0x394] ss:$28 sps:$4 sm:$0xff]  }
 0x153   :  { %3194 = vmatprep.mubr.bf16.mxu1 %v9038_v50  ;;  %3022 = vmatprep.mubr.bf16.mxu0 %v9038_v50  ;;  %v8302_v45 = vld [vmem:[#allocation2 + $0x8d8] ss:$28 sps:$4 sm:$0xff]   ;;  %v8269_v50 = vld [vmem:[#allocation2 + $0x3c8] ss:$28 sps:$4 sm:$0xff]  }
 0x155   :  { %2993 = vmatpush1.bf16.msra.mxu0 %v8201_v46  ;;  %7558 = vmatpush3.bf16.msra.mxu1 %v8228_v48  ;;  %v8264_v46 = vld [vmem:[#allocation2 + $0x390] ss:$28 sps:$4 sm:$0xff]   ;;  %v8303_v48 = vld [vmem:[#allocation2 + $0x718] ss:$28 sps:$4 sm:$0xff]  }
 0x156   :  { %2994 = vmatprep.subr.bf16.mxu0 %v8206_v47  ;;  %7559 = vmatprep.subr.bf16.mxu1 %v8232_v49  ;;  %v8271_v47 = vld [vmem:[#allocation2 + $0x3cc] ss:$28 sps:$4 sm:$0xff]  }
 0x157   :  { %v8307_v49 = vld [vmem:[#allocation2 + $0x910] ss:$28 sps:$4 sm:$0xff]  }
 0x159   :  { %2995 = vmatpush1.bf16.msra.mxu0 %v8204_v51  ;;  %7560 = vmatpush3.bf16.msra.mxu1 %v8233_v53  ;;  %v9352_v51 = vld [vmem:[%s9586_s0 + $0x8] ss:$28 sps:$4 sm:$0xff]   ;;  %v8308_v53 = vld [vmem:[#allocation2 + $0x750] ss:$28 sps:$4 sm:$0xff]  }
 0x15a   :  { %2996 = vmatprep.subr.bf16.mxu0 %v8209_v52  ;;  %7561 = vmatprep.subr.bf16.mxu1 %v8237_v54  ;;  %v8276_v52 = vld [vmem:[#allocation2 + $0x404] ss:$28 sps:$4 sm:$0xff]  }
 0x15b   :  { %v8312_v54 = vld [vmem:[#allocation2 + $0x948] ss:$28 sps:$4 sm:$0xff]  }
 0x15d   :  { %2997 = vmatpush1.bf16.msra.mxu0 %v8207_v55  ;;  %7562 = vmatpush3.bf16.msra.mxu1 %v8238_v57  ;;  %v9358_v55 = vld [vmem:[%s9586_s0 + $0x14] ss:$28 sps:$4 sm:$0xff]   ;;  %v8281_v57 = vld [vmem:[#allocation2 + $0x43c] ss:$28 sps:$4 sm:$0xff]  }
 0x15e   :  { %2998 = vmatprep.subr.bf16.mxu0 %v8212_v56  ;;  %7563 = vmatprep.subr.bf16.mxu1 %v8242_v58  ;;  %v8274_v56 = vld [vmem:[#allocation2 + $0x400] ss:$28 sps:$4 sm:$0xff]   ;;  %v8313_v58 = vld [vmem:[#allocation2 + $0x788] ss:$28 sps:$4 sm:$0xff]  }
 0x161   :  { %2999 = vmatpush1.bf16.msra.mxu0 %v8210_v59  ;;  %7564 = vmatpush3.bf16.msra.mxu1 %v8243_v60  ;;  %v8317_v59 = vld [vmem:[#allocation2 + $0x980] ss:$28 sps:$4 sm:$0xff]   ;;  %v8279_v60 = vld [vmem:[#allocation2 + $0x438] ss:$28 sps:$4 sm:$0xff]  }
 0x162   :  { %3000 = vmatprep.subr.bf16.mxu0 %v8215_v61  ;;  %7565 = vmatprep.subr.bf16.mxu1 %v8247_v62  ;;  %v8286_v61 = vld [vmem:[#allocation2 + $0x474] ss:$28 sps:$4 sm:$0xff]   ;;  %v8318_v62 = vld [vmem:[#allocation2 + $0x7c0] ss:$28 sps:$4 sm:$0xff]  }
 0x165   :  { %3001 = vmatpush1.bf16.msra.mxu0 %v8213_v63  ;;  %7566 = vmatpush3.bf16.msra.mxu1 %v8248_v1  ;;  %v8322_v63 = vld [vmem:[#allocation2 + $0x9b8] ss:$28 sps:$4 sm:$0xff]   ;;  %v8291_v1 = vld [vmem:[#allocation2 + $0x4ac] ss:$28 sps:$4 sm:$0xff]  }
 0x166   :  { %3002 = vmatprep.subr.bf16.mxu0 %v8218_v0  ;;  %7567 = vmatprep.subr.bf16.mxu1 %v8252_v2  ;;  %v8284_v0 = vld [vmem:[#allocation2 + $0x470] ss:$28 sps:$4 sm:$0xff]   ;;  %v8323_v2 = vld [vmem:[#allocation2 + $0x7f8] ss:$28 sps:$4 sm:$0xff]  }
 0x169   :  { %3003 = vmatpush1.bf16.msra.mxu0 %v8216_v3  ;;  %7568 = vmatpush3.bf16.msra.mxu1 %v8253_v4  ;;  %v8327_v3 = vld [vmem:[#allocation2 + $0x9f0] ss:$28 sps:$4 sm:$0xff]   ;;  %v8289_v4 = vld [vmem:[#allocation2 + $0x4a8] ss:$28 sps:$4 sm:$0xff]  }
 0x16a   :  { %3004 = vmatprep.subr.bf16.mxu0 %v8221_v5  ;;  %7569 = vmatprep.subr.bf16.mxu1 %v8257_v6  ;;  %v8296_v5 = vld [vmem:[#allocation2 + $0x4e4] ss:$28 sps:$4 sm:$0xff]   ;;  %v8328_v6 = vld [vmem:[#allocation2 + $0x830] ss:$28 sps:$4 sm:$0xff]  }
 0x16d   :  { %3005 = vmatpush1.bf16.msra.mxu0 %v8219_v7  ;;  %7570 = vmatpush3.bf16.msra.mxu1 %v8258_v9  ;;  %v8332_v7 = vld [vmem:[#allocation2 + $0xa28] ss:$28 sps:$4 sm:$0xff]  }
 0x16e   :  { %3006 = vmatprep.subr.bf16.mxu0 %v8226_v8  ;;  %7577 = vmatprep.subr.bf16.mxu1 %v8262_v10  ;;  %v8294_v8 = vld [vmem:[#allocation2 + $0x4e0] ss:$28 sps:$4 sm:$0xff]   ;;  %v8333_v9 = vld [vmem:[#allocation2 + $0x868] ss:$28 sps:$4 sm:$0xff]  }
 0x16f   :  { %v8301_v10 = vld [vmem:[#allocation2 + $0x51c] ss:$28 sps:$4 sm:$0xff]  }
 0x170   :  { %3195 = vmatmul.mubr.bf16.vlgmr.msra.gmra.mrb[4].mxu1 %v9339_v18 }
 0x171   :  { %3007 = vmatpush1.bf16.msra.mxu0 %v8224_v11  ;;  %7578 = vmatpush3.bf16.msra.mxu1 %v8263_v13  ;;  %v8337_v11 = vld [vmem:[#allocation2 + $0xa60] ss:$28 sps:$4 sm:$0xff]  }
 0x172   :  { %3008 = vmatprep.subr.bf16.mxu0 %v8231_v12  ;;  %7579 = vmatprep.subr.bf16.mxu1 %v8267_v14  ;;  %v8299_v12 = vld [vmem:[#allocation2 + $0x518] ss:$28 sps:$4 sm:$0xff]   ;;  %v8338_v13 = vld [vmem:[#allocation2 + $0x8a0] ss:$28 sps:$4 sm:$0xff]  }
 0x173   :  { %3235 = vmatprep.mubr.bf16.mxu1 %v9345_v21  ;;  %v8306_v14 = vld [vmem:[#allocation2 + $0x554] ss:$28 sps:$4 sm:$0xff]  }
 0x175   :  { %3009 = vmatpush1.bf16.msra.mxu0 %v8229_v15  ;;  %7580 = vmatpush3.bf16.msra.mxu1 %v8268_v19  ;;  %v8304_v15 = vld [vmem:[#allocation2 + $0x550] ss:$28 sps:$4 sm:$0xff]   ;;  %v9196_v19 = vmov 0.0  }
 0x176   :  { %3010 = vmatprep.subr.bf16.mxu0 %v8236_v17  ;;  %7581 = vmatprep.subr.bf16.mxu1 %v8272_v20  ;;  %v8342_v17 = vld [vmem:[#allocation2 + $0xa98] ss:$28 sps:$4 sm:$0xff]   ;;  %v8309_v20 = vld [vmem:[#allocation2 + $0x588] ss:$28 sps:$4 sm:$0xff]  }
 0x179   :  { %3011 = vmatpush1.bf16.msra.mxu0 %v8234_v22  ;;  %7582 = vmatpush3.bf16.msra.mxu1 %v8273_v24  ;;  %v8346_v22 = vld [vmem:[#allocation2 + $0xad0] ss:$28 sps:$4 sm:$0xff]   ;;  %v8314_v24 = vld [vmem:[#allocation2 + $0x5c0] ss:$28 sps:$4 sm:$0xff]  }
 0x17a   :  { %3012 = vmatprep.subr.bf16.mxu0 %v8241_v23  ;;  %7583 = vmatprep.subr.bf16.mxu1 %v8277_v25  ;;  %v8316_v23 = vld [vmem:[#allocation2 + $0x5c4] ss:$28 sps:$4 sm:$0xff]  }
 0x17b   :  { %v8350_v25 = vld [vmem:[#allocation2 + $0xb08] ss:$28 sps:$4 sm:$0xff]  }
 0x17d   :  { %3013 = vmatpush1.bf16.msra.mxu0 %v8239_v26  ;;  %7584 = vmatpush3.bf16.msra.mxu1 %v8278_v28  ;;  %v8321_v26 = vld [vmem:[#allocation2 + $0x5fc] ss:$28 sps:$4 sm:$0xff]  }
 0x17e   :  { %3014 = vmatprep.subr.bf16.mxu0 %v8246_v27  ;;  %7585 = vmatprep.subr.bf16.mxu1 %v8282_v29  ;;  %v8319_v27 = vld [vmem:[#allocation2 + $0x5f8] ss:$28 sps:$4 sm:$0xff]   ;;  %v8354_v28 = vld [vmem:[#allocation2 + $0xb40] ss:$28 sps:$4 sm:$0xff]  }
 0x17f   :  { %v8326_v29 = vld [vmem:[#allocation2 + $0x634] ss:$28 sps:$4 sm:$0xff]  }
 0x181   :  { %3015 = vmatpush1.bf16.msra.mxu0 %v8244_v30  ;;  %7586 = vmatpush3.bf16.msra.mxu1 %v8283_v32  ;;  %v8324_v30 = vld [vmem:[#allocation2 + $0x630] ss:$28 sps:$4 sm:$0xff]  }
 0x182   :  { %3016 = vmatprep.subr.bf16.mxu0 %v8251_v31  ;;  %7587 = vmatprep.subr.bf16.mxu1 %v8287_v33  ;;  %v8358_v31 = vld [vmem:[#allocation2 + $0xb78] ss:$28 sps:$4 sm:$0xff]   ;;  %v8331_v32 = vld [vmem:[#allocation2 + $0x66c] ss:$28 sps:$4 sm:$0xff]  }
 0x183   :  { %v8329_v33 = vld [vmem:[#allocation2 + $0x668] ss:$28 sps:$4 sm:$0xff]  }
 0x185   :  { %3017 = vmatpush1.bf16.msra.mxu0 %v8249_v34  ;;  %7588 = vmatpush3.bf16.msra.mxu1 %v8288_v36  ;;  %v8362_v34 = vld [vmem:[#allocation2 + $0xbb0] ss:$28 sps:$4 sm:$0xff]   ;;  %v8334_v36 = vld [vmem:[#allocation2 + $0x6a0] ss:$28 sps:$4 sm:$0xff]  }
 0x186   :  { %3018 = vmatprep.subr.bf16.mxu0 %v8256_v35  ;;  %7589 = vmatprep.subr.bf16.mxu1 %v8292_v37  ;;  %v8336_v35 = vld [vmem:[#allocation2 + $0x6a4] ss:$28 sps:$4 sm:$0xff]  }
 0x187   :  { %v8366_v37 = vld [vmem:[#allocation2 + $0xbe8] ss:$28 sps:$4 sm:$0xff]  }
 0x189   :  { %3019 = vmatpush1.bf16.msra.mxu0 %v8254_v38  ;;  %7590 = vmatpush3.bf16.msra.mxu1 %v8293_v40  ;;  %v8341_v38 = vld [vmem:[#allocation2 + $0x6dc] ss:$28 sps:$4 sm:$0xff]  }
 0x18a   :  { %3020 = vmatprep.subr.bf16.mxu0 %v8261_v39  ;;  %7591 = vmatprep.subr.bf16.mxu1 %v8297_v41  ;;  %v8339_v39 = vld [vmem:[#allocation2 + $0x6d8] ss:$28 sps:$4 sm:$0xff]   ;;  %v8370_v40 = vld [vmem:[#allocation2 + $0xc20] ss:$28 sps:$4 sm:$0xff]  }
 0x18b   :  { %v8345_v41 = vld [vmem:[#allocation2 + $0x714] ss:$28 sps:$4 sm:$0xff]  }
 0x18d   :  { %3021 = vmatpush1.bf16.msra.mxu0 %v8259_v42  ;;  %7592 = vmatpush3.bf16.msra.mxu1 %v8298_v44  ;;  %v8376_v42 = vld [vmem:[#allocation7 + $0x4] ss:$28 sps:$4 sm:$0xff]  }
 0x18e   :  { %3033 = vmatprep.subr.bf16.mxu0 %v8266_v43  ;;  %7599 = vmatprep.subr.bf16.mxu1 %v8302_v45  ;;  %v8343_v43 = vld [vmem:[#allocation2 + $0x710] ss:$28 sps:$4 sm:$0xff]  }
 0x18f   :  { %v8374_v44 = vld [vmem:[#allocation7] ss:$28 sps:$4 sm:$0xff]  }
 0x190   :  { %3023 = vmatmul.mubr.bf16.vlgmr.msra.gmra.mrb[4].mxu0 %v9339_v18  ;;  %3236 = vmatmul.mubr.bf16.vlgmr.msra.gmra.mrb[8].mxu1 %v9352_v51  ;;  %v8311_v18 = vld [vmem:[#allocation2 + $0x58c] ss:$28 sps:$4 sm:$0xff]  }
 0x191   :  { %3034 = vmatpush1.bf16.msra.mxu0 %v8264_v46  ;;  %7600 = vmatpush3.bf16.msra.mxu1 %v8303_v48  ;;  %v8349_v45 = vld [vmem:[#allocation2 + $0x74c] ss:$28 sps:$4 sm:$0xff]   ;;  %v9382_v48 = vld [vmem:[%s9586_s0 + $0x18] ss:$28 sps:$4 sm:$0xff]  }
 0x192   :  { %3035 = vmatprep.subr.bf16.mxu0 %v8271_v47  ;;  %7601 = vmatprep.subr.bf16.mxu1 %v8307_v49  ;;  %v8382_v46 = vld [vmem:[#allocation7 + $0x3c] ss:$28 sps:$4 sm:$0xff]  }
 0x193   :  { %3276 = vmatprep.mubr.bf16.mxu1 %v9358_v55  ;;  %3065 = vmatprep.mubr.bf16.mxu0 %v9345_v21  ;;  %v9366_v21 = vld [vmem:[%s9586_s0 + $0x10] ss:$28 sps:$4 sm:$0xff]   ;;  %v8347_v47 = vld [vmem:[#allocation2 + $0x748] ss:$28 sps:$4 sm:$0xff]  }
 0x194   :  { %v8380_v49 = vld [vmem:[#allocation7 + $0x38] ss:$28 sps:$4 sm:$0xff]  }
 0x195   :  { %3036 = vmatpush1.bf16.msra.mxu0 %v8269_v50  ;;  %7602 = vmatpush3.bf16.msra.mxu1 %v8308_v53  ;;  %v8353_v50 = vld [vmem:[#allocation2 + $0x784] ss:$28 sps:$4 sm:$0xff]  }
 0x196   :  { %3037 = vmatprep.subr.bf16.mxu0 %v8276_v52  ;;  %7603 = vmatprep.subr.bf16.mxu1 %v8312_v54  ;;  %v8388_v52 = vld [vmem:[#allocation7 + $0x74] ss:$28 sps:$4 sm:$0xff]   ;;  %v8357_v54 = vld [vmem:[#allocation2 + $0x7bc] ss:$28 sps:$4 sm:$0xff]  }
 0x197   :  { %v8351_v53 = vld [vmem:[#allocation2 + $0x780] ss:$28 sps:$4 sm:$0xff]  }
 0x199   :  { %3038 = vmatpush1.bf16.msra.mxu0 %v8274_v56  ;;  %7604 = vmatpush3.bf16.msra.mxu1 %v8313_v58  ;;  %v8394_v56 = vld [vmem:[#allocation7 + $0xac] ss:$28 sps:$4 sm:$0xff]  }
 0x19a   :  { %3039 = vmatprep.subr.bf16.mxu0 %v8281_v57  ;;  %7605 = vmatprep.subr.bf16.mxu1 %v8317_v59  ;;  %v8355_v57 = vld [vmem:[#allocation2 + $0x7b8] ss:$28 sps:$4 sm:$0xff]  }
 0x19b   :  { %v8392_v58 = vld [vmem:[#allocation7 + $0xa8] ss:$28 sps:$4 sm:$0xff]  }
 0x19c   :  { %v8361_v59 = vld [vmem:[#allocation2 + $0x7f4] ss:$28 sps:$4 sm:$0xff]  }
 0x19d   :  { %3040 = vmatpush1.bf16.msra.mxu0 %v8279_v60  ;;  %7606 = vmatpush3.bf16.msra.mxu1 %v8318_v62  ;;  %v8400_v60 = vld [vmem:[#allocation7 + $0xe4] ss:$28 sps:$4 sm:$0xff]  }
 0x19e   :  { %3041 = vmatprep.subr.bf16.mxu0 %v8286_v61  ;;  %7607 = vmatprep.subr.bf16.mxu1 %v8322_v63  ;;  %v8359_v61 = vld [vmem:[#allocation2 + $0x7f0] ss:$28 sps:$4 sm:$0xff]  }
 0x19f   :  { %v8398_v62 = vld [vmem:[#allocation7 + $0xe0] ss:$28 sps:$4 sm:$0xff]  }
 0x1a0   :  { %v8406_v63 = vld [vmem:[#allocation7 + $0x11c] ss:$28 sps:$4 sm:$0xff]  }
 0x1a1   :  { %3042 = vmatpush1.bf16.msra.mxu0 %v8284_v0  ;;  %7608 = vmatpush3.bf16.msra.mxu1 %v8323_v2  ;;  %v8363_v0 = vld [vmem:[#allocation2 + $0x828] ss:$28 sps:$4 sm:$0xff]  }
 0x1a2   :  { %3043 = vmatprep.subr.bf16.mxu0 %v8291_v1  ;;  %7609 = vmatprep.subr.bf16.mxu1 %v8327_v3  ;;  %v8404_v1 = vld [vmem:[#allocation7 + $0x118] ss:$28 sps:$4 sm:$0xff]  }
 0x1a3   :  { %v8369_v2 = vld [vmem:[#allocation2 + $0x864] ss:$28 sps:$4 sm:$0xff]  }
 0x1a4   :  { %v8412_v3 = vld [vmem:[#allocation7 + $0x154] ss:$28 sps:$4 sm:$0xff]  }
 0x1a5   :  { %3044 = vmatpush1.bf16.msra.mxu0 %v8289_v4  ;;  %7610 = vmatpush3.bf16.msra.mxu1 %v8328_v6  ;;  %v8367_v4 = vld [vmem:[#allocation2 + $0x860] ss:$28 sps:$4 sm:$0xff]  }
 0x1a6   :  { %3045 = vmatprep.subr.bf16.mxu0 %v8296_v5  ;;  %7611 = vmatprep.subr.bf16.mxu1 %v8332_v7  ;;  %v8410_v5 = vld [vmem:[#allocation7 + $0x150] ss:$28 sps:$4 sm:$0xff]  }
 0x1a7   :  { %v8373_v6 = vld [vmem:[#allocation2 + $0x89c] ss:$28 sps:$4 sm:$0xff]  }
 0x1a8   :  { %v8418_v7 = vld [vmem:[#allocation7 + $0x18c] ss:$28 sps:$4 sm:$0xff]  }
 0x1a9   :  { %3046 = vmatpush1.bf16.msra.mxu0 %v8294_v8  ;;  %7612 = vmatpush3.bf16.msra.mxu1 %v8333_v9  ;;  %v8371_v8 = vld [vmem:[#allocation2 + $0x898] ss:$28 sps:$4 sm:$0xff]  }
 0x1aa   :  { %3047 = vmatprep.subr.bf16.mxu0 %v8301_v10  ;;  %7613 = vmatprep.subr.bf16.mxu1 %v8337_v11  ;;  %v8416_v9 = vld [vmem:[#allocation7 + $0x188] ss:$28 sps:$4 sm:$0xff]  }
 0x1ab   :  { %v8379_v10 = vld [vmem:[#allocation2 + $0x8d4] ss:$28 sps:$4 sm:$0xff]  }
 0x1ac   :  { %v8424_v11 = vld [vmem:[#allocation7 + $0x1c4] ss:$28 sps:$4 sm:$0xff]  }
 0x1ad   :  { %3048 = vmatpush1.bf16.msra.mxu0 %v8299_v12  ;;  %7614 = vmatpush3.bf16.msra.mxu1 %v8338_v13  ;;  %v8377_v12 = vld [vmem:[#allocation2 + $0x8d0] ss:$28 sps:$4 sm:$0xff]  }
 0x1ae   :  { %3049 = vmatprep.subr.bf16.mxu0 %v8306_v14  ;;  %7705 = vmatprep.subr.bf16.mxu1 %v9196_v19  ;;  %v8385_v13 = vld [vmem:[#allocation2 + $0x90c] ss:$28 sps:$4 sm:$0xff]  }
 0x1af   :  { %v8422_v14 = vld [vmem:[#allocation7 + $0x1c0] ss:$28 sps:$4 sm:$0xff]  }
 0x1b0   :  { %3277 = vmatmul.mubr.bf16.vlgmr.msra.gmra.mrb[12].mxu1 %v9366_v21 }
 0x1b1   :  { %3050 = vmatpush1.bf16.msra.mxu0 %v8304_v15  ;;  %7706 = vmatpush3.bf16.msra.mxu1 %v8342_v17  ;;  %v8430_v15 = vld [vmem:[#allocation7 + $0x1fc] ss:$28 sps:$4 sm:$0xff]  }
 0x1b2   :  { %3051 = vmatprep.subr.bf16.mxu0 %v8311_v18  ;;  %7707 = vmatprep.subr.bf16.mxu1 %v9196_v19  ;;  %v8383_v17 = vld [vmem:[#allocation2 + $0x908] ss:$28 sps:$4 sm:$0xff]  }
 0x1b3   :  { %7721 = vmatprep.mubr.msk.bf16.mxu1 %vm9197_vm0, %v9196_v19  ;;  %v8428_v18 = vld [vmem:[#allocation7 + $0x1f8] ss:$28 sps:$4 sm:$0xff]  }
 0x1b5   :  { %3052 = vmatpush1.bf16.msra.mxu0 %v8309_v20  ;;  %7708 = vmatpush3.bf16.msra.mxu1 %v8346_v22  ;;  %v8391_v20 = vld [vmem:[#allocation2 + $0x944] ss:$28 sps:$4 sm:$0xff]  }
 0x1b6   :  { %3053 = vmatprep.subr.bf16.mxu0 %v8316_v23  ;;  %7709 = vmatprep.subr.bf16.mxu1 %v9196_v19  ;;  %v8436_v22 = vld [vmem:[#allocation7 + $0x234] ss:$28 sps:$4 sm:$0xff]  }
 0x1b7   :  { %v8389_v23 = vld [vmem:[#allocation2 + $0x940] ss:$28 sps:$4 sm:$0xff]  }
 0x1b9   :  { %3054 = vmatpush1.bf16.msra.mxu0 %v8314_v24  ;;  %7710 = vmatpush3.bf16.msra.mxu1 %v8350_v25  ;;  %v8397_v24 = vld [vmem:[#allocation2 + $0x97c] ss:$28 sps:$4 sm:$0xff]  }
 0x1ba   :  { %3055 = vmatprep.subr.bf16.mxu0 %v8321_v26  ;;  %7711 = vmatprep.subr.bf16.mxu1 %v9196_v19  ;;  %v8434_v25 = vld [vmem:[#allocation7 + $0x230] ss:$28 sps:$4 sm:$0xff]  }
 0x1bb   :  { %v8442_v26 = vld [vmem:[#allocation7 + $0x26c] ss:$28 sps:$4 sm:$0xff]  }
 0x1bd   :  { %3056 = vmatpush1.bf16.msra.mxu0 %v8319_v27  ;;  %7712 = vmatpush3.bf16.msra.mxu1 %v8354_v28  ;;  %v8395_v27 = vld [vmem:[#allocation2 + $0x978] ss:$28 sps:$4 sm:$0xff]  }
 0x1be   :  { %3057 = vmatprep.subr.bf16.mxu0 %v8326_v29  ;;  %7713 = vmatprep.subr.bf16.mxu1 %v9196_v19  ;;  %v8403_v28 = vld [vmem:[#allocation2 + $0x9b4] ss:$28 sps:$4 sm:$0xff]  }
 0x1bf   :  { %v8440_v29 = vld [vmem:[#allocation7 + $0x268] ss:$28 sps:$4 sm:$0xff]  }
 0x1c1   :  { %3058 = vmatpush1.bf16.msra.mxu0 %v8324_v30  ;;  %7714 = vmatpush3.bf16.msra.mxu1 %v8358_v31  ;;  %v8448_v30 = vld [vmem:[#allocation7 + $0x2a4] ss:$28 sps:$4 sm:$0xff]  }
 0x1c2   :  { %3059 = vmatprep.subr.bf16.mxu0 %v8331_v32  ;;  %7715 = vmatprep.subr.bf16.mxu1 %v9196_v19  ;;  %v8401_v31 = vld [vmem:[#allocation2 + $0x9b0] ss:$28 sps:$4 sm:$0xff]  }
 0x1c3   :  { %v8409_v32 = vld [vmem:[#allocation2 + $0x9ec] ss:$28 sps:$4 sm:$0xff]  }
 0x1c5   :  { %3060 = vmatpush1.bf16.msra.mxu0 %v8329_v33  ;;  %7716 = vmatpush3.bf16.msra.mxu1 %v8362_v34  ;;  %v8446_v33 = vld [vmem:[#allocation7 + $0x2a0] ss:$28 sps:$4 sm:$0xff]  }
 0x1c6   :  { %3061 = vmatprep.subr.bf16.mxu0 %v8336_v35  ;;  %7717 = vmatprep.subr.bf16.mxu1 %v9196_v19  ;;  %v8454_v34 = vld [vmem:[#allocation7 + $0x2dc] ss:$28 sps:$4 sm:$0xff]  }
 0x1c7   :  { %v8407_v35 = vld [vmem:[#allocation2 + $0x9e8] ss:$28 sps:$4 sm:$0xff]  }
 0x1c9   :  { %3062 = vmatpush1.bf16.msra.mxu0 %v8334_v36  ;;  %7718 = vmatpush3.bf16.msra.mxu1 %v8366_v37  ;;  %v8415_v36 = vld [vmem:[#allocation2 + $0xa24] ss:$28 sps:$4 sm:$0xff]  }
 0x1ca   :  { %3063 = vmatprep.subr.bf16.mxu0 %v8341_v38  ;;  %7719 = vmatprep.subr.bf16.mxu1 %v9196_v19  ;;  %v8452_v37 = vld [vmem:[#allocation7 + $0x2d8] ss:$28 sps:$4 sm:$0xff]  }
 0x1cb   :  { %v8460_v38 = vld [vmem:[#allocation7 + $0x314] ss:$28 sps:$4 sm:$0xff]  }
 0x1cd   :  { %3064 = vmatpush1.bf16.msra.mxu0 %v8339_v39  ;;  %7720 = vmatpush3.bf16.msra.mxu1 %v8370_v40  ;;  %v8413_v39 = vld [vmem:[#allocation2 + $0xa20] ss:$28 sps:$4 sm:$0xff]  }
 0x1ce   :  { %3076 = vmatprep.subr.bf16.mxu0 %v8345_v41  ;;  %5913 = vmatprep.subr.bf16.mxu1 %v8376_v42  ;;  %v8421_v40 = vld [vmem:[#allocation2 + $0xa5c] ss:$28 sps:$4 sm:$0xff]  }
 0x1cf   :  { %v8458_v41 = vld [vmem:[#allocation7 + $0x310] ss:$28 sps:$4 sm:$0xff]  }
 0x1d0   :  { %3066 = vmatmul.mubr.bf16.vlgmr.msra.gmra.mrb[4].mxu0 %v9352_v51  ;;  %7722 = vmatmul.mubr.bf16.vlgmr.msra.gmra.mrb[16].mxu1 %v9382_v48  ;;  %v8386_v51 = vld [vmem:[#allocation7 + $0x70] ss:$28 sps:$4 sm:$0xff]  }
 0x1d1   :  { %3077 = vmatpush1.bf16.msra.mxu0 %v8343_v43  ;;  %5914 = vmatpush1.bf16.msra.mxu1 %v8374_v44  ;;  %v8466_v42 = vld [vmem:[#allocation7 + $0x34c] ss:$28 sps:$4 sm:$0xff]   ;;  %v8427_v44 = vld [vmem:[#allocation2 + $0xa94] ss:$28 sps:$4 sm:$0xff]  }
 0x1d2   :  { %3078 = vmatprep.subr.bf16.mxu0 %v8349_v45  ;;  %5915 = vmatprep.subr.bf16.mxu1 %v8382_v46  ;;  %v8419_v43 = vld [vmem:[#allocation2 + $0xa58] ss:$28 sps:$4 sm:$0xff]  }
 0x1d3   :  { %3108 = vmatprep.mubr.bf16.mxu0 %v9358_v55  ;;  %v8365_v55 = vld [vmem:[#allocation2 + $0x82c] ss:$28 sps:$4 sm:$0xff]   ;;  %v8464_v45 = vld [vmem:[#allocation7 + $0x348] ss:$28 sps:$4 sm:$0xff]  }
 0x1d4   :  { %v8472_v46 = vld [vmem:[#allocation7 + $0x384] ss:$28 sps:$4 sm:$0xff]  }
 0x1d5   :  { %3079 = vmatpush1.bf16.msra.mxu0 %v8347_v47  ;;  %5916 = vmatpush1.bf16.msra.mxu1 %v8380_v49  ;;  %v8425_v47 = vld [vmem:[#allocation2 + $0xa90] ss:$28 sps:$4 sm:$0xff]  }
 0x1d6   :  { %3080 = vmatprep.subr.bf16.mxu0 %v8353_v50  ;;  %5917 = vmatprep.subr.bf16.mxu1 %v8388_v52  ;;  %v8433_v49 = vld [vmem:[#allocation2 + $0xacc] ss:$28 sps:$4 sm:$0xff]   ;;  %v8439_v52 = vld [vmem:[#allocation2 + $0xb04] ss:$28 sps:$4 sm:$0xff]  }
 0x1d7   :  { %v8431_v50 = vld [vmem:[#allocation2 + $0xac8] ss:$28 sps:$4 sm:$0xff]  }
 0x1d9   :  { %3081 = vmatpush1.bf16.msra.mxu0 %v8351_v53  ;;  %5918 = vmatpush1.bf16.msra.mxu1 %v8386_v51  ;;  %v559_v53 = vlaneseq  ;;  %v8437_v51 = vld [vmem:[#allocation2 + $0xb00] ss:$28 sps:$4 sm:$0xff]  }
 0x1da   :  { %3082 = vmatprep.subr.bf16.mxu0 %v8357_v54  ;;  %5919 = vmatprep.subr.bf16.mxu1 %v8394_v56  ;;  %v8445_v54 = vld [vmem:[#allocation2 + $0xb3c] ss:$28 sps:$4 sm:$0xff]  }
 0x1db   :  { %v9388_v56 = vshrl.u32 %v559_v53, 7 }
 0x1dd   :  { %3083 = vmatpush1.bf16.msra.mxu0 %v8355_v57  ;;  %5920 = vmatpush1.bf16.msra.mxu1 %v8392_v58  ;;  %v8443_v57 = vld [vmem:[#allocation2 + $0xb38] ss:$28 sps:$4 sm:$0xff]  }
 0x1de   :  { %3084 = vmatprep.subr.bf16.mxu0 %v8361_v59  ;;  %5921 = vmatprep.subr.bf16.mxu1 %v8400_v60  ;;  %v8451_v58 = vld [vmem:[#allocation2 + $0xb74] ss:$28 sps:$4 sm:$0xff]   ;;  %v9391_v59 = vsub.s32 0, %v9388_v56  ;;  %v9393_v60 = vld [vmem:[#allocation4] sm:$0xff] }
 0x1e1   :  { %3085 = vmatpush1.bf16.msra.mxu0 %v8359_v61  ;;  %5922 = vmatpush1.bf16.msra.mxu1 %v8398_v62  ;;  %v9396_v61 = vsub.s32 2, %v9388_v56  ;;  %v9399_v62 = vsub.s32 1, %v9388_v56 }
 0x1e2   :  { %3086 = vmatprep.subr.bf16.mxu0 %v8365_v55  ;;  %5923 = vmatprep.subr.bf16.mxu1 %v8406_v63  ;;  %v9401_v55 = vld [vmem:[#allocation6] sm:$0xff]  ;;  %v9404_v63 = vsub.s32 3, %v9388_v56 }
 0x1e5   :  { %3087 = vmatpush1.bf16.msra.mxu0 %v8363_v0  ;;  %5924 = vmatpush1.bf16.msra.mxu1 %v8404_v1  ;;  %v8457_v0 = vld [vmem:[#allocation2 + $0xbac] ss:$28 sps:$4 sm:$0xff]   ;;  %v562_v1 = vrot.slane %v9393_v60, %v9391_v59 }
 0x1e6   :  { %3088 = vmatprep.subr.bf16.mxu0 %v8369_v2  ;;  %5925 = vmatprep.subr.bf16.mxu1 %v8412_v3  ;;  %v570_v2 = vrot.slane %v9393_v60, %v9396_v61  ;;  %v566_v3 = vrot.slane %v9393_v60, %v9399_v62 }
 0x1e9   :  { %3089 = vmatpush1.bf16.msra.mxu0 %v8367_v4  ;;  %5926 = vmatpush1.bf16.msra.mxu1 %v8410_v5  ;;  %v574_v4 = vrot.slane %v9393_v60, %v9404_v63  ;;  %v8455_v5 = vld [vmem:[#allocation2 + $0xba8] ss:$28 sps:$4 sm:$0xff]  }
 0x1ea   :  { %3090 = vmatprep.subr.bf16.mxu0 %v8373_v6  ;;  %5927 = vmatprep.subr.bf16.mxu1 %v8418_v7  ;;  %v8463_v6 = vld [vmem:[#allocation2 + $0xbe4] ss:$28 sps:$4 sm:$0xff]   ;;  %v3345_v7 = vrot.slane %v9401_v55, %v9391_v59 }
 0x1ed   :  { %3091 = vmatpush1.bf16.msra.mxu0 %v8371_v8  ;;  %5928 = vmatpush1.bf16.msra.mxu1 %v8416_v9  ;;  %v3353_v8 = vrot.slane %v9401_v55, %v9396_v61 }
 0x1ee   :  { %3092 = vmatprep.subr.bf16.mxu0 %v8379_v10  ;;  %5929 = vmatprep.subr.bf16.mxu1 %v8424_v11 }
 0x1f1   :  { %3093 = vmatpush1.bf16.msra.mxu0 %v8377_v12  ;;  %5930 = vmatpush1.bf16.msra.mxu1 %v8422_v14  ;;  %v3349_v14 = vrot.slane %v9401_v55, %v9399_v62 }
 0x1f2   :  { %3094 = vmatprep.subr.bf16.mxu0 %v8385_v13  ;;  %5931 = vmatprep.subr.bf16.mxu1 %v8430_v15 }
 0x1f5   :  { %3095 = vmatpush1.bf16.msra.mxu0 %v8383_v17  ;;  %5932 = vmatpush1.bf16.msra.mxu1 %v8428_v18  ;;  %v3357_v17 = vrot.slane %v9401_v55, %v9404_v63 }
 0x1f6   :  { %3096 = vmatprep.subr.bf16.mxu0 %v8391_v20  ;;  %5933 = vmatprep.subr.bf16.mxu1 %v8436_v22 }
 0x1f9   :  { %3097 = vmatpush1.bf16.msra.mxu0 %v8389_v23  ;;  %5934 = vmatpush1.bf16.msra.mxu1 %v8434_v25  ;;  %v8469_v25 = vld [vmem:[#allocation2 + $0xc1c] ss:$28 sps:$4 sm:$0xff]  }
 0x1fa   :  { %3098 = vmatprep.subr.bf16.mxu0 %v8397_v24  ;;  %5935 = vmatprep.subr.bf16.mxu1 %v8442_v26  ;;  %v8461_v24 = vld [vmem:[#allocation2 + $0xbe0] ss:$28 sps:$4 sm:$0xff]  }
 0x1fd   :  { %3099 = vmatpush1.bf16.msra.mxu0 %v8395_v27  ;;  %5936 = vmatpush1.bf16.msra.mxu1 %v8440_v29 }
 0x1fe   :  { %3100 = vmatprep.subr.bf16.mxu0 %v8403_v28  ;;  %5937 = vmatprep.subr.bf16.mxu1 %v8448_v30 }
 0x201   :  { %3101 = vmatpush1.bf16.msra.mxu0 %v8401_v31  ;;  %5938 = vmatpush1.bf16.msra.mxu1 %v8446_v33 }
 0x202   :  { %3102 = vmatprep.subr.bf16.mxu0 %v8409_v32  ;;  %5939 = vmatprep.subr.bf16.mxu1 %v8454_v34 }
 0x205   :  { %3103 = vmatpush1.bf16.msra.mxu0 %v8407_v35  ;;  %5940 = vmatpush1.bf16.msra.mxu1 %v8452_v37 }
 0x206   :  { %3104 = vmatprep.subr.bf16.mxu0 %v8415_v36  ;;  %5941 = vmatprep.subr.bf16.mxu1 %v8460_v38  ;;  %v8467_v38 = vld [vmem:[#allocation2 + $0xc18] ss:$28 sps:$4 sm:$0xff]  }
 0x209   :  { %3105 = vmatpush1.bf16.msra.mxu0 %v8413_v39  ;;  %5942 = vmatpush1.bf16.msra.mxu1 %v8458_v41  ;;  %v8475_v39 = vld [vmem:[#allocation7 + $0xc] ss:$28 sps:$4 sm:$0xff]  }
 0x20a   :  { %3106 = vmatprep.subr.bf16.mxu0 %v8421_v40  ;;  %5943 = vmatprep.subr.bf16.mxu1 %v8466_v42 }
 0x20d   :  { %3107 = vmatpush1.bf16.msra.mxu0 %v8419_v43  ;;  %5944 = vmatpush1.bf16.msra.mxu1 %v8464_v45 }
 0x20e   :  { %3119 = vmatprep.subr.bf16.mxu0 %v8427_v44  ;;  %5956 = vmatprep.subr.bf16.mxu1 %v8472_v46  ;;  %v8473_v44 = vld [vmem:[#allocation7 + $0x8] ss:$28 sps:$4 sm:$0xff]  }
 0x210   :  { %3109 = vmatmul.mubr.bf16.vlgmr.msra.gmra.mrb[4].mxu0 %v9366_v21  ;;  %v8449_v21 = vld [vmem:[#allocation2 + $0xb70] ss:$28 sps:$4 sm:$0xff]  }
 0x211   :  { %3120 = vmatpush1.bf16.msra.mxu0 %v8425_v47  ;;  %3151 = vmatprep.mubr.bf16.mxu0 %v9195_v16 }
 0x212   :  { %3121 = vmatprep.subr.bf16.mxu0 %v8433_v49 }
 0x215   :  { %3122 = vmatpush1.bf16.msra.mxu0 %v8431_v50  ;;  %v8470_v50 = vld [vmem:[#allocation7 + $0x380] ss:$28 sps:$4 sm:$0xff]  }
 0x216   :  { %3123 = vmatprep.subr.bf16.mxu0 %v8439_v52 }
 0x219   :  { %3124 = vmatpush1.bf16.msra.mxu0 %v8437_v51 }
 0x21a   :  { %3125 = vmatprep.subr.bf16.mxu0 %v8445_v54 }
 0x21d   :  { %3126 = vmatpush1.bf16.msra.mxu0 %v8443_v57  ;;  %v8478_v57 = vld [vmem:[#allocation7 + $0x3bc] ss:$28 sps:$4 sm:$0xff]  }
 0x21e   :  { %3127 = vmatprep.subr.bf16.mxu0 %v8451_v58 }
 0x221   :  { %3128 = vmatpush1.bf16.msra.mxu0 %v8449_v21 }
 0x222   :  { %3129 = vmatprep.subr.bf16.mxu0 %v8457_v0  ;;  %v8481_v0 = vld [vmem:[#allocation7 + $0x44] ss:$28 sps:$4 sm:$0xff]  }
 0x223   :  { %v2809_v9 = vpop.f32.mrb[0].mxu0  ;;  %v2981_v10 = vpop.f32.mrb[0].mxu1 }
 0x224   :  { %v7745_v11 = vadd.f32 %v2809_v9, %v562_v1  ;;  %v7749_v12 = vadd.f32 %v2981_v10, %v570_v2  ;;  %v2811_v13 = vpop.f32.mrb[1].mxu0  ;;  %v2983_v15 = vpop.f32.mrb[1].mxu1  ;;  %v8491_v9 = vld [vmem:[#allocation7 + $0xb0] ss:$28 sps:$4 sm:$0xff]   ;;  %v8496_v10 = vld [vmem:[#allocation7 + $0x464] ss:$28 sps:$4 sm:$0xff]  }
 0x225   :  { %v7746_v18 = vadd.f32 %v2811_v13, %v566_v3  ;;  %v7750_v20 = vadd.f32 %v2983_v15, %v574_v4  ;;  %v2813_v22 = vpop.f32.mrb[2].mxu0  ;;  %v2985_v23 = vpop.f32.mrb[2].mxu1  ;;  %3130 = vmatpush1.bf16.msra.mxu0 %v8455_v5  ;;  %v8482_v5 = vld [vmem:[#allocation7 + $0x3f0] ss:$28 sps:$4 sm:$0xff]   ;;  %v8497_v13 = vld [vmem:[#allocation7 + $0xe8] ss:$28 sps:$4 sm:$0xff]  }
 0x226   :  { %vm3326_vm1 = vcmp.gt.f32.partialorder %v7745_v11, 0.0  ;;  %v3377_v26 = vmul.f32 %v7745_v11, %v3345_v7  ;;  %vm3328_vm2 = vcmp.gt.f32.partialorder %v7749_v12, 0.0  ;;  %v3379_v27 = vmul.f32 %v7749_v12, %v3353_v8  ;;  %v2815_v28 = vpop.f32.mrb[3].mxu0  ;;  %v2987_v29 = vpop.f32.mrb[3].mxu1  ;;  %3131 = vmatprep.subr.bf16.mxu0 %v8463_v6  ;;  %v8485_v6 = vld [vmem:[#allocation7 + $0x78] ss:$28 sps:$4 sm:$0xff]  }
 0x227   :  { %vm3327_vm3 = vcmp.gt.f32.partialorder %v7746_v18, 0.0  ;;  %vm3329_vm4 = vcmp.gt.f32.partialorder %v7750_v20, 0.0  ;;  %v3378_v30 = vmul.f32 %v7746_v18, %v3349_v14  ;;  %v3380_v31 = vmul.f32 %v7750_v20, %v3357_v17  ;;  %v8505_v15 = vld [vmem:[#allocation7 + $0x124] ss:$28 sps:$4 sm:$0xff]  }
 0x228   :  { %v7747_v32 = vadd.f32 %v2813_v22, %v562_v1  ;;  %v7751_v33 = vadd.f32 %v2985_v23, %v570_v2  ;;  %v3391_v34 = vsel %vm3326_vm1, %v7745_v11, %v3377_v26  ;;  %v3393_v35 = vsel %vm3328_vm2, %v7749_v12, %v3379_v27  ;;  %v8479_v1 = vld [vmem:[#allocation7 + $0x40] ss:$28 sps:$4 sm:$0xff]   ;;  %v8476_v2 = vld [vmem:[#allocation7 + $0x3b8] ss:$28 sps:$4 sm:$0xff]   ;;  %v8499_v11 = vld [vmem:[#allocation7 + $0xec] ss:$28 sps:$4 sm:$0xff]  }
 0x229   :  { %v7748_v36 = vadd.f32 %v2815_v28, %v566_v3  ;;  %v7752_v37 = vadd.f32 %v2987_v29, %v574_v4  ;;  %3132 = vmatpush1.bf16.msra.mxu0 %v8461_v24  ;;  %v3392_v45 = vsel %vm3327_vm3, %v7746_v18, %v3378_v30  ;;  %v3394_v46 = vsel %vm3329_vm4, %v7750_v20, %v3380_v31  ;;  %v8484_v3 = vld [vmem:[#allocation7 + $0x3f4] ss:$28 sps:$4 sm:$0xff]   ;;  %v8487_v4 = vld [vmem:[#allocation7 + $0x7c] ss:$28 sps:$4 sm:$0xff]   ;;  %v8514_v29 = vld [vmem:[#allocation7 + $0x50c] ss:$28 sps:$4 sm:$0xff]  }
 0x22a   :  { %vm3333_vm5 = vcmp.gt.f32.partialorder %v7747_v32, 0.0  ;;  %v3384_v40 = vmul.f32 %v7747_v32, %v3345_v7  ;;  %vm3335_vm6 = vcmp.gt.f32.partialorder %v7751_v33, 0.0  ;;  %v3386_v41 = vmul.f32 %v7751_v33, %v3353_v8  ;;  %3133 = vmatprep.subr.bf16.mxu0 %v8469_v25  ;;  %v8490_v7 = vld [vmem:[#allocation7 + $0x42c] ss:$28 sps:$4 sm:$0xff]   ;;  %v8494_v12 = vld [vmem:[#allocation7 + $0x460] ss:$28 sps:$4 sm:$0xff]  }
 0x22b   :  { %vm3334_vm7 = vcmp.gt.f32.partialorder %v7748_v36, 0.0  ;;  %v3385_v42 = vmul.f32 %v7748_v36, %v3349_v14  ;;  %vm3336_vm8 = vcmp.gt.f32.partialorder %v7752_v37, 0.0  ;;  %v3387_v43 = vmul.f32 %v7752_v37, %v3357_v17  ;;  %v8488_v8 = vld [vmem:[#allocation7 + $0x428] ss:$28 sps:$4 sm:$0xff]   ;;  %v8502_v14 = vld [vmem:[#allocation7 + $0x49c] ss:$28 sps:$4 sm:$0xff]  }
 0x22c   :  { %v3398_v47 = vsel %vm3333_vm5, %v7747_v32, %v3384_v40  ;;  %v3400_v49 = vsel %vm3335_vm6, %v7751_v33, %v3386_v41  ;;  %v8500_v17 = vld [vmem:[#allocation7 + $0x498] ss:$28 sps:$4 sm:$0xff]   ;;  %v8503_v18 = vld [vmem:[#allocation7 + $0x120] ss:$28 sps:$4 sm:$0xff]   ;;  %v8506_v25 = vld [vmem:[#allocation7 + $0x4d0] ss:$28 sps:$4 sm:$0xff]  }
 0x22d   :  { %v9424_v52 = vpack.c.bf16 %v3398_v47, %v3391_v34  ;;  %v9426_v53 = vpack.c.bf16 %v3400_v49, %v3393_v35  ;;  %v3399_v51 = vsel %vm3334_vm7, %v7748_v36, %v3385_v42  ;;  %v3401_v54 = vsel %vm3336_vm8, %v7752_v37, %v3387_v43  ;;  %3134 = vmatpush1.bf16.msra.mxu0 %v8467_v38  ;;  %v8508_v20 = vld [vmem:[#allocation7 + $0x4d4] ss:$28 sps:$4 sm:$0xff]   ;;  %v8511_v22 = vld [vmem:[#allocation7 + $0x15c] ss:$28 sps:$4 sm:$0xff]   ;;  %v8512_v33 = vld [vmem:[#allocation7 + $0x508] ss:$28 sps:$4 sm:$0xff]  }
 0x22e   :  { %v9428_v58 = vpack.c.bf16 %v3399_v51, %v3392_v45  ;;  %v9430_v21 = vpack.c.bf16 %v3401_v54, %v3394_v46  ;;  %6085 = vmatprep.subr.bf16.mxu0 %v8475_v39  ;;  %v8509_v26 = vld [vmem:[#allocation7 + $0x158] ss:$28 sps:$4 sm:$0xff]   ;;  %v8515_v34 = vld [vmem:[#allocation7 + $0x190] ss:$28 sps:$4 sm:$0xff]   ;;  %v8520_v35 = vld [vmem:[#allocation7 + $0x544] ss:$28 sps:$4 sm:$0xff]  }
 0x22f   :  { %v8517_v30 = vld [vmem:[#allocation7 + $0x194] ss:$28 sps:$4 sm:$0xff]   ;;  %v8523_v36 = vld [vmem:[#allocation7 + $0x1cc] ss:$28 sps:$4 sm:$0xff]   ;;  %v8518_v37 = vld [vmem:[#allocation7 + $0x540] ss:$28 sps:$4 sm:$0xff]  }
 0x230   :  { %5945 = vmatprep.mubr.bf16.mxu1 %v9428_v58  ;;  %3152 = vmatmul.mubr.bf16.vlgmr.msra.gmra.mrb[4].mxu0 %v9382_v48  ;;  %v8493_v48 = vld [vmem:[#allocation7 + $0xb4] ss:$28 sps:$4 sm:$0xff]   ;;  %v8521_v38 = vld [vmem:[#allocation7 + $0x1c8] ss:$28 sps:$4 sm:$0xff]   ;;  %v8526_v39 = vld [vmem:[#allocation7 + $0x57c] ss:$28 sps:$4 sm:$0xff]  }
 0x231   :  { %5946 = vmatmul.mubr.bf16.vlgmr.msra.gmra.mrb[20].mxu1 %v9424_v52  ;;  %6086 = vmatpush1.bf16.msra.mxu0 %v8473_v44  ;;  %v8529_v40 = vld [vmem:[#allocation7 + $0x204] ss:$28 sps:$4 sm:$0xff]   ;;  %v8524_v41 = vld [vmem:[#allocation7 + $0x578] ss:$28 sps:$4 sm:$0xff]   ;;  %v8530_v45 = vld [vmem:[#allocation7 + $0x5b0] ss:$28 sps:$4 sm:$0xff]  }
 0x232   :  { %5957 = vmatpush1.bf16.msra.mxu1 %v8470_v50  ;;  %5988 = vmatprep.mubr.bf16.mxu1 %v9430_v21  ;;  %v8527_v42 = vld [vmem:[#allocation7 + $0x200] ss:$28 sps:$4 sm:$0xff]   ;;  %v8532_v43 = vld [vmem:[#allocation7 + $0x5b4] ss:$28 sps:$4 sm:$0xff]   ;;  %v8538_v47 = vld [vmem:[#allocation7 + $0x5ec] ss:$28 sps:$4 sm:$0xff]  }
 0x233   :  { %6117 = vmatprep.mubr.bf16.mxu0 %v9428_v58  ;;  %5958 = vmatprep.subr.bf16.mxu1 %v8478_v57  ;;  %v8535_v44 = vld [vmem:[#allocation7 + $0x23c] ss:$28 sps:$4 sm:$0xff]   ;;  %v8541_v49 = vld [vmem:[#allocation7 + $0x274] ss:$28 sps:$4 sm:$0xff]   ;;  %v8536_v50 = vld [vmem:[#allocation7 + $0x5e8] ss:$28 sps:$4 sm:$0xff]  }
 0x234   :  { %6087 = vmatprep.subr.bf16.mxu0 %v8481_v0  ;;  %v8533_v46 = vld [vmem:[#allocation7 + $0x238] ss:$28 sps:$4 sm:$0xff]   ;;  %v8539_v51 = vld [vmem:[#allocation7 + $0x270] ss:$28 sps:$4 sm:$0xff]   ;;  %v8544_v54 = vld [vmem:[#allocation7 + $0x624] ss:$28 sps:$4 sm:$0xff]  }
 0x235   :  { %6088 = vmatpush1.bf16.msra.mxu0 %v8479_v1  ;;  %v8547_v57 = vld [vmem:[#allocation7 + $0x2ac] ss:$28 sps:$4 sm:$0xff]   ;;  %v9442_v0 = vsub.s32 6, %v9388_v56 }
 0x236   :  { %5959 = vmatpush1.bf16.msra.mxu1 %v8476_v2  ;;  %6089 = vmatprep.subr.bf16.mxu0 %v8487_v4  ;;  %v8545_v1 = vld [vmem:[#allocation7 + $0x2a8] ss:$28 sps:$4 sm:$0xff]   ;;  %v8542_v2 = vld [vmem:[#allocation7 + $0x620] ss:$28 sps:$4 sm:$0xff]  }
 0x237   :  { %5960 = vmatprep.subr.bf16.mxu1 %v8484_v3  ;;  %v8553_v3 = vld [vmem:[#allocation7 + $0x2e4] ss:$28 sps:$4 sm:$0xff]   ;;  %v8550_v4 = vld [vmem:[#allocation7 + $0x65c] ss:$28 sps:$4 sm:$0xff]  }
 0x239   :  { %6090 = vmatpush1.bf16.msra.mxu0 %v8485_v6  ;;  %v8551_v6 = vld [vmem:[#allocation7 + $0x2e0] ss:$28 sps:$4 sm:$0xff]  }
 0x23a   :  { %5961 = vmatpush1.bf16.msra.mxu1 %v8482_v5  ;;  %6091 = vmatprep.subr.bf16.mxu0 %v8493_v48  ;;  %v586_v5 = vrot.slane %v9393_v60, %v9442_v0  ;;  %v8559_v48 = vld [vmem:[#allocation7 + $0x31c] ss:$28 sps:$4 sm:$0xff]   ;;  %v8554_v60 = vld [vmem:[#allocation7 + $0x690] ss:$28 sps:$4 sm:$0xff]  }
 0x23b   :  { %5962 = vmatprep.subr.bf16.mxu1 %v8490_v7  ;;  %v8548_v7 = vld [vmem:[#allocation7 + $0x658] ss:$28 sps:$4 sm:$0xff]  }
 0x23d   :  { %6092 = vmatpush1.bf16.msra.mxu0 %v8491_v9 }
 0x23e   :  { %5963 = vmatpush1.bf16.msra.mxu1 %v8488_v8  ;;  %6093 = vmatprep.subr.bf16.mxu0 %v8499_v11  ;;  %v8556_v8 = vld [vmem:[#allocation7 + $0x694] ss:$28 sps:$4 sm:$0xff]  }
 0x23f   :  { %5964 = vmatprep.subr.bf16.mxu1 %v8496_v10 }
 0x241   :  { %6094 = vmatpush1.bf16.msra.mxu0 %v8497_v13 }
 0x242   :  { %5965 = vmatpush1.bf16.msra.mxu1 %v8494_v12  ;;  %6095 = vmatprep.subr.bf16.mxu0 %v8505_v15  ;;  %v8557_v12 = vld [vmem:[#allocation7 + $0x318] ss:$28 sps:$4 sm:$0xff]  }
 0x243   :  { %5966 = vmatprep.subr.bf16.mxu1 %v8502_v14  ;;  %v7571_v23 = vpop.f32.mrb[4].mxu1 }
 0x244   :  { %v7572_v24 = vpop.f32.mrb[5].mxu1 }
 0x245   :  { %6096 = vmatpush1.bf16.msra.mxu0 %v8503_v18  ;;  %v9437_v27 = vadd.f32 %v7572_v24, %v7571_v23  ;;  %v7574_v28 = vpop.f32.mrb[6].mxu1  ;;  %v8563_v24 = vld [vmem:[#allocation7 + $0x350] ss:$28 sps:$4 sm:$0xff]  }
 0x246   :  { %5967 = vmatpush1.bf16.msra.mxu1 %v8500_v17  ;;  %6097 = vmatprep.subr.bf16.mxu0 %v8511_v22  ;;  %v7575_v31 = vpop.f32.mrb[7].mxu1  ;;  %v8565_v17 = vld [vmem:[#allocation7 + $0x354] ss:$28 sps:$4 sm:$0xff]  }
 0x247   :  { %5968 = vmatprep.subr.bf16.mxu1 %v8508_v20  ;;  %v9439_v32 = vadd.f32 %v7575_v31, %v7574_v28  ;;  %v3197_v9 = vadd.f32 %v9437_v27, %v586_v5  ;;  %v8562_v20 = vld [vmem:[#allocation7 + $0x6cc] ss:$28 sps:$4 sm:$0xff]   ;;  %v8616_v28 = vld [vmem:[#allocation7 + $0x704] ss:$28 sps:$4 sm:$0xff]  }
 0x248   :  { %v8568_v27 = vld [vmem:[#allocation7 + $0x38c] ss:$28 sps:$4 sm:$0xff]   ;;  %v8614_v31 = vld [vmem:[#allocation7 + $0x700] ss:$28 sps:$4 sm:$0xff]  }
 0x249   :  { %6098 = vmatpush1.bf16.msra.mxu0 %v8509_v26  ;;  %v3200_v13 = vadd.f32 %v9439_v32, %v586_v5  ;;  %v8560_v26 = vld [vmem:[#allocation7 + $0x6c8] ss:$28 sps:$4 sm:$0xff]   ;;  %v8622_v32 = vld [vmem:[#allocation7 + $0x73c] ss:$28 sps:$4 sm:$0xff]  }
 0x24a   :  { %5969 = vmatpush1.bf16.msra.mxu1 %v8506_v25  ;;  %6099 = vmatprep.subr.bf16.mxu0 %v8517_v30  ;;  %v8571_v30 = vld [vmem:[#allocation7 + $0x3c4] ss:$28 sps:$4 sm:$0xff]  }
 0x24b   :  { %5970 = vmatprep.subr.bf16.mxu1 %v8514_v29  ;;  %v8566_v29 = vld [vmem:[#allocation7 + $0x388] ss:$28 sps:$4 sm:$0xff]  }
 0x24d   :  { %6100 = vmatpush1.bf16.msra.mxu0 %v8515_v34  ;;  %v8574_v34 = vld [vmem:[#allocation7 + $0x3fc] ss:$28 sps:$4 sm:$0xff]  }
 0x24e   :  { %5971 = vmatpush1.bf16.msra.mxu1 %v8512_v33  ;;  %6101 = vmatprep.subr.bf16.mxu0 %v8523_v36  ;;  %v8569_v33 = vld [vmem:[#allocation7 + $0x3c0] ss:$28 sps:$4 sm:$0xff]   ;;  %v8628_v36 = vld [vmem:[#allocation7 + $0x774] ss:$28 sps:$4 sm:$0xff]  }
 0x24f   :  { %5972 = vmatprep.subr.bf16.mxu1 %v8520_v35  ;;  %v8620_v35 = vld [vmem:[#allocation7 + $0x738] ss:$28 sps:$4 sm:$0xff]  }
 0x251   :  { %6102 = vmatpush1.bf16.msra.mxu0 %v8521_v38  ;;  %v8577_v38 = vld [vmem:[#allocation7 + $0x434] ss:$28 sps:$4 sm:$0xff]  }
 0x252   :  { %5973 = vmatpush1.bf16.msra.mxu1 %v8518_v37  ;;  %6103 = vmatprep.subr.bf16.mxu0 %v8529_v40  ;;  %v8572_v37 = vld [vmem:[#allocation7 + $0x3f8] ss:$28 sps:$4 sm:$0xff]   ;;  %v8634_v40 = vld [vmem:[#allocation7 + $0x7ac] ss:$28 sps:$4 sm:$0xff]  }
 0x253   :  { %5974 = vmatprep.subr.bf16.mxu1 %v8526_v39  ;;  %v8626_v39 = vld [vmem:[#allocation7 + $0x770] ss:$28 sps:$4 sm:$0xff]  }
 0x255   :  { %6104 = vmatpush1.bf16.msra.mxu0 %v8527_v42  ;;  %v8580_v42 = vld [vmem:[#allocation7 + $0x46c] ss:$28 sps:$4 sm:$0xff]  }
 0x256   :  { %5975 = vmatpush1.bf16.msra.mxu1 %v8524_v41  ;;  %6105 = vmatprep.subr.bf16.mxu0 %v8535_v44  ;;  %v8575_v41 = vld [vmem:[#allocation7 + $0x430] ss:$28 sps:$4 sm:$0xff]   ;;  %v8640_v44 = vld [vmem:[#allocation7 + $0x7e4] ss:$28 sps:$4 sm:$0xff]  }
 0x257   :  { %5976 = vmatprep.subr.bf16.mxu1 %v8532_v43  ;;  %v8632_v43 = vld [vmem:[#allocation7 + $0x7a8] ss:$28 sps:$4 sm:$0xff]  }
 0x259   :  { %6106 = vmatpush1.bf16.msra.mxu0 %v8533_v46  ;;  %v8583_v46 = vld [vmem:[#allocation7 + $0x4a4] ss:$28 sps:$4 sm:$0xff]  }
 0x25a   :  { %5977 = vmatpush1.bf16.msra.mxu1 %v8530_v45  ;;  %6107 = vmatprep.subr.bf16.mxu0 %v8541_v49  ;;  %v8578_v45 = vld [vmem:[#allocation7 + $0x468] ss:$28 sps:$4 sm:$0xff]   ;;  %v8646_v49 = vld [vmem:[#allocation7 + $0x81c] ss:$28 sps:$4 sm:$0xff]  }
 0x25b   :  { %5978 = vmatprep.subr.bf16.mxu1 %v8538_v47  ;;  %v8638_v47 = vld [vmem:[#allocation7 + $0x7e0] ss:$28 sps:$4 sm:$0xff]  }
 0x25d   :  { %6108 = vmatpush1.bf16.msra.mxu0 %v8539_v51  ;;  %v8586_v51 = vld [vmem:[#allocation7 + $0x4dc] ss:$28 sps:$4 sm:$0xff]  }
 0x25e   :  { %5979 = vmatpush1.bf16.msra.mxu1 %v8536_v50  ;;  %6109 = vmatprep.subr.bf16.mxu0 %v8547_v57  ;;  %v8581_v50 = vld [vmem:[#allocation7 + $0x4a0] ss:$28 sps:$4 sm:$0xff]   ;;  %v8644_v57 = vld [vmem:[#allocation7 + $0x818] ss:$28 sps:$4 sm:$0xff]  }
 0x25f   :  { %5980 = vmatprep.subr.bf16.mxu1 %v8544_v54 }
 0x261   :  { %6110 = vmatpush1.bf16.msra.mxu0 %v8545_v1 }
 0x262   :  { %5981 = vmatpush1.bf16.msra.mxu1 %v8542_v2  ;;  %6111 = vmatprep.subr.bf16.mxu0 %v8553_v3  ;;  %v8652_v2 = vld [vmem:[#allocation7 + $0x854] ss:$28 sps:$4 sm:$0xff]  }
 0x263   :  { %5982 = vmatprep.subr.bf16.mxu1 %v8550_v4  ;;  %v7593_v10 = vpop.f32.mrb[8].mxu1  ;;  %v8584_v3 = vld [vmem:[#allocation7 + $0x4d8] ss:$28 sps:$4 sm:$0xff]  }
 0x264   :  { %v7594_v11 = vpop.f32.mrb[9].mxu1 }
 0x265   :  { %6112 = vmatpush1.bf16.msra.mxu0 %v8551_v6  ;;  %v7595_v14 = vadd.f32 %v7594_v11, %v7593_v10  ;;  %v7596_v15 = vpop.f32.mrb[10].mxu1  ;;  %v8589_v6 = vld [vmem:[#allocation7 + $0x514] ss:$28 sps:$4 sm:$0xff]   ;;  %v8658_v10 = vld [vmem:[#allocation7 + $0x88c] ss:$28 sps:$4 sm:$0xff]  }
 0x266   :  { %5983 = vmatpush1.bf16.msra.mxu1 %v8548_v7  ;;  %6113 = vmatprep.subr.bf16.mxu0 %v8559_v48  ;;  %v7597_v18 = vpop.f32.mrb[11].mxu1  ;;  %v8587_v11 = vld [vmem:[#allocation7 + $0x510] ss:$28 sps:$4 sm:$0xff]  }
 0x267   :  { %5984 = vmatprep.subr.bf16.mxu1 %v8556_v8  ;;  %v9448_v22 = vadd.f32 %v7595_v14, %v3197_v9  ;;  %v7598_v23 = vadd.f32 %v7597_v18, %v7596_v15  ;;  %v8650_v9 = vld [vmem:[#allocation7 + $0x850] ss:$28 sps:$4 sm:$0xff]   ;;  %v8656_v14 = vld [vmem:[#allocation7 + $0x888] ss:$28 sps:$4 sm:$0xff]   ;;  %v8662_v18 = vld [vmem:[#allocation7 + $0x8c0] ss:$28 sps:$4 sm:$0xff]  }
 0x268   :  { %v8664_v15 = vld [vmem:[#allocation7 + $0x8c4] ss:$28 sps:$4 sm:$0xff]  }
 0x269   :  { %6114 = vmatpush1.bf16.msra.mxu0 %v8557_v12  ;;  %v9450_v25 = vadd.f32 %v7598_v23, %v3200_v13  ;;  %v8592_v13 = vld [vmem:[#allocation7 + $0x54c] ss:$28 sps:$4 sm:$0xff]   ;;  %v8598_v23 = vld [vmem:[#allocation7 + $0x5bc] ss:$28 sps:$4 sm:$0xff]  }
 0x26a   :  { %5985 = vmatpush1.bf16.msra.mxu1 %v8554_v60  ;;  %6115 = vmatprep.subr.bf16.mxu0 %v8565_v17  ;;  %v8590_v60 = vld [vmem:[#allocation7 + $0x548] ss:$28 sps:$4 sm:$0xff]  }
 0x26b   :  { %5986 = vmatprep.subr.bf16.mxu1 %v8562_v20  ;;  %v8595_v17 = vld [vmem:[#allocation7 + $0x584] ss:$28 sps:$4 sm:$0xff]   ;;  %v8670_v20 = vld [vmem:[#allocation7 + $0x8fc] ss:$28 sps:$4 sm:$0xff]  }
 0x26d   :  { %6116 = vmatpush1.bf16.msra.mxu0 %v8563_v24  ;;  %v8668_v24 = vld [vmem:[#allocation7 + $0x8f8] ss:$28 sps:$4 sm:$0xff]  }
 0x26e   :  { %5987 = vmatpush1.bf16.msra.mxu1 %v8560_v26  ;;  %6128 = vmatprep.subr.bf16.mxu0 %v8568_v27  ;;  %v8596_v26 = vld [vmem:[#allocation7 + $0x5b8] ss:$28 sps:$4 sm:$0xff]  }
 0x26f   :  { %5999 = vmatprep.subr.bf16.mxu1 %v8616_v28  ;;  %v8601_v27 = vld [vmem:[#allocation7 + $0x5f4] ss:$28 sps:$4 sm:$0xff]  }
 0x270   :  { %6118 = vmatmul.mubr.bf16.vlgmr.msra.gmra.mrb[8].mxu0 %v9424_v52  ;;  %v8674_v28 = vld [vmem:[#allocation7 + $0x930] ss:$28 sps:$4 sm:$0xff]  }
 0x271   :  { %5989 = vmatmul.mubr.bf16.vlgmr.msra.gmra.mrb[20].mxu1 %v9426_v53  ;;  %6129 = vmatpush1.bf16.msra.mxu0 %v8566_v29  ;;  %v8682_v29 = vld [vmem:[#allocation7 + $0x96c] ss:$28 sps:$4 sm:$0xff]  }
 0x272   :  { %6160 = vmatprep.mubr.bf16.mxu0 %v9430_v21  ;;  %6130 = vmatprep.subr.bf16.mxu0 %v8571_v30  ;;  %v8599_v30 = vld [vmem:[#allocation7 + $0x5f0] ss:$28 sps:$4 sm:$0xff]  }
 0x273   :  { %6000 = vmatpush1.bf16.msra.mxu1 %v8614_v31  ;;  %v8604_v31 = vld [vmem:[#allocation7 + $0x62c] ss:$28 sps:$4 sm:$0xff]  }
 0x274   :  { %6001 = vmatprep.subr.bf16.mxu1 %v8622_v32  ;;  %v8680_v32 = vld [vmem:[#allocation7 + $0x968] ss:$28 sps:$4 sm:$0xff]  }
 0x275   :  { %6131 = vmatpush1.bf16.msra.mxu0 %v8569_v33  ;;  %v8688_v33 = vld [vmem:[#allocation7 + $0x9a4] ss:$28 sps:$4 sm:$0xff]  }
 0x276   :  { %6132 = vmatprep.subr.bf16.mxu0 %v8574_v34  ;;  %v8602_v34 = vld [vmem:[#allocation7 + $0x628] ss:$28 sps:$4 sm:$0xff]  }
 0x277   :  { %6002 = vmatpush1.bf16.msra.mxu1 %v8620_v35  ;;  %v8607_v35 = vld [vmem:[#allocation7 + $0x664] ss:$28 sps:$4 sm:$0xff]  }
 0x278   :  { %6003 = vmatprep.subr.bf16.mxu1 %v8628_v36  ;;  %v8686_v36 = vld [vmem:[#allocation7 + $0x9a0] ss:$28 sps:$4 sm:$0xff]  }
 0x279   :  { %6133 = vmatpush1.bf16.msra.mxu0 %v8572_v37  ;;  %v8694_v37 = vld [vmem:[#allocation7 + $0x9dc] ss:$28 sps:$4 sm:$0xff]  }
 0x27a   :  { %6134 = vmatprep.subr.bf16.mxu0 %v8577_v38  ;;  %v8605_v38 = vld [vmem:[#allocation7 + $0x660] ss:$28 sps:$4 sm:$0xff]  }
 0x27b   :  { %6004 = vmatpush1.bf16.msra.mxu1 %v8626_v39  ;;  %v8610_v39 = vld [vmem:[#allocation7 + $0x69c] ss:$28 sps:$4 sm:$0xff]  }
 0x27c   :  { %6005 = vmatprep.subr.bf16.mxu1 %v8634_v40  ;;  %v3369_v40 = vrot.slane %v9401_v55, %v9442_v0 }
 0x27d   :  { %6135 = vmatpush1.bf16.msra.mxu0 %v8575_v41 }
 0x27e   :  { %6136 = vmatprep.subr.bf16.mxu0 %v8580_v42  ;;  %v8692_v42 = vld [vmem:[#allocation7 + $0x9d8] ss:$28 sps:$4 sm:$0xff]  }
 0x27f   :  { %6006 = vmatpush1.bf16.msra.mxu1 %v8632_v43 }
 0x280   :  { %6007 = vmatprep.subr.bf16.mxu1 %v8640_v44 }
 0x281   :  { %6137 = vmatpush1.bf16.msra.mxu0 %v8578_v45  ;;  %v8700_v45 = vld [vmem:[#allocation7 + $0xa14] ss:$28 sps:$4 sm:$0xff]  }
 0x282   :  { %6138 = vmatprep.subr.bf16.mxu0 %v8583_v46  ;;  %v8608_v46 = vld [vmem:[#allocation7 + $0x698] ss:$28 sps:$4 sm:$0xff]  }
 0x283   :  { %v7615_v54 = vpop.f32.mrb[12].mxu1  ;;  %6008 = vmatpush1.bf16.msra.mxu1 %v8638_v47 }
 0x284   :  { %v7616_v1 = vpop.f32.mrb[13].mxu1  ;;  %6009 = vmatprep.subr.bf16.mxu1 %v8646_v49  ;;  %v8613_v49 = vld [vmem:[#allocation7 + $0x6d4] ss:$28 sps:$4 sm:$0xff]  }
 0x285   :  { %6139 = vmatpush1.bf16.msra.mxu0 %v8581_v50  ;;  %v7617_v4 = vadd.f32 %v7616_v1, %v7615_v54  ;;  %v7618_v5 = vpop.f32.mrb[14].mxu1 }
 0x286   :  { %6140 = vmatprep.subr.bf16.mxu0 %v8586_v51  ;;  %v7619_v7 = vpop.f32.mrb[15].mxu1 }
 0x287   :  { %v7620_v48 = vadd.f32 %v7619_v7, %v7618_v5  ;;  %v3279_v8 = vadd.f32 %v7617_v4, %v9448_v22  ;;  %6010 = vmatpush1.bf16.msra.mxu1 %v8644_v57  ;;  %v8593_v22 = vld [vmem:[#allocation7 + $0x580] ss:$28 sps:$4 sm:$0xff]   ;;  %v8698_v57 = vld [vmem:[#allocation7 + $0xa10] ss:$28 sps:$4 sm:$0xff]   ;;  %v8704_v7 = vld [vmem:[#allocation7 + $0xa48] ss:$28 sps:$4 sm:$0xff]  }
 0x288   :  { %6011 = vmatprep.subr.bf16.mxu1 %v8652_v2  ;;  %v8706_v2 = vld [vmem:[#allocation7 + $0xa4c] ss:$28 sps:$4 sm:$0xff]  }
 0x289   :  { %6141 = vmatpush1.bf16.msra.mxu0 %v8584_v3  ;;  %v9457_v12 = vadd.f32 %v7620_v48, %v9450_v25  ;;  %v8676_v25 = vld [vmem:[#allocation7 + $0x934] ss:$28 sps:$4 sm:$0xff]   ;;  %v8619_v5 = vld [vmem:[#allocation7 + $0x70c] ss:$28 sps:$4 sm:$0xff]   ;;  %v8712_v48 = vld [vmem:[#allocation7 + $0xa84] ss:$28 sps:$4 sm:$0xff]  }
 0x28a   :  { %6142 = vmatprep.subr.bf16.mxu0 %v8589_v6  ;;  %v8611_v3 = vld [vmem:[#allocation7 + $0x6d0] ss:$28 sps:$4 sm:$0xff]  }
 0x28b   :  { %6012 = vmatpush1.bf16.msra.mxu1 %v8650_v9  ;;  %v8625_v9 = vld [vmem:[#allocation7 + $0x744] ss:$28 sps:$4 sm:$0xff]  }
 0x28c   :  { %6013 = vmatprep.subr.bf16.mxu1 %v8658_v10  ;;  %v8623_v10 = vld [vmem:[#allocation7 + $0x740] ss:$28 sps:$4 sm:$0xff]  }
 0x28d   :  { %6143 = vmatpush1.bf16.msra.mxu0 %v8587_v11  ;;  %v8631_v11 = vld [vmem:[#allocation7 + $0x77c] ss:$28 sps:$4 sm:$0xff]  }
 0x28e   :  { %6144 = vmatprep.subr.bf16.mxu0 %v8592_v13  ;;  %v8637_v13 = vld [vmem:[#allocation7 + $0x7b4] ss:$28 sps:$4 sm:$0xff]  }
 0x28f   :  { %6014 = vmatpush1.bf16.msra.mxu1 %v8656_v14  ;;  %v8635_v14 = vld [vmem:[#allocation7 + $0x7b0] ss:$28 sps:$4 sm:$0xff]  }
 0x290   :  { %6015 = vmatprep.subr.bf16.mxu1 %v8664_v15  ;;  %v8643_v15 = vld [vmem:[#allocation7 + $0x7ec] ss:$28 sps:$4 sm:$0xff]  }
 0x291   :  { %6145 = vmatpush1.bf16.msra.mxu0 %v8590_v60  ;;  %v8641_v60 = vld [vmem:[#allocation7 + $0x7e8] ss:$28 sps:$4 sm:$0xff]  }
 0x292   :  { %6146 = vmatprep.subr.bf16.mxu0 %v8595_v17  ;;  %v8649_v17 = vld [vmem:[#allocation7 + $0x824] ss:$28 sps:$4 sm:$0xff]  }
 0x293   :  { %6016 = vmatpush1.bf16.msra.mxu1 %v8662_v18  ;;  %v8647_v18 = vld [vmem:[#allocation7 + $0x820] ss:$28 sps:$4 sm:$0xff]  }
 0x294   :  { %6017 = vmatprep.subr.bf16.mxu1 %v8670_v20  ;;  %v8655_v20 = vld [vmem:[#allocation7 + $0x85c] ss:$28 sps:$4 sm:$0xff]  }
 0x295   :  { %6147 = vmatpush1.bf16.msra.mxu0 %v8593_v22  ;;  %v8653_v22 = vld [vmem:[#allocation7 + $0x858] ss:$28 sps:$4 sm:$0xff]  }
 0x296   :  { %6148 = vmatprep.subr.bf16.mxu0 %v8598_v23  ;;  %v8661_v23 = vld [vmem:[#allocation7 + $0x894] ss:$28 sps:$4 sm:$0xff]  }
 0x297   :  { %6018 = vmatpush1.bf16.msra.mxu1 %v8668_v24  ;;  %v8659_v24 = vld [vmem:[#allocation7 + $0x890] ss:$28 sps:$4 sm:$0xff]  }
 0x298   :  { %6019 = vmatprep.subr.bf16.mxu1 %v8676_v25  ;;  %v8667_v25 = vld [vmem:[#allocation7 + $0x8cc] ss:$28 sps:$4 sm:$0xff]  }
 0x299   :  { %6149 = vmatpush1.bf16.msra.mxu0 %v8596_v26  ;;  %v8665_v26 = vld [vmem:[#allocation7 + $0x8c8] ss:$28 sps:$4 sm:$0xff]  }
 0x29a   :  { %6150 = vmatprep.subr.bf16.mxu0 %v8601_v27  ;;  %v8673_v27 = vld [vmem:[#allocation7 + $0x904] ss:$28 sps:$4 sm:$0xff]  }
 0x29b   :  { %6020 = vmatpush1.bf16.msra.mxu1 %v8674_v28  ;;  %v8671_v28 = vld [vmem:[#allocation7 + $0x900] ss:$28 sps:$4 sm:$0xff]  }
 0x29c   :  { %6021 = vmatprep.subr.bf16.mxu1 %v8682_v29  ;;  %v8679_v29 = vld [vmem:[#allocation7 + $0x93c] ss:$28 sps:$4 sm:$0xff]  }
 0x29d   :  { %6151 = vmatpush1.bf16.msra.mxu0 %v8599_v30  ;;  %v8677_v30 = vld [vmem:[#allocation7 + $0x938] ss:$28 sps:$4 sm:$0xff]  }
 0x29e   :  { %6152 = vmatprep.subr.bf16.mxu0 %v8604_v31  ;;  %v8685_v31 = vld [vmem:[#allocation7 + $0x974] ss:$28 sps:$4 sm:$0xff]  }
 0x29f   :  { %6022 = vmatpush1.bf16.msra.mxu1 %v8680_v32  ;;  %v8683_v32 = vld [vmem:[#allocation7 + $0x970] ss:$28 sps:$4 sm:$0xff]  }
 0x2a0   :  { %6023 = vmatprep.subr.bf16.mxu1 %v8688_v33  ;;  %v8691_v33 = vld [vmem:[#allocation7 + $0x9ac] ss:$28 sps:$4 sm:$0xff]  }
 0x2a1   :  { %6153 = vmatpush1.bf16.msra.mxu0 %v8602_v34  ;;  %v8689_v34 = vld [vmem:[#allocation7 + $0x9a8] ss:$28 sps:$4 sm:$0xff]  }
 0x2a2   :  { %6154 = vmatprep.subr.bf16.mxu0 %v8607_v35  ;;  %v8697_v35 = vld [vmem:[#allocation7 + $0x9e4] ss:$28 sps:$4 sm:$0xff]  }
 0x2a3   :  { %v3319_v41 = vpop.f32.mrb[16].mxu1  ;;  %6024 = vmatpush1.bf16.msra.mxu1 %v8686_v36  ;;  %v8695_v36 = vld [vmem:[#allocation7 + $0x9e0] ss:$28 sps:$4 sm:$0xff]  }
 0x2a4   :  { %v3320_v43 = vadd.f32 %v3319_v41, %v3279_v8  ;;  %v7723_v44 = vpop.f32.mrb[17].mxu1  ;;  %6025 = vmatprep.subr.bf16.mxu1 %v8694_v37  ;;  %v8617_v8 = vld [vmem:[#allocation7 + $0x708] ss:$28 sps:$4 sm:$0xff]   ;;  %v8703_v37 = vld [vmem:[#allocation7 + $0xa1c] ss:$28 sps:$4 sm:$0xff]  }
 0x2a5   :  { %6155 = vmatpush1.bf16.msra.mxu0 %v8605_v38  ;;  %v3322_v47 = vpop.f32.mrb[18].mxu1  ;;  %v8701_v38 = vld [vmem:[#allocation7 + $0xa18] ss:$28 sps:$4 sm:$0xff]   ;;  %v8715_v41 = vld [vmem:[#allocation7 + $0xa8c] ss:$28 sps:$4 sm:$0xff]  }
 0x2a6   :  { %6156 = vmatprep.subr.bf16.mxu0 %v8610_v39  ;;  %vm3332_vm9 = vcmp.gt.f32.partialorder %v3320_v43, 0.0  ;;  %v3383_v50 = vmul.f32 %v3369_v40, %v3320_v43  ;;  %v3323_v51 = vadd.f32 %v3322_v47, %v9457_v12  ;;  %v7724_v54 = vpop.f32.mrb[19].mxu1  ;;  %v8629_v12 = vld [vmem:[#allocation7 + $0x778] ss:$28 sps:$4 sm:$0xff]  }
 0x2a7   :  { %6026 = vmatpush1.bf16.msra.mxu1 %v8692_v42  ;;  %v8709_v39 = vld [vmem:[#allocation7 + $0xa54] ss:$28 sps:$4 sm:$0xff]   ;;  %v9466_v42 = vsub.s32 4, %v9388_v56  ;;  %v9046_v47 = vld [vmem:[#allocation6] sm:$0xff] }
 0x2a8   :  { %v3397_v55 = vsel %vm3332_vm9, %v3320_v43, %v3383_v50  ;;  %vm3339_vm10 = vcmp.gt.f32.partialorder %v3323_v51, 0.0  ;;  %v3390_v1 = vmul.f32 %v3369_v40, %v3323_v51  ;;  %6027 = vmatprep.subr.bf16.mxu1 %v8700_v45  ;;  %v8707_v40 = vld [vmem:[#allocation7 + $0xa50] ss:$28 sps:$4 sm:$0xff]   ;;  %v9469_v43 = vsub.s32 5, %v9388_v56 }
 0x2a9   :  { %6157 = vmatpush1.bf16.msra.mxu0 %v8608_v46  ;;  %v9045_v44 = vld [vmem:[#allocation4] sm:$0xff] }
 0x2aa   :  { %6158 = vmatprep.subr.bf16.mxu0 %v8613_v49  ;;  %v3404_v4 = vsel %vm3339_vm10, %v3323_v51, %v3390_v1  ;;  %v578_v45 = vrot.slane %v9045_v44, %v9466_v42  ;;  %v582_v46 = vrot.slane %v9045_v44, %v9469_v43  ;;  %v3361_v49 = vrot.slane %v9046_v47, %v9466_v42  ;;  %v8754_v44 = vld [vmem:[#allocation7 + $0xc0c] ss:$28 sps:$4 sm:$0xff]  }
 0x2ab   :  { %v9462_v6 = vpack.c.bf16 %v3404_v4, %v3397_v55  ;;  %6028 = vmatpush1.bf16.msra.mxu1 %v8698_v57  ;;  %v3365_v51 = vrot.slane %v9046_v47, %v9469_v43  ;;  %v8755_v47 = vld [vmem:[#allocation7 + $0xc10] ss:$28 sps:$4 sm:$0xff]  }
 0x2ac   :  { %6029 = vmatprep.subr.bf16.mxu1 %v8706_v2 }
 0x2ad   :  { %6159 = vmatpush1.bf16.msra.mxu0 %v8611_v3 }
 0x2ae   :  { %6171 = vmatprep.subr.bf16.mxu0 %v8619_v5 }
 0x2af   :  { %6030 = vmatpush1.bf16.msra.mxu1 %v8704_v7 }
 0x2b0   :  { %6161 = vmatmul.mubr.bf16.vlgmr.msra.gmra.mrb[8].mxu0 %v9426_v53  ;;  %6042 = vmatprep.subr.bf16.mxu1 %v8712_v48 }
 0x2b1   :  { %6172 = vmatpush1.bf16.msra.mxu0 %v8617_v8 }
 0x2b2   :  { %6173 = vmatprep.subr.bf16.mxu0 %v8625_v9 }
 0x2b5   :  { %6174 = vmatpush1.bf16.msra.mxu0 %v8623_v10 }
 0x2b6   :  { %6175 = vmatprep.subr.bf16.mxu0 %v8631_v11 }
 0x2b9   :  { %6176 = vmatpush1.bf16.msra.mxu0 %v8629_v12 }
 0x2ba   :  { %6177 = vmatprep.subr.bf16.mxu0 %v8637_v13 }
 0x2bd   :  { %6178 = vmatpush1.bf16.msra.mxu0 %v8635_v14  ;;  %v8710_v14 = vld [vmem:[#allocation7 + $0xa80] ss:$28 sps:$4 sm:$0xff]  }
 0x2be   :  { %6179 = vmatprep.subr.bf16.mxu0 %v8643_v15  ;;  %v8713_v15 = vld [vmem:[#allocation7 + $0xa88] ss:$28 sps:$4 sm:$0xff]  }
 0x2c1   :  { %6180 = vmatpush1.bf16.msra.mxu0 %v8641_v60  ;;  %v8718_v60 = vld [vmem:[#allocation7 + $0xabc] ss:$28 sps:$4 sm:$0xff]  }
 0x2c2   :  { %6181 = vmatprep.subr.bf16.mxu0 %v8649_v17  ;;  %v8721_v17 = vld [vmem:[#allocation7 + $0xac4] ss:$28 sps:$4 sm:$0xff]  }
 0x2c5   :  { %6182 = vmatpush1.bf16.msra.mxu0 %v8647_v18  ;;  %v8716_v18 = vld [vmem:[#allocation7 + $0xab8] ss:$28 sps:$4 sm:$0xff]  }
 0x2c6   :  { %6183 = vmatprep.subr.bf16.mxu0 %v8655_v20  ;;  %v8719_v20 = vld [vmem:[#allocation7 + $0xac0] ss:$28 sps:$4 sm:$0xff]  }
 0x2c9   :  { %6184 = vmatpush1.bf16.msra.mxu0 %v8653_v22  ;;  %v8724_v22 = vld [vmem:[#allocation7 + $0xaf4] ss:$28 sps:$4 sm:$0xff]  }
 0x2ca   :  { %6185 = vmatprep.subr.bf16.mxu0 %v8661_v23  ;;  %v8727_v23 = vld [vmem:[#allocation7 + $0xafc] ss:$28 sps:$4 sm:$0xff]  }
 0x2cd   :  { %6186 = vmatpush1.bf16.msra.mxu0 %v8659_v24  ;;  %v8722_v24 = vld [vmem:[#allocation7 + $0xaf0] ss:$28 sps:$4 sm:$0xff]  }
 0x2ce   :  { %6187 = vmatprep.subr.bf16.mxu0 %v8667_v25  ;;  %v8725_v25 = vld [vmem:[#allocation7 + $0xaf8] ss:$28 sps:$4 sm:$0xff]  }
 0x2d1   :  { %6188 = vmatpush1.bf16.msra.mxu0 %v8665_v26  ;;  %v8730_v26 = vld [vmem:[#allocation7 + $0xb2c] ss:$28 sps:$4 sm:$0xff]  }
 0x2d2   :  { %6189 = vmatprep.subr.bf16.mxu0 %v8673_v27  ;;  %v8733_v27 = vld [vmem:[#allocation7 + $0xb34] ss:$28 sps:$4 sm:$0xff]  }
 0x2d5   :  { %6190 = vmatpush1.bf16.msra.mxu0 %v8671_v28  ;;  %v8728_v28 = vld [vmem:[#allocation7 + $0xb28] ss:$28 sps:$4 sm:$0xff]  }
 0x2d6   :  { %6191 = vmatprep.subr.bf16.mxu0 %v8679_v29  ;;  %v8731_v29 = vld [vmem:[#allocation7 + $0xb30] ss:$28 sps:$4 sm:$0xff]  }
 0x2d9   :  { %6192 = vmatpush1.bf16.msra.mxu0 %v8677_v30  ;;  %v8736_v30 = vld [vmem:[#allocation7 + $0xb64] ss:$28 sps:$4 sm:$0xff]  }
 0x2da   :  { %6193 = vmatprep.subr.bf16.mxu0 %v8685_v31  ;;  %v8739_v31 = vld [vmem:[#allocation7 + $0xb6c] ss:$28 sps:$4 sm:$0xff]  }
 0x2dd   :  { %6194 = vmatpush1.bf16.msra.mxu0 %v8683_v32  ;;  %v8734_v32 = vld [vmem:[#allocation7 + $0xb60] ss:$28 sps:$4 sm:$0xff]  }
 0x2de   :  { %6195 = vmatprep.subr.bf16.mxu0 %v8691_v33  ;;  %v8737_v33 = vld [vmem:[#allocation7 + $0xb68] ss:$28 sps:$4 sm:$0xff]  }
 0x2e1   :  { %6196 = vmatpush1.bf16.msra.mxu0 %v8689_v34  ;;  %v8742_v34 = vld [vmem:[#allocation7 + $0xb9c] ss:$28 sps:$4 sm:$0xff]  }
 0x2e2   :  { %6197 = vmatprep.subr.bf16.mxu0 %v8697_v35  ;;  %v8745_v35 = vld [vmem:[#allocation7 + $0xba4] ss:$28 sps:$4 sm:$0xff]  }
 0x2e5   :  { %6198 = vmatpush1.bf16.msra.mxu0 %v8695_v36  ;;  %v8740_v36 = vld [vmem:[#allocation7 + $0xb98] ss:$28 sps:$4 sm:$0xff]  }
 0x2e6   :  { %6199 = vmatprep.subr.bf16.mxu0 %v8703_v37  ;;  %v8743_v37 = vld [vmem:[#allocation7 + $0xba0] ss:$28 sps:$4 sm:$0xff]  }
 0x2e9   :  { %6200 = vmatpush1.bf16.msra.mxu0 %v8701_v38  ;;  %v8748_v38 = vld [vmem:[#allocation7 + $0xbd4] ss:$28 sps:$4 sm:$0xff]  }
 0x2ea   :  { %6201 = vmatprep.subr.bf16.mxu0 %v8709_v39  ;;  %v8751_v39 = vld [vmem:[#allocation7 + $0xbdc] ss:$28 sps:$4 sm:$0xff]  }
 0x2ed   :  { %6202 = vmatpush1.bf16.msra.mxu0 %v8707_v40  ;;  %v8746_v40 = vld [vmem:[#allocation7 + $0xbd0] ss:$28 sps:$4 sm:$0xff]  }
 0x2ee   :  { %6214 = vmatprep.subr.bf16.mxu0 %v8715_v41  ;;  %v8749_v41 = vld [vmem:[#allocation7 + $0xbd8] ss:$28 sps:$4 sm:$0xff]  }
 0x303   :  { %v3153_v50 = vpop.f32.mrb[4].mxu0 }
 0x304   :  { %v7753_v54 = vadd.f32 %v3153_v50, %v578_v45  ;;  %v3155_v57 = vpop.f32.mrb[5].mxu0  ;;  %v8761_v50 = vld [vmem:[#allocation7 + $0x1d8] ss:$28 sps:$4 sm:$0xff]  }
 0x305   :  { %v7754_v55 = vadd.f32 %v3155_v57, %v582_v46  ;;  %v3157_v1 = vpop.f32.mrb[6].mxu0  ;;  %v8765_v57 = vld [vmem:[#allocation7 + $0x4c] ss:$28 sps:$4 sm:$0xff]  }
 0x306   :  { %v3381_v2 = vmul.f32 %v7753_v54, %v3361_v49  ;;  %v7755_v3 = vadd.f32 %v3157_v1, %v578_v45  ;;  %v3159_v4 = vpop.f32.mrb[7].mxu0  ;;  %vm3330_vm11 = vcmp.gt.f32.partialorder %v7753_v54, 0.0  ;;  %v8757_v45 = vld [vmem:[#allocation7 + $0xc14] ss:$28 sps:$4 sm:$0xff]   ;;  %v8763_v1 = vld [vmem:[#allocation7 + $0x48] ss:$28 sps:$4 sm:$0xff]  }
 0x307   :  { %v3382_v56 = vmul.f32 %v7754_v55, %v3365_v51  ;;  %v7756_v5 = vadd.f32 %v3159_v4, %v582_v46  ;;  %vm3331_vm12 = vcmp.gt.f32.partialorder %v7754_v55, 0.0  ;;  %v8752_v46 = vld [vmem:[#allocation7 + $0xc08] ss:$28 sps:$4 sm:$0xff]  }
 0x308   :  { %vm3337_vm13 = vcmp.gt.f32.partialorder %v7755_v3, 0.0  ;;  %v3388_v7 = vmul.f32 %v7755_v3, %v3361_v49  ;;  %v3395_v8 = vsel %vm3330_vm11, %v7753_v54, %v3381_v2  ;;  %v8760_v49 = vld [vmem:[#allocation7 + $0x14] ss:$28 sps:$4 sm:$0xff]   ;;  %v8771_v4 = vld [vmem:[#allocation7 + $0x248] ss:$28 sps:$4 sm:$0xff]  }
 0x309   :  { %vm3338_vm14 = vcmp.gt.f32.partialorder %v7756_v5, 0.0  ;;  %v3389_v48 = vmul.f32 %v7756_v5, %v3365_v51  ;;  %v3396_v10 = vsel %vm3331_vm12, %v7754_v55, %v3382_v56  ;;  %v8758_v51 = vld [vmem:[#allocation7 + $0x10] ss:$28 sps:$4 sm:$0xff]   ;;  %v8762_v54 = vld [vmem:[#allocation7 + $0x18] ss:$28 sps:$4 sm:$0xff]  }
 0x30a   :  { %v3402_v9 = vsel %vm3337_vm13, %v7755_v3, %v3388_v7  ;;  %v8766_v55 = vld [vmem:[#allocation7 + $0x210] ss:$28 sps:$4 sm:$0xff]   ;;  %v8770_v3 = vld [vmem:[#allocation7 + $0x84] ss:$28 sps:$4 sm:$0xff]   ;;  %v8775_v7 = vld [vmem:[#allocation7 + $0xbc] ss:$28 sps:$4 sm:$0xff]  }
 0x30b   :  { %v9475_v11 = vpack.c.bf16 %v3402_v9, %v3395_v8  ;;  %v3403_v12 = vsel %vm3338_vm14, %v7756_v5, %v3389_v48  ;;  %v8767_v2 = vld [vmem:[#allocation7 + $0x50] ss:$28 sps:$4 sm:$0xff]   ;;  %v8768_v56 = vld [vmem:[#allocation7 + $0x80] ss:$28 sps:$4 sm:$0xff]   ;;  %v8772_v5 = vld [vmem:[#allocation7 + $0x88] ss:$28 sps:$4 sm:$0xff]  }
 0x30c   :  { %v9477_v13 = vpack.c.bf16 %v3403_v12, %v3396_v10  ;;  %v8776_v48 = vld [vmem:[#allocation7 + $0x280] ss:$28 sps:$4 sm:$0xff]   ;;  %v8773_v8 = vld [vmem:[#allocation7 + $0xb8] ss:$28 sps:$4 sm:$0xff]   ;;  %v8778_v12 = vld [vmem:[#allocation7 + $0xf0] ss:$28 sps:$4 sm:$0xff]  }
 0x30d   :  { %v8777_v9 = vld [vmem:[#allocation7 + $0xc0] ss:$28 sps:$4 sm:$0xff]   ;;  %v8780_v10 = vld [vmem:[#allocation7 + $0xf4] ss:$28 sps:$4 sm:$0xff]  }
 0x30e   :  { %6031 = vmatprep.mubr.bf16.mxu1 %v9477_v13  ;;  %6203 = vmatprep.mubr.bf16.mxu0 %v9477_v13 }
 0x30f   :  { %6032 = vmatmul.mubr.bf16.vlgmr.msra.gmra.mrb[20].mxu1 %v9475_v11  ;;  %6204 = vmatmul.mubr.bf16.vlgmr.msra.gmra.mrb[8].mxu0 %v9475_v11 }
 0x310   :  { %6043 = vmatpush1.bf16.msra.mxu1 %v8710_v14  ;;  %6215 = vmatpush1.bf16.msra.mxu0 %v8713_v15  ;;  %v8782_v14 = vld [vmem:[#allocation7 + $0xf8] ss:$28 sps:$4 sm:$0xff]   ;;  %v8785_v15 = vld [vmem:[#allocation7 + $0x12c] ss:$28 sps:$4 sm:$0xff]  }
 0x311   :  { %6044 = vmatprep.subr.bf16.mxu1 %v8718_v60  ;;  %6216 = vmatprep.subr.bf16.mxu0 %v8721_v17  ;;  %v8786_v60 = vld [vmem:[#allocation7 + $0x2f0] ss:$28 sps:$4 sm:$0xff]   ;;  %v8783_v17 = vld [vmem:[#allocation7 + $0x128] ss:$28 sps:$4 sm:$0xff]  }
 0x312   :  { %6074 = vmatprep.mubr.bf16.mxu1 %v9195_v16  ;;  %6246 = vmatprep.mubr.bf16.mxu0 %v9195_v16 }
 0x314   :  { %6045 = vmatpush1.bf16.msra.mxu1 %v8716_v18  ;;  %6217 = vmatpush1.bf16.msra.mxu0 %v8719_v20  ;;  %v8787_v18 = vld [vmem:[#allocation7 + $0x130] ss:$28 sps:$4 sm:$0xff]   ;;  %v8790_v20 = vld [vmem:[#allocation7 + $0x164] ss:$28 sps:$4 sm:$0xff]  }
 0x315   :  { %6046 = vmatprep.subr.bf16.mxu1 %v8724_v22  ;;  %6218 = vmatprep.subr.bf16.mxu0 %v8727_v23  ;;  %v8791_v22 = vld [vmem:[#allocation7 + $0x328] ss:$28 sps:$4 sm:$0xff]   ;;  %v8788_v23 = vld [vmem:[#allocation7 + $0x160] ss:$28 sps:$4 sm:$0xff]  }
 0x318   :  { %6047 = vmatpush1.bf16.msra.mxu1 %v8722_v24  ;;  %6219 = vmatpush1.bf16.msra.mxu0 %v8725_v25  ;;  %v8792_v24 = vld [vmem:[#allocation7 + $0x168] ss:$28 sps:$4 sm:$0xff]   ;;  %v8795_v25 = vld [vmem:[#allocation7 + $0x19c] ss:$28 sps:$4 sm:$0xff]  }
 0x319   :  { %6048 = vmatprep.subr.bf16.mxu1 %v8730_v26  ;;  %6220 = vmatprep.subr.bf16.mxu0 %v8733_v27  ;;  %v8796_v26 = vld [vmem:[#allocation7 + $0x360] ss:$28 sps:$4 sm:$0xff]   ;;  %v8793_v27 = vld [vmem:[#allocation7 + $0x198] ss:$28 sps:$4 sm:$0xff]  }
 0x31c   :  { %6049 = vmatpush1.bf16.msra.mxu1 %v8728_v28  ;;  %6221 = vmatpush1.bf16.msra.mxu0 %v8731_v29  ;;  %v8797_v28 = vld [vmem:[#allocation7 + $0x1a0] ss:$28 sps:$4 sm:$0xff]   ;;  %v8800_v29 = vld [vmem:[#allocation7 + $0x1d4] ss:$28 sps:$4 sm:$0xff]  }
 0x31d   :  { %6050 = vmatprep.subr.bf16.mxu1 %v8736_v30  ;;  %6222 = vmatprep.subr.bf16.mxu0 %v8739_v31  ;;  %v8801_v30 = vld [vmem:[#allocation7 + $0x558] ss:$28 sps:$4 sm:$0xff]   ;;  %v8798_v31 = vld [vmem:[#allocation7 + $0x1d0] ss:$28 sps:$4 sm:$0xff]  }
 0x320   :  { %6051 = vmatpush1.bf16.msra.mxu1 %v8734_v32  ;;  %6223 = vmatpush1.bf16.msra.mxu0 %v8737_v33  ;;  %v8802_v32 = vld [vmem:[#allocation7 + $0x398] ss:$28 sps:$4 sm:$0xff]   ;;  %v8805_v33 = vld [vmem:[#allocation7 + $0x20c] ss:$28 sps:$4 sm:$0xff]  }
 0x321   :  { %6052 = vmatprep.subr.bf16.mxu1 %v8742_v34  ;;  %6224 = vmatprep.subr.bf16.mxu0 %v8745_v35  ;;  %v8806_v34 = vld [vmem:[#allocation7 + $0x590] ss:$28 sps:$4 sm:$0xff]   ;;  %v8803_v35 = vld [vmem:[#allocation7 + $0x208] ss:$28 sps:$4 sm:$0xff]  }
 0x324   :  { %6053 = vmatpush1.bf16.msra.mxu1 %v8740_v36  ;;  %6225 = vmatpush1.bf16.msra.mxu0 %v8743_v37  ;;  %v8807_v36 = vld [vmem:[#allocation7 + $0x3d0] ss:$28 sps:$4 sm:$0xff]   ;;  %v8810_v37 = vld [vmem:[#allocation7 + $0x244] ss:$28 sps:$4 sm:$0xff]  }
 0x325   :  { %6054 = vmatprep.subr.bf16.mxu1 %v8748_v38  ;;  %6226 = vmatprep.subr.bf16.mxu0 %v8751_v39  ;;  %v8811_v38 = vld [vmem:[#allocation7 + $0x5c8] ss:$28 sps:$4 sm:$0xff]   ;;  %v8808_v39 = vld [vmem:[#allocation7 + $0x240] ss:$28 sps:$4 sm:$0xff]  }
 0x328   :  { %6055 = vmatpush1.bf16.msra.mxu1 %v8746_v40  ;;  %6227 = vmatpush1.bf16.msra.mxu0 %v8749_v41  ;;  %v8812_v40 = vld [vmem:[#allocation7 + $0x408] ss:$28 sps:$4 sm:$0xff]   ;;  %v8815_v41 = vld [vmem:[#allocation7 + $0x27c] ss:$28 sps:$4 sm:$0xff]  }
 0x329   :  { %6056 = vmatprep.subr.bf16.mxu1 %v8754_v44  ;;  %6228 = vmatprep.subr.bf16.mxu0 %v8757_v45  ;;  %v8816_v44 = vld [vmem:[#allocation7 + $0x600] ss:$28 sps:$4 sm:$0xff]   ;;  %v8813_v45 = vld [vmem:[#allocation7 + $0x278] ss:$28 sps:$4 sm:$0xff]  }
 0x32c   :  { %6057 = vmatpush1.bf16.msra.mxu1 %v8752_v46  ;;  %6229 = vmatpush1.bf16.msra.mxu0 %v8755_v47  ;;  %v8817_v46 = vld [vmem:[#allocation7 + $0x440] ss:$28 sps:$4 sm:$0xff]   ;;  %v8820_v47 = vld [vmem:[#allocation7 + $0x2b4] ss:$28 sps:$4 sm:$0xff]  }
 0x32d   :  { %6257 = vmatprep.subr.bf16.mxu1 %v8760_v49  ;;  %7630 = vmatprep.subr.bf16.mxu0 %v8761_v50  ;;  %v8821_v49 = vld [vmem:[#allocation7 + $0x638] ss:$28 sps:$4 sm:$0xff]   ;;  %v8818_v50 = vld [vmem:[#allocation7 + $0x2b0] ss:$28 sps:$4 sm:$0xff]  }
 0x32f   :  { %6075 = vmatmul.mubr.bf16.vlgmr.msra.gmra.mrb[20].mxu1 %v9462_v6  ;;  %6247 = vmatmul.mubr.bf16.vlgmr.msra.gmra.mrb[8].mxu0 %v9462_v6 }
 0x330   :  { %6258 = vmatpush1.bf16.msra.mxu1 %v8758_v51  ;;  %6289 = vmatprep.mubr.bf16.mxu1 %v9428_v58  ;;  %v8822_v51 = vld [vmem:[#allocation7 + $0x478] ss:$28 sps:$4 sm:$0xff]  }
 0x331   :  { %7631 = vmatpush3.bf16.msra.mxu0 %v8762_v54  ;;  %6461 = vmatprep.mubr.bf16.mxu0 %v9428_v58  ;;  %v8781_v58 = vld [vmem:[#allocation7 + $0x2b8] ss:$28 sps:$4 sm:$0xff]   ;;  %v8825_v54 = vld [vmem:[#allocation7 + $0x2ec] ss:$28 sps:$4 sm:$0xff]  }
 0x332   :  { %6259 = vmatprep.subr.bf16.mxu1 %v8765_v57  ;;  %7632 = vmatprep.subr.bf16.mxu0 %v8766_v55  ;;  %v8826_v57 = vld [vmem:[#allocation7 + $0x670] ss:$28 sps:$4 sm:$0xff]   ;;  %v8823_v55 = vld [vmem:[#allocation7 + $0x2e8] ss:$28 sps:$4 sm:$0xff]  }
 0x334   :  { %6260 = vmatpush1.bf16.msra.mxu1 %v8763_v1  ;;  %v8827_v1 = vld [vmem:[#allocation7 + $0x4b0] ss:$28 sps:$4 sm:$0xff]  }
 0x335   :  { %7633 = vmatpush3.bf16.msra.mxu0 %v8767_v2  ;;  %6261 = vmatprep.subr.bf16.mxu1 %v8770_v3  ;;  %v8830_v2 = vld [vmem:[#allocation7 + $0x324] ss:$28 sps:$4 sm:$0xff]  }
 0x336   :  { %7634 = vmatprep.subr.bf16.mxu0 %v8771_v4  ;;  %v8831_v3 = vld [vmem:[#allocation7 + $0x6a8] ss:$28 sps:$4 sm:$0xff]   ;;  %v8828_v4 = vld [vmem:[#allocation7 + $0x320] ss:$28 sps:$4 sm:$0xff]  }
 0x338   :  { %6262 = vmatpush1.bf16.msra.mxu1 %v8768_v56  ;;  %v8832_v56 = vld [vmem:[#allocation7 + $0x4e8] ss:$28 sps:$4 sm:$0xff]  }
 0x339   :  { %7635 = vmatpush3.bf16.msra.mxu0 %v8772_v5  ;;  %6263 = vmatprep.subr.bf16.mxu1 %v8775_v7  ;;  %v8835_v5 = vld [vmem:[#allocation7 + $0x35c] ss:$28 sps:$4 sm:$0xff]  }
 0x33a   :  { %7636 = vmatprep.subr.bf16.mxu0 %v8776_v48  ;;  %v8836_v7 = vld [vmem:[#allocation7 + $0x6e0] ss:$28 sps:$4 sm:$0xff]   ;;  %v8833_v48 = vld [vmem:[#allocation7 + $0x358] ss:$28 sps:$4 sm:$0xff]  }
 0x33c   :  { %6264 = vmatpush1.bf16.msra.mxu1 %v8773_v8  ;;  %v8837_v8 = vld [vmem:[#allocation7 + $0x520] ss:$28 sps:$4 sm:$0xff]  }
 0x33d   :  { %7637 = vmatpush3.bf16.msra.mxu0 %v8777_v9  ;;  %6265 = vmatprep.subr.bf16.mxu1 %v8780_v10  ;;  %v8840_v9 = vld [vmem:[#allocation7 + $0x394] ss:$28 sps:$4 sm:$0xff]  }
 0x33e   :  { %7638 = vmatprep.subr.bf16.mxu0 %v8781_v58  ;;  %v8841_v10 = vld [vmem:[#allocation7 + $0x8d8] ss:$28 sps:$4 sm:$0xff]   ;;  %v8838_v58 = vld [vmem:[#allocation7 + $0x390] ss:$28 sps:$4 sm:$0xff]  }
 0x340   :  { %6266 = vmatpush1.bf16.msra.mxu1 %v8778_v12  ;;  %v8842_v12 = vld [vmem:[#allocation7 + $0x718] ss:$28 sps:$4 sm:$0xff]  }
 0x341   :  { %7639 = vmatpush3.bf16.msra.mxu0 %v8782_v14  ;;  %6267 = vmatprep.subr.bf16.mxu1 %v8785_v15  ;;  %v8845_v14 = vld [vmem:[#allocation7 + $0x3cc] ss:$28 sps:$4 sm:$0xff]  }
 0x342   :  { %7640 = vmatprep.subr.bf16.mxu0 %v8786_v60  ;;  %v8846_v15 = vld [vmem:[#allocation7 + $0x910] ss:$28 sps:$4 sm:$0xff]   ;;  %v8843_v60 = vld [vmem:[#allocation7 + $0x3c8] ss:$28 sps:$4 sm:$0xff]  }
 0x344   :  { %6268 = vmatpush1.bf16.msra.mxu1 %v8783_v17  ;;  %v8847_v17 = vld [vmem:[#allocation7 + $0x750] ss:$28 sps:$4 sm:$0xff]  }
 0x345   :  { %7641 = vmatpush3.bf16.msra.mxu0 %v8787_v18  ;;  %6269 = vmatprep.subr.bf16.mxu1 %v8790_v20  ;;  %v8850_v18 = vld [vmem:[#allocation7 + $0x404] ss:$28 sps:$4 sm:$0xff]  }
 0x346   :  { %7642 = vmatprep.subr.bf16.mxu0 %v8791_v22  ;;  %v8851_v20 = vld [vmem:[#allocation7 + $0x948] ss:$28 sps:$4 sm:$0xff]   ;;  %v8848_v22 = vld [vmem:[#allocation7 + $0x400] ss:$28 sps:$4 sm:$0xff]  }
 0x348   :  { %6270 = vmatpush1.bf16.msra.mxu1 %v8788_v23  ;;  %v8855_v23 = vld [vmem:[#allocation7 + $0x43c] ss:$28 sps:$4 sm:$0xff]  }
 0x349   :  { %7643 = vmatpush3.bf16.msra.mxu0 %v8792_v24  ;;  %6271 = vmatprep.subr.bf16.mxu1 %v8795_v25  ;;  %v8856_v24 = vld [vmem:[#allocation7 + $0x980] ss:$28 sps:$4 sm:$0xff]   ;;  %v8853_v25 = vld [vmem:[#allocation7 + $0x438] ss:$28 sps:$4 sm:$0xff]  }
 0x34a   :  { %7644 = vmatprep.subr.bf16.mxu0 %v8796_v26  ;;  %v8860_v26 = vld [vmem:[#allocation7 + $0x474] ss:$28 sps:$4 sm:$0xff]  }
 0x34c   :  { %6272 = vmatpush1.bf16.msra.mxu1 %v8793_v27  ;;  %v8861_v27 = vld [vmem:[#allocation7 + $0x9b8] ss:$28 sps:$4 sm:$0xff]  }
 0x34d   :  { %7645 = vmatpush3.bf16.msra.mxu0 %v8797_v28  ;;  %6273 = vmatprep.subr.bf16.mxu1 %v8800_v29  ;;  %v8858_v28 = vld [vmem:[#allocation7 + $0x470] ss:$28 sps:$4 sm:$0xff]   ;;  %v8862_v29 = vld [vmem:[#allocation7 + $0x7f8] ss:$28 sps:$4 sm:$0xff]  }
 0x34e   :  { %7652 = vmatprep.subr.bf16.mxu0 %v8801_v30  ;;  %v8865_v30 = vld [vmem:[#allocation7 + $0x4ac] ss:$28 sps:$4 sm:$0xff]  }
 0x350   :  { %6462 = vmatmul.mubr.bf16.vlgmr.msra.gmra.mrb[12].mxu0 %v9424_v52  ;;  %6274 = vmatpush1.bf16.msra.mxu1 %v8798_v31  ;;  %v8866_v31 = vld [vmem:[#allocation7 + $0x9f0] ss:$28 sps:$4 sm:$0xff]  }
 0x351   :  { %7653 = vmatpush3.bf16.msra.mxu0 %v8802_v32  ;;  %6502 = vmatprep.mubr.bf16.mxu0 %v9430_v21  ;;  %v8863_v32 = vld [vmem:[#allocation7 + $0x4a8] ss:$28 sps:$4 sm:$0xff]  }
 0x352   :  { %6275 = vmatprep.subr.bf16.mxu1 %v8805_v33  ;;  %7654 = vmatprep.subr.bf16.mxu0 %v8806_v34  ;;  %v8867_v33 = vld [vmem:[#allocation7 + $0x830] ss:$28 sps:$4 sm:$0xff]   ;;  %v8870_v34 = vld [vmem:[#allocation7 + $0x4e4] ss:$28 sps:$4 sm:$0xff]  }
 0x354   :  { %6276 = vmatpush1.bf16.msra.mxu1 %v8803_v35  ;;  %v8871_v35 = vld [vmem:[#allocation7 + $0xa28] ss:$28 sps:$4 sm:$0xff]  }
 0x355   :  { %7655 = vmatpush3.bf16.msra.mxu0 %v8807_v36  ;;  %6277 = vmatprep.subr.bf16.mxu1 %v8810_v37  ;;  %v8868_v36 = vld [vmem:[#allocation7 + $0x4e0] ss:$28 sps:$4 sm:$0xff]   ;;  %v8872_v37 = vld [vmem:[#allocation7 + $0x868] ss:$28 sps:$4 sm:$0xff]  }
 0x356   :  { %7656 = vmatprep.subr.bf16.mxu0 %v8811_v38  ;;  %v8875_v38 = vld [vmem:[#allocation7 + $0x51c] ss:$28 sps:$4 sm:$0xff]  }
 0x358   :  { %6278 = vmatpush1.bf16.msra.mxu1 %v8808_v39  ;;  %v8876_v39 = vld [vmem:[#allocation7 + $0xa60] ss:$28 sps:$4 sm:$0xff]  }
 0x359   :  { %7657 = vmatpush3.bf16.msra.mxu0 %v8812_v40  ;;  %6279 = vmatprep.subr.bf16.mxu1 %v8815_v41  ;;  %v8873_v40 = vld [vmem:[#allocation7 + $0x518] ss:$28 sps:$4 sm:$0xff]   ;;  %v8877_v41 = vld [vmem:[#allocation7 + $0x8a0] ss:$28 sps:$4 sm:$0xff]  }
 0x35a   :  { %7658 = vmatprep.subr.bf16.mxu0 %v8816_v44  ;;  %v8880_v44 = vld [vmem:[#allocation7 + $0x554] ss:$28 sps:$4 sm:$0xff]  }
 0x35c   :  { %6280 = vmatpush1.bf16.msra.mxu1 %v8813_v45  ;;  %v8878_v45 = vld [vmem:[#allocation7 + $0x550] ss:$28 sps:$4 sm:$0xff]  }
 0x35d   :  { %7659 = vmatpush3.bf16.msra.mxu0 %v8817_v46  ;;  %6281 = vmatprep.subr.bf16.mxu1 %v8820_v47  ;;  %v8881_v46 = vld [vmem:[#allocation7 + $0xa98] ss:$28 sps:$4 sm:$0xff]   ;;  %v8884_v47 = vld [vmem:[#allocation7 + $0x58c] ss:$28 sps:$4 sm:$0xff]  }
 0x35e   :  { %7660 = vmatprep.subr.bf16.mxu0 %v8821_v49  ;;  %v8882_v49 = vld [vmem:[#allocation7 + $0x588] ss:$28 sps:$4 sm:$0xff]  }
 0x360   :  { %6282 = vmatpush1.bf16.msra.mxu1 %v8818_v50  ;;  %v8885_v50 = vld [vmem:[#allocation7 + $0xad0] ss:$28 sps:$4 sm:$0xff]  }
 0x361   :  { %7661 = vmatpush3.bf16.msra.mxu0 %v8822_v51  ;;  %6283 = vmatprep.subr.bf16.mxu1 %v8825_v54  ;;  %v8888_v51 = vld [vmem:[#allocation7 + $0x5c4] ss:$28 sps:$4 sm:$0xff]  }
 0x362   :  { %7662 = vmatprep.subr.bf16.mxu0 %v8826_v57  ;;  %v8886_v54 = vld [vmem:[#allocation7 + $0x5c0] ss:$28 sps:$4 sm:$0xff]   ;;  %v8889_v57 = vld [vmem:[#allocation7 + $0xb08] ss:$28 sps:$4 sm:$0xff]  }
 0x364   :  { %6284 = vmatpush1.bf16.msra.mxu1 %v8823_v55  ;;  %v8892_v55 = vld [vmem:[#allocation7 + $0x5fc] ss:$28 sps:$4 sm:$0xff]  }
 0x365   :  { %7663 = vmatpush3.bf16.msra.mxu0 %v8827_v1  ;;  %6285 = vmatprep.subr.bf16.mxu1 %v8830_v2  ;;  %v8890_v1 = vld [vmem:[#allocation7 + $0x5f8] ss:$28 sps:$4 sm:$0xff]   ;;  %v8893_v2 = vld [vmem:[#allocation7 + $0xb40] ss:$28 sps:$4 sm:$0xff]  }
 0x366   :  { %7664 = vmatprep.subr.bf16.mxu0 %v8831_v3  ;;  %v8896_v3 = vld [vmem:[#allocation7 + $0x634] ss:$28 sps:$4 sm:$0xff]  }
 0x368   :  { %6286 = vmatpush1.bf16.msra.mxu1 %v8828_v4  ;;  %v8894_v4 = vld [vmem:[#allocation7 + $0x630] ss:$28 sps:$4 sm:$0xff]  }
 0x369   :  { %7665 = vmatpush3.bf16.msra.mxu0 %v8832_v56  ;;  %6287 = vmatprep.subr.bf16.mxu1 %v8835_v5  ;;  %v8897_v56 = vld [vmem:[#allocation7 + $0xb78] ss:$28 sps:$4 sm:$0xff]   ;;  %v8900_v5 = vld [vmem:[#allocation7 + $0x66c] ss:$28 sps:$4 sm:$0xff]  }
 0x36a   :  { %7666 = vmatprep.subr.bf16.mxu0 %v8836_v7  ;;  %v8898_v7 = vld [vmem:[#allocation7 + $0x668] ss:$28 sps:$4 sm:$0xff]  }
 0x36c   :  { %6288 = vmatpush1.bf16.msra.mxu1 %v8833_v48  ;;  %v8901_v48 = vld [vmem:[#allocation7 + $0xbb0] ss:$28 sps:$4 sm:$0xff]  }
 0x36d   :  { %7667 = vmatpush3.bf16.msra.mxu0 %v8837_v8  ;;  %6300 = vmatprep.subr.bf16.mxu1 %v8840_v9  ;;  %v8904_v8 = vld [vmem:[#allocation7 + $0x6a4] ss:$28 sps:$4 sm:$0xff]  }
 0x36e   :  { %7674 = vmatprep.subr.bf16.mxu0 %v8841_v10  ;;  %v8902_v9 = vld [vmem:[#allocation7 + $0x6a0] ss:$28 sps:$4 sm:$0xff]   ;;  %v8905_v10 = vld [vmem:[#allocation7 + $0xbe8] ss:$28 sps:$4 sm:$0xff]  }
 0x36f   :  { %6290 = vmatmul.mubr.bf16.vlgmr.msra.gmra.mrb[24].mxu1 %v9424_v52  ;;  %v8852_v52 = vld [vmem:[#allocation7 + $0x788] ss:$28 sps:$4 sm:$0xff]  }
 0x370   :  { %6503 = vmatmul.mubr.bf16.vlgmr.msra.gmra.mrb[16].mxu0 %v9426_v53  ;;  %6301 = vmatpush1.bf16.msra.mxu1 %v8838_v58  ;;  %v8908_v58 = vld [vmem:[#allocation7 + $0x6dc] ss:$28 sps:$4 sm:$0xff]  }
 0x371   :  { %6332 = vmatprep.mubr.bf16.mxu1 %v9430_v21  ;;  %7675 = vmatpush3.bf16.msra.mxu0 %v8842_v12  ;;  %v8857_v21 = vld [vmem:[#allocation7 + $0x7c0] ss:$28 sps:$4 sm:$0xff]   ;;  %v8906_v12 = vld [vmem:[#allocation7 + $0x6d8] ss:$28 sps:$4 sm:$0xff]  }
 0x372   :  { %6543 = vmatprep.mubr.bf16.mxu0 %v9477_v13  ;;  %6302 = vmatprep.subr.bf16.mxu1 %v8845_v14  ;;  %v8909_v14 = vld [vmem:[#allocation7 + $0xc20] ss:$28 sps:$4 sm:$0xff]  }
 0x373   :  { %7676 = vmatprep.subr.bf16.mxu0 %v8846_v15  ;;  %v8912_v15 = vld [vmem:[#allocation7 + $0x714] ss:$28 sps:$4 sm:$0xff]  }
 0x374   :  { %6303 = vmatpush1.bf16.msra.mxu1 %v8843_v60  ;;  %v8910_v60 = vld [vmem:[#allocation7 + $0x710] ss:$28 sps:$4 sm:$0xff]  }
 0x375   :  { %7677 = vmatpush3.bf16.msra.mxu0 %v8847_v17  ;;  %6304 = vmatprep.subr.bf16.mxu1 %v8850_v18  ;;  %v8915_v17 = vld [vmem:[#allocation7 + $0x74c] ss:$28 sps:$4 sm:$0xff]  }
 0x376   :  { %7678 = vmatprep.subr.bf16.mxu0 %v8851_v20  ;;  %v8913_v18 = vld [vmem:[#allocation7 + $0x748] ss:$28 sps:$4 sm:$0xff]  }
 0x377   :  { %v8918_v20 = vld [vmem:[#allocation7 + $0x784] ss:$28 sps:$4 sm:$0xff]  }
 0x378   :  { %6305 = vmatpush1.bf16.msra.mxu1 %v8848_v22  ;;  %v8916_v22 = vld [vmem:[#allocation7 + $0x780] ss:$28 sps:$4 sm:$0xff]  }
 0x379   :  { %7679 = vmatpush3.bf16.msra.mxu0 %v8852_v52  ;;  %6306 = vmatprep.subr.bf16.mxu1 %v8855_v23  ;;  %v8921_v52 = vld [vmem:[#allocation7 + $0x7bc] ss:$28 sps:$4 sm:$0xff]   ;;  %v8924_v23 = vld [vmem:[#allocation7 + $0x7f4] ss:$28 sps:$4 sm:$0xff]  }
 0x37a   :  { %7680 = vmatprep.subr.bf16.mxu0 %v8856_v24  ;;  %v8922_v24 = vld [vmem:[#allocation7 + $0x7f0] ss:$28 sps:$4 sm:$0xff]  }
 0x37c   :  { %6307 = vmatpush1.bf16.msra.mxu1 %v8853_v25  ;;  %v8925_v25 = vld [vmem:[#allocation7 + $0x828] ss:$28 sps:$4 sm:$0xff]  }
 0x37d   :  { %7681 = vmatpush3.bf16.msra.mxu0 %v8857_v21  ;;  %6308 = vmatprep.subr.bf16.mxu1 %v8860_v26  ;;  %v8930_v21 = vld [vmem:[#allocation7 + $0x864] ss:$28 sps:$4 sm:$0xff]   ;;  %v8933_v26 = vld [vmem:[#allocation7 + $0x89c] ss:$28 sps:$4 sm:$0xff]  }
 0x37e   :  { %7682 = vmatprep.subr.bf16.mxu0 %v8861_v27  ;;  %v8931_v27 = vld [vmem:[#allocation7 + $0x898] ss:$28 sps:$4 sm:$0xff]  }
 0x380   :  { %6309 = vmatpush1.bf16.msra.mxu1 %v8858_v28  ;;  %v8936_v28 = vld [vmem:[#allocation7 + $0x8d4] ss:$28 sps:$4 sm:$0xff]  }
 0x381   :  { %7683 = vmatpush3.bf16.msra.mxu0 %v8862_v29  ;;  %6310 = vmatprep.subr.bf16.mxu1 %v8865_v30  ;;  %v8934_v29 = vld [vmem:[#allocation7 + $0x8d0] ss:$28 sps:$4 sm:$0xff]  }
 0x382   :  { %7684 = vmatprep.subr.bf16.mxu0 %v8866_v31  ;;  %v8939_v30 = vld [vmem:[#allocation7 + $0x90c] ss:$28 sps:$4 sm:$0xff]  }
 0x383   :  { %v8937_v31 = vld [vmem:[#allocation7 + $0x908] ss:$28 sps:$4 sm:$0xff]  }
 0x384   :  { %6311 = vmatpush1.bf16.msra.mxu1 %v8863_v32  ;;  %v8942_v32 = vld [vmem:[#allocation7 + $0x944] ss:$28 sps:$4 sm:$0xff]  }
 0x385   :  { %7685 = vmatpush3.bf16.msra.mxu0 %v8867_v33  ;;  %6312 = vmatprep.subr.bf16.mxu1 %v8870_v34  ;;  %v8940_v33 = vld [vmem:[#allocation7 + $0x940] ss:$28 sps:$4 sm:$0xff]  }
 0x386   :  { %7686 = vmatprep.subr.bf16.mxu0 %v8871_v35  ;;  %v8945_v34 = vld [vmem:[#allocation7 + $0x97c] ss:$28 sps:$4 sm:$0xff]  }
 0x387   :  { %v8943_v35 = vld [vmem:[#allocation7 + $0x978] ss:$28 sps:$4 sm:$0xff]  }
 0x388   :  { %6313 = vmatpush1.bf16.msra.mxu1 %v8868_v36  ;;  %v8948_v36 = vld [vmem:[#allocation7 + $0x9b4] ss:$28 sps:$4 sm:$0xff]  }
 0x389   :  { %7687 = vmatpush3.bf16.msra.mxu0 %v8872_v37  ;;  %6314 = vmatprep.subr.bf16.mxu1 %v8875_v38  ;;  %v8946_v37 = vld [vmem:[#allocation7 + $0x9b0] ss:$28 sps:$4 sm:$0xff]  }
 0x38a   :  { %7688 = vmatprep.subr.bf16.mxu0 %v8876_v39  ;;  %v8951_v38 = vld [vmem:[#allocation7 + $0x9ec] ss:$28 sps:$4 sm:$0xff]  }
 0x38b   :  { %v8949_v39 = vld [vmem:[#allocation7 + $0x9e8] ss:$28 sps:$4 sm:$0xff]  }
 0x38c   :  { %6315 = vmatpush1.bf16.msra.mxu1 %v8873_v40  ;;  %v8954_v40 = vld [vmem:[#allocation7 + $0xa24] ss:$28 sps:$4 sm:$0xff]  }
 0x38d   :  { %7689 = vmatpush3.bf16.msra.mxu0 %v8877_v41  ;;  %6316 = vmatprep.subr.bf16.mxu1 %v8880_v44  ;;  %v8952_v41 = vld [vmem:[#allocation7 + $0xa20] ss:$28 sps:$4 sm:$0xff]  }
 0x38e   :  { %7725 = vmatprep.subr.bf16.mxu0 %v9196_v19  ;;  %v8957_v44 = vld [vmem:[#allocation7 + $0xa5c] ss:$28 sps:$4 sm:$0xff]  }
 0x390   :  { %6544 = vmatmul.mubr.bf16.vlgmr.msra.gmra.mrb[20].mxu0 %v9475_v11  ;;  %6317 = vmatpush1.bf16.msra.mxu1 %v8878_v45  ;;  %v8955_v45 = vld [vmem:[#allocation7 + $0xa58] ss:$28 sps:$4 sm:$0xff]  }
 0x391   :  { %7726 = vmatpush3.bf16.msra.mxu0 %v8881_v46  ;;  %6318 = vmatprep.subr.bf16.mxu1 %v8884_v47  ;;  %v8960_v46 = vld [vmem:[#allocation7 + $0xa94] ss:$28 sps:$4 sm:$0xff]  }
 0x392   :  { %7727 = vmatprep.subr.bf16.mxu0 %v9196_v19  ;;  %7741 = vmatprep.mubr.msk.bf16.mxu0 %vm9197_vm0, %v9196_v19  ;;  %v8958_v47 = vld [vmem:[#allocation7 + $0xa90] ss:$28 sps:$4 sm:$0xff]  }
 0x394   :  { %6319 = vmatpush1.bf16.msra.mxu1 %v8882_v49  ;;  %v8963_v49 = vld [vmem:[#allocation7 + $0xacc] ss:$28 sps:$4 sm:$0xff]  }
 0x395   :  { %7728 = vmatpush3.bf16.msra.mxu0 %v8885_v50  ;;  %6320 = vmatprep.subr.bf16.mxu1 %v8888_v51  ;;  %v8961_v50 = vld [vmem:[#allocation7 + $0xac8] ss:$28 sps:$4 sm:$0xff]  }
 0x396   :  { %7729 = vmatprep.subr.bf16.mxu0 %v9196_v19  ;;  %v8966_v51 = vld [vmem:[#allocation7 + $0xb04] ss:$28 sps:$4 sm:$0xff]  }
 0x398   :  { %6321 = vmatpush1.bf16.msra.mxu1 %v8886_v54  ;;  %v8964_v54 = vld [vmem:[#allocation7 + $0xb00] ss:$28 sps:$4 sm:$0xff]  }
 0x399   :  { %7730 = vmatpush3.bf16.msra.mxu0 %v8889_v57  ;;  %6322 = vmatprep.subr.bf16.mxu1 %v8892_v55  ;;  %v8969_v57 = vld [vmem:[#allocation7 + $0xb3c] ss:$28 sps:$4 sm:$0xff]  }
 0x39a   :  { %7731 = vmatprep.subr.bf16.mxu0 %v9196_v19  ;;  %v8967_v55 = vld [vmem:[#allocation7 + $0xb38] ss:$28 sps:$4 sm:$0xff]  }
 0x39c   :  { %6323 = vmatpush1.bf16.msra.mxu1 %v8890_v1  ;;  %v8972_v1 = vld [vmem:[#allocation7 + $0xb74] ss:$28 sps:$4 sm:$0xff]  }
 0x39d   :  { %7732 = vmatpush3.bf16.msra.mxu0 %v8893_v2  ;;  %6324 = vmatprep.subr.bf16.mxu1 %v8896_v3  ;;  %v8970_v2 = vld [vmem:[#allocation7 + $0xb70] ss:$28 sps:$4 sm:$0xff]   ;;  %v9511_v3 = vld [vmem:[#allocation9] sm:$0xff] }
 0x39e   :  { %7733 = vmatprep.subr.bf16.mxu0 %v9196_v19 }
 0x3a0   :  { %6325 = vmatpush1.bf16.msra.mxu1 %v8894_v4  ;;  %v9513_v4 = vld [vmem:[#allocation10] sm:$0xff] }
 0x3a1   :  { %7734 = vmatpush3.bf16.msra.mxu0 %v8897_v56  ;;  %6326 = vmatprep.subr.bf16.mxu1 %v8900_v5  ;;  %v3873_v56 = vrot.slane %v9511_v3, %v9396_v61  ;;  %v3869_v5 = vrot.slane %v9511_v3, %v9399_v62 }
 0x3a2   :  { %7735 = vmatprep.subr.bf16.mxu0 %v9196_v19 }
 0x3a4   :  { %6327 = vmatpush1.bf16.msra.mxu1 %v8898_v7  ;;  %v3877_v7 = vrot.slane %v9511_v3, %v9404_v63 }
 0x3a5   :  { %7736 = vmatpush3.bf16.msra.mxu0 %v8901_v48  ;;  %6328 = vmatprep.subr.bf16.mxu1 %v8904_v8  ;;  %v8973_v48 = vld [vmem:[#allocation7 + $0xba8] ss:$28 sps:$4 sm:$0xff]   ;;  %v6612_v8 = vrot.slane %v9513_v4, %v9391_v59 }
 0x3a6   :  { %7737 = vmatprep.subr.bf16.mxu0 %v9196_v19 }
 0x3a8   :  { %6329 = vmatpush1.bf16.msra.mxu1 %v8902_v9  ;;  %v6620_v9 = vrot.slane %v9513_v4, %v9396_v61  ;;  %v8976_v61 = vld [vmem:[#allocation7 + $0xbe0] ss:$28 sps:$4 sm:$0xff]  }
 0x3a9   :  { %7738 = vmatpush3.bf16.msra.mxu0 %v8905_v10  ;;  %6330 = vmatprep.subr.bf16.mxu1 %v8908_v58  ;;  %v8978_v10 = vld [vmem:[#allocation7 + $0xbe4] ss:$28 sps:$4 sm:$0xff]  }
 0x3aa   :  { %7739 = vmatprep.subr.bf16.mxu0 %v9196_v19  ;;  %v8919_v19 = vld [vmem:[#allocation7 + $0x7b8] ss:$28 sps:$4 sm:$0xff]  }
 0x3ac   :  { %6331 = vmatpush1.bf16.msra.mxu1 %v8906_v12 }
 0x3ad   :  { %7740 = vmatpush3.bf16.msra.mxu0 %v8909_v14  ;;  %6343 = vmatprep.subr.bf16.mxu1 %v8912_v15  ;;  %v6616_v14 = vrot.slane %v9513_v4, %v9399_v62  ;;  %v6624_v15 = vrot.slane %v9513_v4, %v9404_v63  ;;  %v8981_v62 = vld [vmem:[#allocation7 + $0xc1c] ss:$28 sps:$4 sm:$0xff]  }
 0x3af   :  { %6333 = vmatmul.mubr.bf16.vlgmr.msra.gmra.mrb[24].mxu1 %v9426_v53  ;;  %v8927_v53 = vld [vmem:[#allocation7 + $0x82c] ss:$28 sps:$4 sm:$0xff]  }
 0x3b0   :  { %7742 = vmatmul.mubr.bf16.vlgmr.msra.gmra.mrb[24].mxu0 %v9462_v6  ;;  %6344 = vmatpush1.bf16.msra.mxu1 %v8910_v60 }
 0x3b1   :  { %6375 = vmatprep.mubr.bf16.mxu1 %v9477_v13  ;;  %6345 = vmatprep.subr.bf16.mxu1 %v8915_v17  ;;  %v8928_v13 = vld [vmem:[#allocation7 + $0x860] ss:$28 sps:$4 sm:$0xff]  }
 0x3b4   :  { %6346 = vmatpush1.bf16.msra.mxu1 %v8913_v18 }
 0x3b5   :  { %6347 = vmatprep.subr.bf16.mxu1 %v8918_v20 }
 0x3b8   :  { %6348 = vmatpush1.bf16.msra.mxu1 %v8916_v22 }
 0x3b9   :  { %6349 = vmatprep.subr.bf16.mxu1 %v8921_v52 }
 0x3bc   :  { %6350 = vmatpush1.bf16.msra.mxu1 %v8919_v19 }
 0x3bd   :  { %6351 = vmatprep.subr.bf16.mxu1 %v8924_v23 }
 0x3c0   :  { %6352 = vmatpush1.bf16.msra.mxu1 %v8922_v24 }
 0x3c1   :  { %6353 = vmatprep.subr.bf16.mxu1 %v8927_v53 }
 0x3c4   :  { %6354 = vmatpush1.bf16.msra.mxu1 %v8925_v25 }
 0x3c5   :  { %6355 = vmatprep.subr.bf16.mxu1 %v8930_v21 }
 0x3c8   :  { %6356 = vmatpush1.bf16.msra.mxu1 %v8928_v13 }
 0x3c9   :  { %6357 = vmatprep.subr.bf16.mxu1 %v8933_v26 }
 0x3cc   :  { %6358 = vmatpush1.bf16.msra.mxu1 %v8931_v27 }
 0x3cd   :  { %6359 = vmatprep.subr.bf16.mxu1 %v8936_v28 }
 0x3d0   :  { %6360 = vmatpush1.bf16.msra.mxu1 %v8934_v29 }
 0x3d1   :  { %6361 = vmatprep.subr.bf16.mxu1 %v8939_v30 }
 0x3d4   :  { %6362 = vmatpush1.bf16.msra.mxu1 %v8937_v31 }
 0x3d5   :  { %6363 = vmatprep.subr.bf16.mxu1 %v8942_v32 }
 0x3d8   :  { %6364 = vmatpush1.bf16.msra.mxu1 %v8940_v33  ;;  %v8979_v33 = vld [vmem:[#allocation7 + $0xc18] ss:$28 sps:$4 sm:$0xff]  }
 0x3d9   :  { %6365 = vmatprep.subr.bf16.mxu1 %v8945_v34 }
 0x3dc   :  { %6366 = vmatpush1.bf16.msra.mxu1 %v8943_v35 }
 0x3dd   :  { %6367 = vmatprep.subr.bf16.mxu1 %v8948_v36 }
 0x3e0   :  { %6368 = vmatpush1.bf16.msra.mxu1 %v8946_v37 }
 0x3e1   :  { %6369 = vmatprep.subr.bf16.mxu1 %v8951_v38 }
 0x3e4   :  { %6370 = vmatpush1.bf16.msra.mxu1 %v8949_v39 }
 0x3e5   :  { %6371 = vmatprep.subr.bf16.mxu1 %v8954_v40 }
 0x3e8   :  { %6372 = vmatpush1.bf16.msra.mxu1 %v8952_v41 }
 0x3e9   :  { %6373 = vmatprep.subr.bf16.mxu1 %v8957_v44 }
 0x3ec   :  { %6374 = vmatpush1.bf16.msra.mxu1 %v8955_v45 }
 0x3ed   :  { %6386 = vmatprep.subr.bf16.mxu1 %v8960_v46 }
 0x3ef   :  { %6376 = vmatmul.mubr.bf16.vlgmr.msra.gmra.mrb[24].mxu1 %v9475_v11  ;;  %v8975_v11 = vld [vmem:[#allocation7 + $0xbac] ss:$28 sps:$4 sm:$0xff]  }
 0x3f0   :  { %6387 = vmatpush1.bf16.msra.mxu1 %v8958_v47  ;;  %6418 = vmatprep.mubr.bf16.mxu1 %v9195_v16  ;;  %v3865_v16 = vrot.slane %v9511_v3, %v9391_v59 }
 0x3f1   :  { %6388 = vmatprep.subr.bf16.mxu1 %v8963_v49 }
 0x3f4   :  { %6389 = vmatpush1.bf16.msra.mxu1 %v8961_v50 }
 0x3f5   :  { %6390 = vmatprep.subr.bf16.mxu1 %v8966_v51 }
 0x3f8   :  { %6391 = vmatpush1.bf16.msra.mxu1 %v8964_v54 }
 0x3f9   :  { %6392 = vmatprep.subr.bf16.mxu1 %v8969_v57 }
 0x3fc   :  { %6393 = vmatpush1.bf16.msra.mxu1 %v8967_v55 }
 0x3fd   :  { %6394 = vmatprep.subr.bf16.mxu1 %v8972_v1 }
 0x400   :  { %6395 = vmatpush1.bf16.msra.mxu1 %v8970_v2 }
 0x401   :  { %6396 = vmatprep.subr.bf16.mxu1 %v8975_v11 }
 0x402   :  { %v6076_v58 = vpop.f32.mrb[20].mxu1  ;;  %v6248_v12 = vpop.f32.mrb[8].mxu0 }
 0x403   :  { %v7757_v60 = vadd.f32 %v6076_v58, %v3865_v16  ;;  %v7761_v17 = vadd.f32 %v6248_v12, %v3873_v56  ;;  %v6078_v18 = vpop.f32.mrb[21].mxu1  ;;  %v6250_v20 = vpop.f32.mrb[9].mxu0 }
 0x404   :  { %v7758_v22 = vadd.f32 %v6078_v18, %v3869_v5  ;;  %v7762_v52 = vadd.f32 %v6250_v20, %v3877_v7  ;;  %v6080_v59 = vpop.f32.mrb[22].mxu1  ;;  %v6252_v19 = vpop.f32.mrb[10].mxu0  ;;  %6397 = vmatpush1.bf16.msra.mxu1 %v8973_v48 }
 0x405   :  { %vm6593_vm15 = vcmp.gt.f32.partialorder %v7757_v60, 0.0  ;;  %v6644_v23 = vmul.f32 %v7757_v60, %v6612_v8  ;;  %vm6595_vm0 = vcmp.gt.f32.partialorder %v7761_v17, 0.0  ;;  %v6646_v24 = vmul.f32 %v7761_v17, %v6620_v9  ;;  %v6082_v53 = vpop.f32.mrb[23].mxu1  ;;  %v6254_v25 = vpop.f32.mrb[11].mxu0  ;;  %6398 = vmatprep.subr.bf16.mxu1 %v8978_v10 }
 0x406   :  { %vm6594_vm1 = vcmp.gt.f32.partialorder %v7758_v22, 0.0  ;;  %v6645_v63 = vmul.f32 %v7758_v22, %v6616_v14  ;;  %vm6596_vm2 = vcmp.gt.f32.partialorder %v7762_v52, 0.0  ;;  %v6647_v21 = vmul.f32 %v7762_v52, %v6624_v15 }
 0x407   :  { %v6658_v13 = vsel %vm6593_vm15, %v7757_v60, %v6644_v23  ;;  %v6660_v26 = vsel %vm6595_vm0, %v7761_v17, %v6646_v24  ;;  %v7759_v27 = vadd.f32 %v6080_v59, %v3865_v16  ;;  %v7763_v28 = vadd.f32 %v6252_v19, %v3873_v56 }
 0x408   :  { %v6672_v29 = vsub.f32 0.0, %v6658_v13  ;;  %v6674_v30 = vsub.f32 0.0, %v6660_v26  ;;  %v6659_v31 = vsel %vm6594_vm1, %v7758_v22, %v6645_v63  ;;  %v6661_v32 = vsel %vm6596_vm2, %v7762_v52, %v6647_v21  ;;  %6399 = vmatpush1.bf16.msra.mxu1 %v8976_v61 }
 0x409   :  { %v6673_v34 = vsub.f32 0.0, %v6659_v31  ;;  %v6675_v35 = vsub.f32 0.0, %v6661_v32  ;;  %vm6600_vm3 = vcmp.gt.f32.partialorder %v7759_v27, 0.0  ;;  %v6651_v36 = vmul.f32 %v7759_v27, %v6612_v8  ;;  %6400 = vmatprep.subr.bf16.mxu1 %v8981_v62 }
 0x40a   :  { %v6686_v37 = vmul.f32 1.442695, %v6672_v29  ;;  %v6690_v38 = vmul.f32 1.442695, %v6674_v30  ;;  %vm6602_vm4 = vcmp.gt.f32.partialorder %v7763_v28, 0.0  ;;  %v6653_v39 = vmul.f32 %v7763_v28, %v6620_v9 }
 0x40b   :  { %v6688_v40 = vmul.f32 1.442695, %v6673_v34  ;;  %v6692_v41 = vmul.f32 1.442695, %v6675_v35  ;;  %v6665_v44 = vsel %vm6600_vm3, %v7759_v27, %v6651_v36  ;;  %v7760_v45 = vadd.f32 %v6082_v53, %v3869_v5 }
 0x40c   :  { %8982 = vpow2.f32 %v6686_v37  ;;  %v6679_v46 = vsub.f32 0.0, %v6665_v44  ;;  %v6667_v47 = vsel %vm6602_vm4, %v7763_v28, %v6653_v39  ;;  %v7764_v49 = vadd.f32 %v6254_v25, %v3877_v7  ;;  %6401 = vmatpush1.bf16.msra.mxu1 %v8979_v33 }
 0x40d   :  { %8984 = vpow2.f32 %v6690_v38  ;;  %v6681_v50 = vsub.f32 0.0, %v6667_v47  ;;  %vm6601_vm5 = vcmp.gt.f32.partialorder %v7760_v45, 0.0  ;;  %v6652_v51 = vmul.f32 %v7760_v45, %v6616_v14 }
 0x40e   :  { %8986 = vpow2.f32 %v6688_v40  ;;  %v6700_v54 = vmul.f32 1.442695, %v6679_v46  ;;  %vm6603_vm6 = vcmp.gt.f32.partialorder %v7764_v49, 0.0  ;;  %v6654_v57 = vmul.f32 %v7764_v49, %v6624_v15 }
 0x40f   :  { %8988 = vpow2.f32 %v6692_v41  ;;  %v6704_v55 = vmul.f32 1.442695, %v6681_v50  ;;  %v6666_v1 = vsel %vm6601_vm5, %v7760_v45, %v6652_v51  ;;  %6419 = vmatmul.mubr.bf16.vlgmr.msra.gmra.mrb[24].mxu1 %v9462_v6  ;;  %v3889_v29 = vrot.slane %v9511_v3, %v9442_v0 }
 0x410   :  { %8990 = vpow2.f32 %v6700_v54  ;;  %v6680_v2 = vsub.f32 0.0, %v6666_v1  ;;  %v6668_v11 = vsel %vm6603_vm6, %v7764_v49, %v6654_v57  ;;  %v6636_v51 = vrot.slane %v9513_v4, %v9442_v0 }
 0x411   :  { %8992 = vpow2.f32 %v6704_v55  ;;  %v6682_v16 = vsub.f32 0.0, %v6668_v11 }
 0x412   :  { %v6702_v56 = vmul.f32 1.442695, %v6680_v2 }
 0x413   :  { %v6706_v5 = vmul.f32 1.442695, %v6682_v16 }
 0x414   :  { %8994 = vpow2.f32 %v6702_v56 }
 0x415   :  { %8996 = vpow2.f32 %v6706_v5 }
 0x416   :  { %v8983_v7 = vpop.eup %8982 }
 0x417   :  { %v8985_v48 = vpop.eup %8984  ;;  %v6714_v8 = vadd.f32 1.0, %v8983_v7 }
 0x418   :  { %v8987_v9 = vpop.eup %8986  ;;  %v6716_v10 = vadd.f32 1.0, %v8985_v48 }
 0x419   :  { %v8989_v58 = vpop.eup %8988  ;;  %8998 = vrcp.f32 %v6714_v8  ;;  %v6715_v12 = vadd.f32 1.0, %v8987_v9 }
 0x41a   :  { %v8991_v14 = vpop.eup %8990  ;;  %9000 = vrcp.f32 %v6716_v10  ;;  %v6717_v6 = vadd.f32 1.0, %v8989_v58 }
 0x41b   :  { %v8993_v15 = vpop.eup %8992  ;;  %9002 = vrcp.f32 %v6715_v12  ;;  %v6721_v60 = vadd.f32 1.0, %v8991_v14 }
 0x41c   :  { %9004 = vrcp.f32 %v6717_v6  ;;  %v6723_v17 = vadd.f32 1.0, %v8993_v15 }
 0x41d   :  { %9006 = vrcp.f32 %v6721_v60  ;;  %v3881_v60 = vrot.slane %v9511_v3, %v9466_v42 }
 0x41e   :  { %v8995_v18 = vpop.eup %8994  ;;  %9008 = vrcp.f32 %v6723_v17  ;;  %v3885_v17 = vrot.slane %v9511_v3, %v9469_v43 }
 0x41f   :  { %v8997_v20 = vpop.eup %8996  ;;  %v6722_v22 = vadd.f32 1.0, %v8995_v18  ;;  %v6628_v18 = vrot.slane %v9513_v4, %v9466_v42 }
 0x420   :  { %v6724_v52 = vadd.f32 1.0, %v8997_v20 }
 0x421   :  { %9010 = vrcp.f32 %v6722_v22  ;;  %v6632_v22 = vrot.slane %v9513_v4, %v9469_v43 }
 0x422   :  { %9012 = vrcp.f32 %v6724_v52 }
 0x423   :  { %v8999_v59 = vpop.eup %8998  ;;  %v7646_v19 = vpop.f32.mrb[12].mxu0 }
 0x424   :  { %v9001_v61 = vpop.eup %9000  ;;  %6742 = vst [vmem:[%s9593_s7] sm:$0xff] %v8999_v59  ;;  %v7647_v23 = vpop.f32.mrb[13].mxu0 }
 0x425   :  { %v9003_v24 = vpop.eup %9002  ;;  %6744 = vst [vmem:[%s9593_s7 + $0x10] sm:$0xff] %v9001_v61  ;;  %v7648_v53 = vadd.f32 %v7647_v23, %v7646_v19  ;;  %v7649_v25 = vpop.f32.mrb[14].mxu0 }
 0x426   :  { %v9005_v62 = vpop.eup %9004  ;;  %6743 = vst [vmem:[%s9593_s7 + $0x8] sm:$0xff] %v9003_v24  ;;  %v7650_v63 = vpop.f32.mrb[15].mxu0 }
 0x427   :  { %v9007_v21 = vpop.eup %9006  ;;  %6745 = vst [vmem:[%s9593_s7 + $0x18] sm:$0xff] %v9005_v62  ;;  %v7651_v13 = vadd.f32 %v7650_v63, %v7649_v25  ;;  %v6464_v32 = vadd.f32 %v7648_v53, %v3889_v29 }
 0x428   :  { %v9009_v26 = vpop.eup %9008  ;;  %6749 = vst [vmem:[%s9593_s7 + $0x38] sm:$0xff] %v9007_v21 }
 0x429   :  { %6751 = vst [vmem:[%s9593_s7 + $0x48] sm:$0xff] %v9009_v26  ;;  %v6467_v36 = vadd.f32 %v7651_v13, %v3889_v29 }
 0x42b   :  { %v9011_v27 = vpop.eup %9010 }
 0x42c   :  { %v9013_v28 = vpop.eup %9012  ;;  %6750 = vst [vmem:[%s9593_s7 + $0x40] sm:$0xff] %v9011_v27 }
 0x42d   :  { %6752 = vst [vmem:[%s9593_s7 + $0x50] sm:$0xff] %v9013_v28 }
 0x443   :  { %v7668_v30 = vpop.f32.mrb[16].mxu0 }
 0x444   :  { %v7669_v31 = vpop.f32.mrb[17].mxu0 }
 0x445   :  { %v7670_v33 = vadd.f32 %v7669_v31, %v7668_v30  ;;  %v7671_v34 = vpop.f32.mrb[18].mxu0 }
 0x446   :  { %v7672_v35 = vpop.f32.mrb[19].mxu0 }
 0x447   :  { %v6505_v37 = vadd.f32 %v7670_v33, %v6464_v32  ;;  %v7673_v38 = vadd.f32 %v7672_v35, %v7671_v34 }
 0x449   :  { %v6508_v39 = vadd.f32 %v7673_v38, %v6467_v36 }
 0x463   :  { %v7690_v40 = vpop.f32.mrb[20].mxu0 }
 0x464   :  { %v7691_v41 = vpop.f32.mrb[21].mxu0 }
 0x465   :  { %v7692_v44 = vadd.f32 %v7691_v41, %v7690_v40  ;;  %v7693_v45 = vpop.f32.mrb[22].mxu0 }
 0x466   :  { %v7694_v46 = vpop.f32.mrb[23].mxu0 }
 0x467   :  { %v7695_v47 = vadd.f32 %v7694_v46, %v7693_v45  ;;  %v6546_v49 = vadd.f32 %v7692_v44, %v6505_v37 }
 0x469   :  { %v6549_v50 = vadd.f32 %v7695_v47, %v6508_v39 }
 0x483   :  { %v6586_v54 = vpop.f32.mrb[24].mxu0 }
 0x484   :  { %v6587_v57 = vadd.f32 %v6586_v54, %v6546_v49  ;;  %v7743_v55 = vpop.f32.mrb[25].mxu0 }
 0x485   :  { %v6589_v1 = vpop.f32.mrb[26].mxu0 }
 0x486   :  { %vm6599_vm7 = vcmp.gt.f32.partialorder %v6587_v57, 0.0  ;;  %v6650_v2 = vmul.f32 %v6636_v51, %v6587_v57  ;;  %v6590_v11 = vadd.f32 %v6589_v1, %v6549_v50  ;;  %v7744_v16 = vpop.f32.mrb[27].mxu0 }
 0x488   :  { %v6664_v56 = vsel %vm6599_vm7, %v6587_v57, %v6650_v2  ;;  %vm6606_vm8 = vcmp.gt.f32.partialorder %v6590_v11, 0.0  ;;  %v6657_v5 = vmul.f32 %v6636_v51, %v6590_v11 }
 0x489   :  { %v6678_v7 = vsub.f32 0.0, %v6664_v56 }
 0x48a   :  { %v6671_v48 = vsel %vm6606_vm8, %v6590_v11, %v6657_v5 }
 0x48b   :  { %v6698_v8 = vmul.f32 1.442695, %v6678_v7  ;;  %v6685_v9 = vsub.f32 0.0, %v6671_v48 }
 0x48d   :  { %9014 = vpow2.f32 %v6698_v8  ;;  %v6712_v10 = vmul.f32 1.442695, %v6685_v9 }
 0x48f   :  { %9016 = vpow2.f32 %v6712_v10 }
 0x497   :  { %v9015_v58 = vpop.eup %9014 }
 0x498   :  { %v6720_v0 = vadd.f32 1.0, %v9015_v58 }
 0x499   :  { %v9017_v12 = vpop.eup %9016 }
 0x49a   :  { %9018 = vrcp.f32 %v6720_v0  ;;  %v6727_v14 = vadd.f32 1.0, %v9017_v12 }
 0x49c   :  { %9020 = vrcp.f32 %v6727_v14 }
 0x4a4   :  { %v9019_v6 = vpop.eup %9018 }
 0x4a5   :  { %6748 = vst [vmem:[%s9593_s7 + $0x30] sm:$0xff] %v9019_v6 }
 0x4a6   :  { %v9021_v15 = vpop.eup %9020 }
 0x4a7   :  { %6755 = vst [vmem:[%s9593_s7 + $0x68] sm:$0xff] %v9021_v15 }
 0x4e2   :  { %v6420_v20 = vpop.f32.mrb[24].mxu1 }
 0x4e3   :  { %v7765_v52 = vadd.f32 %v6420_v20, %v3881_v60  ;;  %v6422_v59 = vpop.f32.mrb[25].mxu1 }
 0x4e4   :  { %v7766_v19 = vadd.f32 %v6422_v59, %v3885_v17  ;;  %v6424_v61 = vpop.f32.mrb[26].mxu1 }
 0x4e5   :  { %vm6597_vm9 = vcmp.gt.f32.partialorder %v7765_v52, 0.0  ;;  %v6648_v23 = vmul.f32 %v7765_v52, %v6628_v18  ;;  %v7767_v24 = vadd.f32 %v6424_v61, %v3881_v60  ;;  %v6426_v53 = vpop.f32.mrb[27].mxu1 }
 0x4e6   :  { %vm6598_vm10 = vcmp.gt.f32.partialorder %v7766_v19, 0.0  ;;  %v6649_v25 = vmul.f32 %v7766_v19, %v6632_v22  ;;  %v7768_v62 = vadd.f32 %v6426_v53, %v3885_v17 }
 0x4e7   :  { %v6662_v63 = vsel %vm6597_vm9, %v7765_v52, %v6648_v23  ;;  %vm6604_vm11 = vcmp.gt.f32.partialorder %v7767_v24, 0.0  ;;  %v6655_v3 = vmul.f32 %v7767_v24, %v6628_v18 }
 0x4e8   :  { %v6676_v21 = vsub.f32 0.0, %v6662_v63  ;;  %v6663_v42 = vsel %vm6598_vm10, %v7766_v19, %v6649_v25  ;;  %vm6605_vm12 = vcmp.gt.f32.partialorder %v7768_v62, 0.0  ;;  %v6656_v13 = vmul.f32 %v7768_v62, %v6632_v22 }
 0x4e9   :  { %v6677_v26 = vsub.f32 0.0, %v6663_v42  ;;  %v6669_v43 = vsel %vm6604_vm11, %v7767_v24, %v6655_v3 }
 0x4ea   :  { %v6694_v4 = vmul.f32 1.442695, %v6676_v21  ;;  %v6683_v27 = vsub.f32 0.0, %v6669_v43  ;;  %v6670_v28 = vsel %vm6605_vm12, %v7768_v62, %v6656_v13 }
 0x4eb   :  { %v6696_v29 = vmul.f32 1.442695, %v6677_v26  ;;  %v6684_v30 = vsub.f32 0.0, %v6670_v28 }
 0x4ec   :  { %9022 = vpow2.f32 %v6694_v4  ;;  %v6708_v31 = vmul.f32 1.442695, %v6683_v27 }
 0x4ed   :  { %9024 = vpow2.f32 %v6696_v29  ;;  %v6710_v32 = vmul.f32 1.442695, %v6684_v30 }
 0x4ee   :  { %9026 = vpow2.f32 %v6708_v31 }
 0x4ef   :  { %9028 = vpow2.f32 %v6710_v32 }
 0x4f6   :  { %v9023_v33 = vpop.eup %9022 }
 0x4f7   :  { %v9025_v34 = vpop.eup %9024  ;;  %v6718_v35 = vadd.f32 1.0, %v9023_v33 }
 0x4f8   :  { %v9027_v36 = vpop.eup %9026  ;;  %v6719_v37 = vadd.f32 1.0, %v9025_v34 }
 0x4f9   :  { %v9029_v38 = vpop.eup %9028  ;;  %9030 = vrcp.f32 %v6718_v35  ;;  %v6725_v39 = vadd.f32 1.0, %v9027_v36 }
 0x4fa   :  { %9032 = vrcp.f32 %v6719_v37  ;;  %v6726_v40 = vadd.f32 1.0, %v9029_v38 }
 0x4fb   :  { %9034 = vrcp.f32 %v6725_v39 }
 0x4fc   :  { %9036 = vrcp.f32 %v6726_v40 }
 0x503   :  { %v9031_v41 = vpop.eup %9030 }
 0x504   :  { %v9033_v44 = vpop.eup %9032  ;;  %6746 = vst [vmem:[%s9593_s7 + $0x20] sm:$0xff] %v9031_v41 }
 0x505   :  { %v9035_v45 = vpop.eup %9034  ;;  %6747 = vst [vmem:[%s9593_s7 + $0x28] sm:$0xff] %v9033_v44 }
 0x506   :  { %v9037_v46 = vpop.eup %9036  ;;  %6753 = vst [vmem:[%s9593_s7 + $0x58] sm:$0xff] %v9035_v45 }
 0x507   :  { %6754 = vst [vmem:[%s9593_s7 + $0x60] sm:$0xff] %v9037_v46 }
 0x508   :  { %6760 = vsyncpa [#allocation3], 1 }
 0x509   :  { %6761 = vsyncpa [#allocation5], 1 }
 0x50a   :  { %6762 = vsyncpa [#allocation8], 1 }
 0x50b   :  { %6763 = vsyncpa [#allocation11], 1 }

</bundles_post_ra>
